<compile_context>
chip_gen: v7x
topology: tpu7x:2x2x1
jax: 0.10.0
libtpu: 0.0.40
codegen_flags: <defaults>
</compile_context>

<pallas_src>
import functools

import jax
import jax.numpy as jnp
from jax import lax
from jax.experimental import pallas as pl
from jax.experimental.pallas import tpu as pltpu

EPS_LN = 1e-5
EPS_BN = 1e-5
VMEM_LIMIT = 48 * 1024 * 1024  # above default scoped limits, below v7x physical


def _round_up(x, m):
    return ((x + m - 1) // m) * m


def _row_tile(m, cap=256):
    """Biggest row tile: the whole (8-padded) extent if it fits, else `cap`."""
    return _round_up(max(m, 1), 8) if m <= cap else cap


def _pad_rows(x, tm):
    m = x.shape[0]
    mp = _round_up(m, tm)
    if mp != m:
        x = jnp.pad(x, ((0, mp - m), (0, 0)))
    return x, m


def _cparams(sem):
    return pltpu.CompilerParams(dimension_semantics=sem,
                                vmem_limit_bytes=VMEM_LIMIT)


# ----------------------------- Pallas kernels -----------------------------

def _matmul_bias_kernel(x_ref, w_ref, b_ref, o_ref):
    o_ref[...] = (jnp.dot(x_ref[...], w_ref[...],
                          preferred_element_type=jnp.float32)
                  + b_ref[...]).astype(o_ref.dtype)


def matmul_bias(x, w, b):
    """(M, K) @ (K, N) + b, tiled over rows (patch-embed / SPM / up-proj)."""
    m0, k = x.shape
    n = w.shape[1]
    tm = _row_tile(m0)
    xp, m = _pad_rows(x, tm)
    mp = xp.shape[0]
    cost = pl.CostEstimate(flops=int(2 * mp * k * n),
                           transcendentals=0,
                           bytes_accessed=int(4 * (mp * k + k * n + n + mp * n)))
    out = pl.pallas_call(
        _matmul_bias_kernel,
        out_shape=jax.ShapeDtypeStruct((mp, n), jnp.float32),
        grid=(mp // tm,),
        in_specs=[pl.BlockSpec((tm, k), lambda i: (i, 0)),
                  pl.BlockSpec((k, n), lambda i: (0, 0)),    # weight resident
                  pl.BlockSpec((1, n), lambda i: (0, 0))],   # bias resident
        out_specs=pl.BlockSpec((tm, n), lambda i: (i, 0)),
        compiler_params=_cparams(("parallel",)),
        cost_estimate=cost,
    )(xp, w, b.reshape(1, n))
    return out[:m]


def _fused_blocks_kernel(x_ref, r_ref, lnw_ref, lnb_ref, wa_ref, ba_ref,
                         wg_ref, bg_ref, wo_ref, bo_ref, xo_ref, ro_ref):
    """A stack of Block layers (Add -> LayerNorm -> Mixer) fused in one kernel."""
    nl = lnw_ref.shape[0]
    x = x_ref[...]
    r = r_ref[...]
    # Statically unrolled layer loop: the stacked weights stay VMEM-resident
    # and activations never leave VMEM between layers.  (For very deep stacks
    # this could become a lax.fori_loop over the same stacked refs.)
    for l in range(nl):
        r = r + x                                              # Add
        mu = jnp.mean(r, axis=-1, keepdims=True)               # LayerNorm
        var = jnp.mean(jnp.square(r - mu), axis=-1, keepdims=True)
        y = (r - mu) * lax.rsqrt(var + EPS_LN) * lnw_ref[l] + lnb_ref[l]
        # Mixer: two lane-aligned in-projections (no in-kernel column split).
        a = jnp.dot(y, wa_ref[l], preferred_element_type=jnp.float32) + ba_ref[l]
        g = jnp.dot(y, wg_ref[l], preferred_element_type=jnp.float32) + bg_ref[l]
        # TODO(synk): Mamba selective-scan SSM + causal depthwise conv1d are not
        # in the provided reference code; a gated-linear mixer stands in.
        h = a * jax.nn.silu(g)
        x = jnp.dot(h, wo_ref[l], preferred_element_type=jnp.float32) + bo_ref[l]
    xo_ref[...] = x
    ro_ref[...] = r


def fused_blocks(x, res, stack):
    """One pallas_call for the whole per-interaction stack of Mamba blocks."""
    m0, dim = x.shape
    tm = _row_tile(m0)
    xp, m = _pad_rows(x, tm)
    rp, _ = _pad_rows(res, tm)
    mp = xp.shape[0]
    nl = stack["ln_w"].shape[0]

    row = pl.BlockSpec((tm, dim), lambda i: (i, 0))
    vec = pl.BlockSpec((nl, 1, dim), lambda i: (0, 0, 0))
    mat = pl.BlockSpec((nl, dim, dim), lambda i: (0, 0, 0))
    cost = pl.CostEstimate(
        flops=int(nl * mp * (6 * dim * dim + 12 * dim)),
        transcendentals=int(nl * mp * dim),
        bytes_accessed=int(4 * (4 * mp * dim + nl * (3 * dim * dim + 5 * dim))))
    xo, ro = pl.pallas_call(
        _fused_blocks_kernel,
        out_shape=(jax.ShapeDtypeStruct((mp, dim), jnp.float32),
                   jax.ShapeDtypeStruct((mp, dim), jnp.float32)),
        grid=(mp // tm,),
        in_specs=[row, row, vec, vec, mat, vec, mat, vec, mat, vec],
        out_specs=(row, row),
        compiler_params=_cparams(("parallel",)),
        cost_estimate=cost,
    )(xp, rp, stack["ln_w"], stack["ln_b"], stack["wa"], stack["ba"],
      stack["wg"], stack["bg"], stack["wo"], stack["bo"])
    return xo[:m], ro[:m]


def _bn_kernel(x_ref, w_ref, b_ref, fold_ref, o_ref, mu_ref, s2_ref, *, n_total):
    """Two-phase BatchNorm: phase 0 accumulates per-lane sums over row tiles,
    phase 1 folds lane groups into per-channel stats and normalizes."""
    p = pl.program_id(0)
    j = pl.program_id(1)

    @pl.when((p == 0) & (j == 0))
    def _():
        mu_ref[...] = jnp.zeros_like(mu_ref)
        s2_ref[...] = jnp.zeros_like(s2_ref)

    @pl.when(p == 0)
    def _():
        x = x_ref[...]
        mu_ref[...] += jnp.sum(x, axis=0, keepdims=True)
        s2_ref[...] += jnp.sum(x * x, axis=0, keepdims=True)

    @pl.when((p == 1) & (j == 0))
    def _():
        inv_n = 1.0 / float(n_total)
        s = jnp.dot(mu_ref[...], fold_ref[...], preferred_element_type=jnp.float32)
        q = jnp.dot(s2_ref[...], fold_ref[...], preferred_element_type=jnp.float32)
        mean = s * inv_n
        var = q * inv_n - mean * mean
        mu_ref[...] = mean
        s2_ref[...] = lax.rsqrt(var + EPS_BN)

    @pl.when(p == 1)
    def _():
        o_ref[...] = ((x_ref[...] - mu_ref[...]) * s2_ref[...]
                      * w_ref[...] + b_ref[...])


def batchnorm_tokens(tok, w, b):
    """BatchNorm over (N, C) tokens with batch statistics, lane-dense packing.

    TODO(synk): reference is SyncBatchNorm; the cross-device statistic
    all-reduce is not implemented (single-device batch statistics only).
    """
    n, c = tok.shape
    g = 128 // c if (c <= 128 and 128 % c == 0 and n % (128 // c) == 0) else 1
    lanes = c * g
    r0 = n // g
    x2 = tok.reshape(r0, lanes)                  # pack g tokens per lane row
    tn = _row_tile(r0, cap=512)
    x2, _ = _pad_rows(x2, tn)                    # zero rows don't bias sums
    rp = x2.shape[0]
    nt = rp // tn

    lane = jnp.arange(lanes)
    fold = (lane[:, None] % c == lane[None, :] % c).astype(jnp.float32)
    w_l = jnp.tile(w, g).reshape(1, lanes)
    b_l = jnp.tile(b, g).reshape(1, lanes)

    kern = functools.partial(_bn_kernel, n_total=n)
    cost = pl.CostEstimate(
        flops=int(10 * rp * lanes + 4 * lanes * lanes),
        transcendentals=int(lanes),
        bytes_accessed=int(4 * (3 * rp * lanes + lanes * lanes + 4 * lanes)))
    out = pl.pallas_call(
        kern,
        out_shape=jax.ShapeDtypeStruct((rp, lanes), jnp.float32),
        grid=(2, nt),
        in_specs=[pl.BlockSpec((tn, lanes), lambda p, j: (j, 0)),
                  pl.BlockSpec((1, lanes), lambda p, j: (0, 0)),
                  pl.BlockSpec((1, lanes), lambda p, j: (0, 0)),
                  pl.BlockSpec((lanes, lanes), lambda p, j: (0, 0))],
        out_specs=pl.BlockSpec((tn, lanes), lambda p, j: (j, 0)),
        scratch_shapes=[pltpu.VMEM((1, lanes), jnp.float32),
                        pltpu.VMEM((1, lanes), jnp.float32)],
        compiler_params=_cparams(("arbitrary", "arbitrary")),
        cost_estimate=cost,
    )(x2, w_l, b_l, fold)
    return out[:r0].reshape(n, c)


def batchnorm_to_nchw(x_nhwc, w, b):
    bsz, h, wd, c = x_nhwc.shape
    y = batchnorm_tokens(x_nhwc.reshape(bsz * h * wd, c), w, b)
    return y.reshape(bsz, h, wd, c).transpose(0, 3, 1, 2)


# ------------------------------- JAX glue ---------------------------------

def extract_patches(x_nchw, p):
    """NCHW image -> (B, h, w, C*p*p) non-overlapping channel-last patches."""
    bsz, c, hh, ww = x_nchw.shape
    h, w = hh // p, ww // p
    x = x_nchw.reshape(bsz, c, h, p, w, p).transpose(0, 2, 4, 1, 3, 5)
    return x.reshape(bsz, h, w, c * p * p), h, w


def conv_transpose2x2_nhwc(x_nhwc, w, b):
    """ConvTranspose2d(kernel=2, stride=2) as Pallas matmul + depth-to-space."""
    bsz, h, wd, cin = x_nhwc.shape
    co = w.shape[1] // 4
    tok = x_nhwc.reshape(bsz * h * wd, cin)
    y = matmul_bias(tok, w, jnp.repeat(b, 4))     # cols ordered (co, kh, kw)
    y = y.reshape(bsz, h, wd, co, 2, 2).transpose(0, 1, 4, 2, 5, 3)
    return y.reshape(bsz, 2 * h, 2 * wd, co)


def upsample_bilinear_nhwc(x, f):
    bsz, h, w, c = x.shape
    return jax.image.resize(x, (bsz, h * f, w * f, c), method="bilinear")


def downsample_half_nhwc(x):
    # F.interpolate(scale_factor=0.5, bilinear, align_corners=False) == 2x2 mean
    bsz, h, w, c = x.shape
    return x.reshape(bsz, h // 2, 2, w // 2, 2, c).mean(axis=(2, 4))


# ------------------------------ full forward -------------------------------

def mamba_adapter_forward(cfg, params, x_img):
    bsz = x_img.shape[0]
    dim = cfg["dim"]
    patch = cfg["patch_size"]

    # ---- SpatialPriorModule (stand-in: patchify + linear per pyramid level) ----
    # TODO(synk): real SPM is a ResNet-style conv stem; not in the reference code.
    spm = {}
    for name, s in (("c1", patch // 4), ("c2", patch // 2),
                    ("c3", patch), ("c4", patch * 2)):
        pt, h, w = extract_patches(x_img, s)
        tok = matmul_bias(pt.reshape(-1, pt.shape[-1]),
                          params[f"spm_w_{name}"], params[f"spm_b_{name}"])
        spm[name] = (tok, h, w)

    c1_tok, h1, w1 = spm["c1"]
    c1 = c1_tok.reshape(bsz, h1, w1, dim)                       # NHWC (4H, 4W)
    c2 = spm["c2"][0].reshape(bsz, -1, dim)
    c3 = spm["c3"][0].reshape(bsz, -1, dim)
    c4 = spm["c4"][0].reshape(bsz, -1, dim)

    # _add_level_embed + concat
    le = params["level_embed"]
    c2, c3, c4 = c2 + le[0], c3 + le[1], c4 + le[2]
    n2, n3 = c2.shape[1], c3.shape[1]
    c = jnp.concatenate([c2, c3, c4], axis=1)

    # ---- patch embed (Conv2d with kernel == stride -> patchify + matmul) ----
    pt, H, W = extract_patches(x_img, patch)
    x_tok = matmul_bias(pt.reshape(-1, pt.shape[-1]),
                        params["patch_w"], params["patch_b"])
    x = x_tok.reshape(bsz, H * W, dim)
    # pos embed; resize_pos_embed is identity here (src_shape == dst_shape)
    x = x + params["pos_embed"]

    # ---- interactions: fused Add -> LN -> Mixer stacks ----
    # TODO(synk): MSDeformAttn injector/extractor + CFFN of InteractionBlock are
    # not in the reference code; only the backbone blocks run and c passes through.
    outs = []
    L = x.shape[1]
    x2d = x.reshape(bsz * L, dim)
    r2d = jnp.zeros_like(x2d)          # residual=None -> residual = hidden_states
    blocks = params["blocks"]
    for pair in cfg["interaction_indexes"]:
        i0, i1 = pair[0], pair[-1]
        stack = {k: v[i0:i1 + 1] for k, v in blocks.items()}
        x2d, r2d = fused_blocks(x2d, r2d, stack)
        outs.append(x2d.reshape(bsz, H, W, dim))                # NHWC

    # ---- split c back into pyramid levels (NHWC, free reshapes) ----
    c2 = c[:, :n2].reshape(bsz, 2 * H, 2 * W, dim)
    c3 = c[:, n2:n2 + n3].reshape(bsz, H, W, dim)
    c4 = c[:, n2 + n3:].reshape(bsz, H // 2, W // 2, dim)

    # c1 = up(c2) + c1
    c1 = conv_transpose2x2_nhwc(c2, params["up_w"], params["up_b"]) + c1

    # add_mamba_feature
    x1, x2, x3, x4 = outs
    x1 = upsample_bilinear_nhwc(x1, 4)
    x2 = upsample_bilinear_nhwc(x2, 2)
    x4 = downsample_half_nhwc(x4)
    c1, c2, c3, c4 = c1 + x1, c2 + x2, c3 + x3, c4 + x4

    f1 = batchnorm_to_nchw(c1, params["bn1_w"], params["bn1_b"])
    f2 = batchnorm_to_nchw(c2, params["bn2_w"], params["bn2_b"])
    f3 = batchnorm_to_nchw(c3, params["bn3_w"], params["bn3_b"])
    f4 = batchnorm_to_nchw(c4, params["bn4_w"], params["bn4_b"])
    return [f1, f2, f3, f4]


# ------------------------------ config / params ----------------------------

def make_config(img=32, patch=8, dim=32, depth=4,
                interaction_indexes=((0, 0), (1, 1), (2, 2), (3, 3))):
    return {"img": img, "patch_size": patch, "dim": dim, "depth": depth,
            "interaction_indexes": tuple(tuple(p) for p in interaction_indexes)}


def init_params(key, cfg):
    img, patch, dim, depth = cfg["img"], cfg["patch_size"], cfg["dim"], cfg["depth"]
    keys = jax.random.split(key, 32)
    ki = iter(keys)

    def nrm(shape, std=0.02):
        return std * jax.random.normal(next(ki), shape, jnp.float32)

    params = {
        "patch_w": nrm((3 * patch * patch, dim)),
        "patch_b": jnp.zeros((dim,), jnp.float32),
        "pos_embed": nrm((1, (img // patch) ** 2, dim)),
        "level_embed": jax.random.normal(next(ki), (3, dim), jnp.float32),
        "up_w": nrm((dim, dim * 4), std=(2.0 / (2 * 2 * dim)) ** 0.5),
        "up_b": jnp.zeros((dim,), jnp.float32),
    }
    for name, s in (("c1", patch // 4), ("c2", patch // 2),
                    ("c3", patch), ("c4", patch * 2)):
        params[f"spm_w_{name}"] = nrm((3 * s * s, dim))
        params[f"spm_b_{name}"] = jnp.zeros((dim,), jnp.float32)
    params["blocks"] = {                      # stacked per-layer block weights
        "ln_w": jnp.ones((depth, 1, dim), jnp.float32),
        "ln_b": jnp.zeros((depth, 1, dim), jnp.float32),
        "wa": nrm((depth, dim, dim)),
        "ba": jnp.zeros((depth, 1, dim), jnp.float32),
        "wg": nrm((depth, dim, dim)),
        "bg": jnp.zeros((depth, 1, dim), jnp.float32),
        "wo": nrm((depth, dim, dim)),
        "bo": jnp.zeros((depth, 1, dim), jnp.float32),
    }
    for n in ("bn1", "bn2", "bn3", "bn4"):
        params[f"{n}_w"] = jnp.ones((dim,), jnp.float32)
        params[f"{n}_b"] = jnp.zeros((dim,), jnp.float32)
    return params


if __name__ == "__main__":
    key = jax.random.PRNGKey(0)
    kp, kx = jax.random.split(key)
    cfg = make_config()
    params = init_params(kp, cfg)
    x = jax.random.normal(kx, (2, 3, cfg["img"], cfg["img"]), jnp.float32)  # NCHW

    fwd = jax.jit(lambda p, xi: mamba_adapter_forward(cfg, p, xi))
    feats = fwd(params, x)
    feats = jax.block_until_ready(feats)

    assert feats[0].shape == (2, 32, 16, 16)
    assert feats[1].shape == (2, 32, 8, 8)
    assert feats[2].shape == (2, 32, 4, 4)
    assert feats[3].shape == (2, 32, 2, 2)
    assert all(bool(jnp.isfinite(f).all()) for f in feats)
    print("KERNEL_OK")
</pallas_src>

<mosaic_0001>
module attributes {stable_mosaic.version = 11 : i64} {
  func.func @_matmul_bias_kernel(%arg0: i32, %arg1: memref<128x48xf32, #tpu.memory_space<vmem>>, %arg2: memref<48x32xf32, #tpu.memory_space<vmem>>, %arg3: memref<1x32xf32, #tpu.memory_space<vmem>>, %arg4: memref<128x32xf32, #tpu.memory_space<vmem>>) attributes {dimension_semantics = [#tpu.dimension_semantics<parallel>], iteration_bounds = array<i64: 1>, scalar_prefetch = 0 : i64, scratch_operands = 0 : i64, tpu.core_type = #tpu.core_type<tc>, window_params = [{transform_indices = @transform_0, window_bounds = array<i64: 128, 48>}, {pipeline_mode = #tpu.pipeline_mode<synchronous>, transform_indices = @transform_1, window_bounds = array<i64: 48, 32>}, {pipeline_mode = #tpu.pipeline_mode<synchronous>, transform_indices = @transform_2, window_bounds = array<i64: 1, 32>}, {transform_indices = @transform_3, window_bounds = array<i64: 128, 32>}]} {
    %c0 = arith.constant 0 : index
    %c0_0 = arith.constant 0 : index
    %0 = vector.load %arg1[%c0, %c0_0] : memref<128x48xf32, #tpu.memory_space<vmem>>, vector<128x48xf32>
    %c0_1 = arith.constant 0 : index
    %c0_2 = arith.constant 0 : index
    %1 = vector.load %arg2[%c0_1, %c0_2] : memref<48x32xf32, #tpu.memory_space<vmem>>, vector<48x32xf32>
    %cst = arith.constant dense<0.000000e+00> : vector<128x32xf32>
    %2 = tpu.matmul %0, %1, %cst {dimension_numbers = #tpu.dot_dimension_numbers<[1], [0], [0], [1], [0, 0, 1, 1], [], []>} : vector<128x48xf32>, vector<48x32xf32>, vector<128x32xf32> -> vector<128x32xf32>
    %c0_3 = arith.constant 0 : index
    %c0_4 = arith.constant 0 : index
    %3 = vector.load %arg3[%c0_3, %c0_4] : memref<1x32xf32, #tpu.memory_space<vmem>>, vector<1x32xf32>
    %4 = vector.broadcast %3 : vector<1x32xf32> to vector<128x32xf32>
    %5 = arith.addf %2, %4 : vector<128x32xf32>
    %c0_5 = arith.constant 0 : index
    %c0_6 = arith.constant 0 : index
    %6 = vector.load %arg4[%c0_5, %c0_6] : memref<128x32xf32, #tpu.memory_space<vmem>>, vector<128x32xf32>
    tpu.vector_store %arg4[%c0_5, %c0_6], %5 {strides = array<i32>} : memref<128x32xf32, #tpu.memory_space<vmem>>, vector<128x32xf32>,
    return
  }
  func.func @transform_0(%arg0: i32) -> (i32, i32) {
    %c0_i32 = arith.constant 0 : i32
    %c0_i32_0 = arith.constant 0 : i32
    return %arg0, %c0_i32 : i32, i32
  }
  func.func @transform_1(%arg0: i32) -> (i32, i32) {
    %c0_i32 = arith.constant 0 : i32
    %c0_i32_0 = arith.constant 0 : i32
    %c0_i32_1 = arith.constant 0 : i32
    return %c0_i32, %c0_i32_0 : i32, i32
  }
  func.func @transform_2(%arg0: i32) -> (i32, i32) {
    %c0_i32 = arith.constant 0 : i32
    %c0_i32_0 = arith.constant 0 : i32
    %c0_i32_1 = arith.constant 0 : i32
    return %c0_i32, %c0_i32_0 : i32, i32
  }
  func.func @transform_3(%arg0: i32) -> (i32, i32) {
    %c0_i32 = arith.constant 0 : i32
    %c0_i32_0 = arith.constant 0 : i32
    return %arg0, %c0_i32 : i32, i32
  }
}

module attributes {stable_mosaic.version = 11 : i64} {
  func.func @_matmul_bias_kernel(%arg0: i32, %arg1: memref<128x32xf32, #tpu.memory_space<vmem>>, %arg2: memref<32x128xf32, #tpu.memory_space<vmem>>, %arg3: memref<1x128xf32, #tpu.memory_space<vmem>>, %arg4: memref<128x128xf32, #tpu.memory_space<vmem>>) attributes {dimension_semantics = [#tpu.dimension_semantics<parallel>], iteration_bounds = array<i64: 1>, scalar_prefetch = 0 : i64, scratch_operands = 0 : i64, tpu.core_type = #tpu.core_type<tc>, window_params = [{transform_indices = @transform_0, window_bounds = array<i64: 128, 32>}, {pipeline_mode = #tpu.pipeline_mode<synchronous>, transform_indices = @transform_1, window_bounds = array<i64: 32, 128>}, {pipeline_mode = #tpu.pipeline_mode<synchronous>, transform_indices = @transform_2, window_bounds = array<i64: 1, 128>}, {transform_indices = @transform_3, window_bounds = array<i64: 128, 128>}]} {
    %c0 = arith.constant 0 : index
    %c0_0 = arith.constant 0 : index
    %0 = vector.load %arg1[%c0, %c0_0] : memref<128x32xf32, #tpu.memory_space<vmem>>, vector<128x32xf32>
    %c0_1 = arith.constant 0 : index
    %c0_2 = arith.constant 0 : index
    %1 = vector.load %arg2[%c0_1, %c0_2] : memref<32x128xf32, #tpu.memory_space<vmem>>, vector<32x128xf32>
    %cst = arith.constant dense<0.000000e+00> : vector<128x128xf32>
    %2 = tpu.matmul %0, %1, %cst {dimension_numbers = #tpu.dot_dimension_numbers<[1], [0], [0], [1], [0, 0, 1, 1], [], []>} : vector<128x32xf32>, vector<32x128xf32>, vector<128x128xf32> -> vector<128x128xf32>
    %c0_3 = arith.constant 0 : index
    %c0_4 = arith.constant 0 : index
    %3 = vector.load %arg3[%c0_3, %c0_4] : memref<1x128xf32, #tpu.memory_space<vmem>>, vector<1x128xf32>
    %4 = vector.broadcast %3 : vector<1x128xf32> to vector<128x128xf32>
    %5 = arith.addf %2, %4 : vector<128x128xf32>
    %c0_5 = arith.constant 0 : index
    %c0_6 = arith.constant 0 : index
    %6 = vector.load %arg4[%c0_5, %c0_6] : memref<128x128xf32, #tpu.memory_space<vmem>>, vector<128x128xf32>
    tpu.vector_store %arg4[%c0_5, %c0_6], %5 {strides = array<i32>} : memref<128x128xf32, #tpu.memory_space<vmem>>, vector<128x128xf32>,
    return
  }
  func.func @transform_0(%arg0: i32) -> (i32, i32) {
    %c0_i32 = arith.constant 0 : i32
    %c0_i32_0 = arith.constant 0 : i32
    return %arg0, %c0_i32 : i32, i32
  }
  func.func @transform_1(%arg0: i32) -> (i32, i32) {
    %c0_i32 = arith.constant 0 : i32
    %c0_i32_0 = arith.constant 0 : i32
    %c0_i32_1 = arith.constant 0 : i32
    return %c0_i32, %c0_i32_0 : i32, i32
  }
  func.func @transform_2(%arg0: i32) -> (i32, i32) {
    %c0_i32 = arith.constant 0 : i32
    %c0_i32_0 = arith.constant 0 : i32
    %c0_i32_1 = arith.constant 0 : i32
    return %c0_i32, %c0_i32_0 : i32, i32
  }
  func.func @transform_3(%arg0: i32) -> (i32, i32) {
    %c0_i32 = arith.constant 0 : i32
    %c0_i32_0 = arith.constant 0 : i32
    return %arg0, %c0_i32 : i32, i32
  }
}

module attributes {stable_mosaic.version = 11 : i64} {
  func.func @_matmul_bias_kernel(%arg0: i32, %arg1: memref<256x12xf32, #tpu.memory_space<vmem>>, %arg2: memref<12x32xf32, #tpu.memory_space<vmem>>, %arg3: memref<1x32xf32, #tpu.memory_space<vmem>>, %arg4: memref<256x32xf32, #tpu.memory_space<vmem>>) attributes {dimension_semantics = [#tpu.dimension_semantics<parallel>], iteration_bounds = array<i64: 2>, scalar_prefetch = 0 : i64, scratch_operands = 0 : i64, tpu.core_type = #tpu.core_type<tc>, window_params = [{transform_indices = @transform_0, window_bounds = array<i64: 256, 12>}, {pipeline_mode = #tpu.pipeline_mode<synchronous>, transform_indices = @transform_1, window_bounds = array<i64: 12, 32>}, {pipeline_mode = #tpu.pipeline_mode<synchronous>, transform_indices = @transform_2, window_bounds = array<i64: 1, 32>}, {transform_indices = @transform_3, window_bounds = array<i64: 256, 32>}]} {
    %c0 = arith.constant 0 : index
    %c0_0 = arith.constant 0 : index
    %0 = vector.load %arg1[%c0, %c0_0] : memref<256x12xf32, #tpu.memory_space<vmem>>, vector<256x12xf32>
    %c0_1 = arith.constant 0 : index
    %c0_2 = arith.constant 0 : index
    %1 = vector.load %arg2[%c0_1, %c0_2] : memref<12x32xf32, #tpu.memory_space<vmem>>, vector<12x32xf32>
    %cst = arith.constant dense<0.000000e+00> : vector<256x32xf32>
    %2 = tpu.matmul %0, %1, %cst {dimension_numbers = #tpu.dot_dimension_numbers<[1], [0], [0], [1], [0, 0, 1, 1], [], []>} : vector<256x12xf32>, vector<12x32xf32>, vector<256x32xf32> -> vector<256x32xf32>
    %c0_3 = arith.constant 0 : index
    %c0_4 = arith.constant 0 : index
    %3 = vector.load %arg3[%c0_3, %c0_4] : memref<1x32xf32, #tpu.memory_space<vmem>>, vector<1x32xf32>
    %4 = vector.broadcast %3 : vector<1x32xf32> to vector<256x32xf32>
    %5 = arith.addf %2, %4 : vector<256x32xf32>
    %c0_5 = arith.constant 0 : index
    %c0_6 = arith.constant 0 : index
    %6 = vector.load %arg4[%c0_5, %c0_6] : memref<256x32xf32, #tpu.memory_space<vmem>>, vector<256x32xf32>
    tpu.vector_store %arg4[%c0_5, %c0_6], %5 {strides = array<i32>} : memref<256x32xf32, #tpu.memory_space<vmem>>, vector<256x32xf32>,
    return
  }
  func.func @transform_0(%arg0: i32) -> (i32, i32) {
    %c0_i32 = arith.constant 0 : i32
    %c0_i32_0 = arith.constant 0 : i32
    return %arg0, %c0_i32 : i32, i32
  }
  func.func @transform_1(%arg0: i32) -> (i32, i32) {
    %c0_i32 = arith.constant 0 : i32
    %c0_i32_0 = arith.constant 0 : i32
    %c0_i32_1 = arith.constant 0 : i32
    return %c0_i32, %c0_i32_0 : i32, i32
  }
  func.func @transform_2(%arg0: i32) -> (i32, i32) {
    %c0_i32 = arith.constant 0 : i32
    %c0_i32_0 = arith.constant 0 : i32
    %c0_i32_1 = arith.constant 0 : i32
    return %c0_i32, %c0_i32_0 : i32, i32
  }
  func.func @transform_3(%arg0: i32) -> (i32, i32) {
    %c0_i32 = arith.constant 0 : i32
    %c0_i32_0 = arith.constant 0 : i32
    return %arg0, %c0_i32 : i32, i32
  }
}

module attributes {stable_mosaic.version = 11 : i64} {
  func.func @_matmul_bias_kernel(%arg0: i32, %arg1: memref<32x192xf32, #tpu.memory_space<vmem>>, %arg2: memref<192x32xf32, #tpu.memory_space<vmem>>, %arg3: memref<1x32xf32, #tpu.memory_space<vmem>>, %arg4: memref<32x32xf32, #tpu.memory_space<vmem>>) attributes {dimension_semantics = [#tpu.dimension_semantics<parallel>], iteration_bounds = array<i64: 1>, scalar_prefetch = 0 : i64, scratch_operands = 0 : i64, tpu.core_type = #tpu.core_type<tc>, window_params = [{transform_indices = @transform_0, window_bounds = array<i64: 32, 192>}, {pipeline_mode = #tpu.pipeline_mode<synchronous>, transform_indices = @transform_1, window_bounds = array<i64: 192, 32>}, {pipeline_mode = #tpu.pipeline_mode<synchronous>, transform_indices = @transform_2, window_bounds = array<i64: 1, 32>}, {transform_indices = @transform_3, window_bounds = array<i64: 32, 32>}]} {
    %c0 = arith.constant 0 : index
    %c0_0 = arith.constant 0 : index
    %0 = vector.load %arg1[%c0, %c0_0] : memref<32x192xf32, #tpu.memory_space<vmem>>, vector<32x192xf32>
    %c0_1 = arith.constant 0 : index
    %c0_2 = arith.constant 0 : index
    %1 = vector.load %arg2[%c0_1, %c0_2] : memref<192x32xf32, #tpu.memory_space<vmem>>, vector<192x32xf32>
    %cst = arith.constant dense<0.000000e+00> : vector<32x32xf32>
    %2 = tpu.matmul %0, %1, %cst {dimension_numbers = #tpu.dot_dimension_numbers<[1], [0], [0], [1], [0, 0, 1, 1], [], []>} : vector<32x192xf32>, vector<192x32xf32>, vector<32x32xf32> -> vector<32x32xf32>
    %c0_3 = arith.constant 0 : index
    %c0_4 = arith.constant 0 : index
    %3 = vector.load %arg3[%c0_3, %c0_4] : memref<1x32xf32, #tpu.memory_space<vmem>>, vector<1x32xf32>
    %4 = vector.broadcast %3 : vector<1x32xf32> to vector<32x32xf32>
    %5 = arith.addf %2, %4 : vector<32x32xf32>
    %c0_5 = arith.constant 0 : index
    %c0_6 = arith.constant 0 : index
    %6 = vector.load %arg4[%c0_5, %c0_6] : memref<32x32xf32, #tpu.memory_space<vmem>>, vector<32x32xf32>
    tpu.vector_store %arg4[%c0_5, %c0_6], %5 {strides = array<i32>} : memref<32x32xf32, #tpu.memory_space<vmem>>, vector<32x32xf32>,
    return
  }
  func.func @transform_0(%arg0: i32) -> (i32, i32) {
    %c0_i32 = arith.constant 0 : i32
    %c0_i32_0 = arith.constant 0 : i32
    return %arg0, %c0_i32 : i32, i32
  }
  func.func @transform_1(%arg0: i32) -> (i32, i32) {
    %c0_i32 = arith.constant 0 : i32
    %c0_i32_0 = arith.constant 0 : i32
    %c0_i32_1 = arith.constant 0 : i32
    return %c0_i32, %c0_i32_0 : i32, i32
  }
  func.func @transform_2(%arg0: i32) -> (i32, i32) {
    %c0_i32 = arith.constant 0 : i32
    %c0_i32_0 = arith.constant 0 : i32
    %c0_i32_1 = arith.constant 0 : i32
    return %c0_i32, %c0_i32_0 : i32, i32
  }
  func.func @transform_3(%arg0: i32) -> (i32, i32) {
    %c0_i32 = arith.constant 0 : i32
    %c0_i32_0 = arith.constant 0 : i32
    return %arg0, %c0_i32 : i32, i32
  }
}

module attributes {stable_mosaic.version = 11 : i64} {
  func.func @_fused_blocks_kernel(%arg0: i32, %arg1: memref<32x32xf32, #tpu.memory_space<vmem>>, %arg2: memref<32x32xf32, #tpu.memory_space<vmem>>, %arg3: memref<1x1x32xf32, #tpu.memory_space<vmem>>, %arg4: memref<1x1x32xf32, #tpu.memory_space<vmem>>, %arg5: memref<1x32x32xf32, #tpu.memory_space<vmem>>, %arg6: memref<1x1x32xf32, #tpu.memory_space<vmem>>, %arg7: memref<1x32x32xf32, #tpu.memory_space<vmem>>, %arg8: memref<1x1x32xf32, #tpu.memory_space<vmem>>, %arg9: memref<1x32x32xf32, #tpu.memory_space<vmem>>, %arg10: memref<1x1x32xf32, #tpu.memory_space<vmem>>, %arg11: memref<32x32xf32, #tpu.memory_space<vmem>>, %arg12: memref<32x32xf32, #tpu.memory_space<vmem>>) attributes {dimension_semantics = [#tpu.dimension_semantics<parallel>], iteration_bounds = array<i64: 1>, scalar_prefetch = 0 : i64, scratch_operands = 0 : i64, tpu.core_type = #tpu.core_type<tc>, window_params = [{transform_indices = @transform_0, window_bounds = array<i64: 32, 32>}, {transform_indices = @transform_1, window_bounds = array<i64: 32, 32>}, {pipeline_mode = #tpu.pipeline_mode<synchronous>, transform_indices = @transform_2, window_bounds = array<i64: 1, 1, 32>}, {pipeline_mode = #tpu.pipeline_mode<synchronous>, transform_indices = @transform_3, window_bounds = array<i64: 1, 1, 32>}, {pipeline_mode = #tpu.pipeline_mode<synchronous>, transform_indices = @transform_4, window_bounds = array<i64: 1, 32, 32>}, {pipeline_mode = #tpu.pipeline_mode<synchronous>, transform_indices = @transform_5, window_bounds = array<i64: 1, 1, 32>}, {pipeline_mode = #tpu.pipeline_mode<synchronous>, transform_indices = @transform_6, window_bounds = array<i64: 1, 32, 32>}, {pipeline_mode = #tpu.pipeline_mode<synchronous>, transform_indices = @transform_7, window_bounds = array<i64: 1, 1, 32>}, {pipeline_mode = #tpu.pipeline_mode<synchronous>, transform_indices = @transform_8, window_bounds = array<i64: 1, 32, 32>}, {pipeline_mode = #tpu.pipeline_mode<synchronous>, transform_indices = @transform_9, window_bounds = array<i64: 1, 1, 32>}, {transform_indices = @transform_10, window_bounds = array<i64: 32, 32>}, {transform_indices = @transform_11, window_bounds = array<i64: 32, 32>}]} {
    %c0 = arith.constant 0 : index
    %c0_0 = arith.constant 0 : index
    %0 = vector.load %arg1[%c0, %c0_0] : memref<32x32xf32, #tpu.memory_space<vmem>>, vector<32x32xf32>
    %c0_1 = arith.constant 0 : index
    %c0_2 = arith.constant 0 : index
    %1 = vector.load %arg2[%c0_1, %c0_2] : memref<32x32xf32, #tpu.memory_space<vmem>>, vector<32x32xf32>
    %2 = arith.addf %1, %0 : vector<32x32xf32>
    %cst = arith.constant dense<0.000000e+00> : vector<32xf32>
    %3 = vector.multi_reduction <add>, %2, %cst [1] : vector<32x32xf32> to vector<32xf32>
    %4 = vector.shape_cast %3 : vector<32xf32> to vector<32x1xf32>
    %cst_3 = arith.constant 3.200000e+01 : f32
    %5 = vector.broadcast %cst_3 : f32 to vector<32x1xf32>
    %6 = arith.divf %4, %5 : vector<32x1xf32>
    %7 = vector.broadcast %6 : vector<32x1xf32> to vector<32x32xf32>
    %8 = arith.subf %2, %7 : vector<32x32xf32>
    %9 = arith.mulf %8, %8 : vector<32x32xf32>
    %cst_4 = arith.constant dense<0.000000e+00> : vector<32xf32>
    %10 = vector.multi_reduction <add>, %9, %cst_4 [1] : vector<32x32xf32> to vector<32xf32>
    %11 = vector.shape_cast %10 : vector<32xf32> to vector<32x1xf32>
    %cst_5 = arith.constant 3.200000e+01 : f32
    %12 = vector.broadcast %cst_5 : f32 to vector<32x1xf32>
    %13 = arith.divf %11, %12 : vector<32x1xf32>
    %14 = vector.broadcast %6 : vector<32x1xf32> to vector<32x32xf32>
    %15 = arith.subf %2, %14 : vector<32x32xf32>
    %cst_6 = arith.constant 9.99999974E-6 : f32
    %16 = vector.broadcast %cst_6 : f32 to vector<32x1xf32>
    %17 = arith.addf %13, %16 : vector<32x1xf32>
    %18 = math.rsqrt %17 : vector<32x1xf32>
    %19 = vector.broadcast %18 : vector<32x1xf32> to vector<32x32xf32>
    %20 = arith.mulf %15, %19 : vector<32x32xf32>
    %c0_7 = arith.constant 0 : index
    %c0_8 = arith.constant 0 : index
    %c0_9 = arith.constant 0 : index
    %21 = vector.load %arg3[%c0_7, %c0_8, %c0_9] : memref<1x1x32xf32, #tpu.memory_space<vmem>>, vector<1x1x32xf32>
    %22 = vector.shape_cast %21 : vector<1x1x32xf32> to vector<1x32xf32>
    %23 = vector.broadcast %22 : vector<1x32xf32> to vector<32x32xf32>
    %24 = arith.mulf %20, %23 : vector<32x32xf32>
    %c0_10 = arith.constant 0 : index
    %c0_11 = arith.constant 0 : index
    %c0_12 = arith.constant 0 : index
    %25 = vector.load %arg4[%c0_10, %c0_11, %c0_12] : memref<1x1x32xf32, #tpu.memory_space<vmem>>, vector<1x1x32xf32>
    %26 = vector.shape_cast %25 : vector<1x1x32xf32> to vector<1x32xf32>
    %27 = vector.broadcast %26 : vector<1x32xf32> to vector<32x32xf32>
    %28 = arith.addf %24, %27 : vector<32x32xf32>
    %c0_13 = arith.constant 0 : index
    %c0_14 = arith.constant 0 : index
    %c0_15 = arith.constant 0 : index
    %29 = vector.load %arg5[%c0_13, %c0_14, %c0_15] : memref<1x32x32xf32, #tpu.memory_space<vmem>>, vector<1x32x32xf32>
    %30 = vector.shape_cast %29 : vector<1x32x32xf32> to vector<32x32xf32>
    %cst_16 = arith.constant dense<0.000000e+00> : vector<32x32xf32>
    %31 = tpu.matmul %28, %30, %cst_16 {dimension_numbers = #tpu.dot_dimension_numbers<[1], [0], [0], [1], [0, 0, 1, 1], [], []>} : vector<32x32xf32>, vector<32x32xf32>, vector<32x32xf32> -> vector<32x32xf32>
    %c0_17 = arith.constant 0 : index
    %c0_18 = arith.constant 0 : index
    %c0_19 = arith.constant 0 : index
    %32 = vector.load %arg6[%c0_17, %c0_18, %c0_19] : memref<1x1x32xf32, #tpu.memory_space<vmem>>, vector<1x1x32xf32>
    %33 = vector.shape_cast %32 : vector<1x1x32xf32> to vector<1x32xf32>
    %34 = vector.broadcast %33 : vector<1x32xf32> to vector<32x32xf32>
    %35 = arith.addf %31, %34 : vector<32x32xf32>
    %c0_20 = arith.constant 0 : index
    %c0_21 = arith.constant 0 : index
    %c0_22 = arith.constant 0 : index
    %36 = vector.load %arg7[%c0_20, %c0_21, %c0_22] : memref<1x32x32xf32, #tpu.memory_space<vmem>>, vector<1x32x32xf32>
    %37 = vector.shape_cast %36 : vector<1x32x32xf32> to vector<32x32xf32>
    %cst_23 = arith.constant dense<0.000000e+00> : vector<32x32xf32>
    %38 = tpu.matmul %28, %37, %cst_23 {dimension_numbers = #tpu.dot_dimension_numbers<[1], [0], [0], [1], [0, 0, 1, 1], [], []>} : vector<32x32xf32>, vector<32x32xf32>, vector<32x32xf32> -> vector<32x32xf32>
    %c0_24 = arith.constant 0 : index
    %c0_25 = arith.constant 0 : index
    %c0_26 = arith.constant 0 : index
    %39 = vector.load %arg8[%c0_24, %c0_25, %c0_26] : memref<1x1x32xf32, #tpu.memory_space<vmem>>, vector<1x1x32xf32>
    %40 = vector.shape_cast %39 : vector<1x1x32xf32> to vector<1x32xf32>
    %41 = vector.broadcast %40 : vector<1x32xf32> to vector<32x32xf32>
    %42 = arith.addf %38, %41 : vector<32x32xf32>
    %43 = arith.negf %42 : vector<32x32xf32>
    %44 = math.exp %43 : vector<32x32xf32>
    %cst_27 = arith.constant 1.000000e+00 : f32
    %45 = vector.broadcast %cst_27 : f32 to vector<32x32xf32>
    %46 = arith.addf %45, %44 : vector<32x32xf32>
    %47 = arith.divf %45, %46 : vector<32x32xf32>
    %48 = arith.mulf %42, %47 : vector<32x32xf32>
    %49 = arith.mulf %35, %48 : vector<32x32xf32>
    %c0_28 = arith.constant 0 : index
    %c0_29 = arith.constant 0 : index
    %c0_30 = arith.constant 0 : index
    %50 = vector.load %arg9[%c0_28, %c0_29, %c0_30] : memref<1x32x32xf32, #tpu.memory_space<vmem>>, vector<1x32x32xf32>
    %51 = vector.shape_cast %50 : vector<1x32x32xf32> to vector<32x32xf32>
    %cst_31 = arith.constant dense<0.000000e+00> : vector<32x32xf32>
    %52 = tpu.matmul %49, %51, %cst_31 {dimension_numbers = #tpu.dot_dimension_numbers<[1], [0], [0], [1], [0, 0, 1, 1], [], []>} : vector<32x32xf32>, vector<32x32xf32>, vector<32x32xf32> -> vector<32x32xf32>
    %c0_32 = arith.constant 0 : index
    %c0_33 = arith.constant 0 : index
    %c0_34 = arith.constant 0 : index
    %53 = vector.load %arg10[%c0_32, %c0_33, %c0_34] : memref<1x1x32xf32, #tpu.memory_space<vmem>>, vector<1x1x32xf32>
    %54 = vector.shape_cast %53 : vector<1x1x32xf32> to vector<1x32xf32>
    %55 = vector.broadcast %54 : vector<1x32xf32> to vector<32x32xf32>
    %56 = arith.addf %52, %55 : vector<32x32xf32>
    %c0_35 = arith.constant 0 : index
    %c0_36 = arith.constant 0 : index
    %57 = vector.load %arg11[%c0_35, %c0_36] : memref<32x32xf32, #tpu.memory_space<vmem>>, vector<32x32xf32>
    tpu.vector_store %arg11[%c0_35, %c0_36], %56 {strides = array<i32>} : memref<32x32xf32, #tpu.memory_space<vmem>>, vector<32x32xf32>,
    %c0_37 = arith.constant 0 : index
    %c0_38 = arith.constant 0 : index
    %58 = vector.load %arg12[%c0_37, %c0_38] : memref<32x32xf32, #tpu.memory_space<vmem>>, vector<32x32xf32>
    tpu.vector_store %arg12[%c0_37, %c0_38], %2 {strides = array<i32>} : memref<32x32xf32, #tpu.memory_space<vmem>>, vector<32x32xf32>,
    return
  }
  func.func @transform_0(%arg0: i32) -> (i32, i32) {
    %c0_i32 = arith.constant 0 : i32
    %c0_i32_0 = arith.constant 0 : i32
    return %arg0, %c0_i32 : i32, i32
  }
  func.func @transform_1(%arg0: i32) -> (i32, i32) {
    %c0_i32 = arith.constant 0 : i32
    %c0_i32_0 = arith.constant 0 : i32
    return %arg0, %c0_i32 : i32, i32
  }
  func.func @transform_2(%arg0: i32) -> (i32, i32, i32) {
    %c0_i32 = arith.constant 0 : i32
    %c0_i32_0 = arith.constant 0 : i32
    %c0_i32_1 = arith.constant 0 : i32
    %c0_i32_2 = arith.constant 0 : i32
    return %c0_i32, %c0_i32_0, %c0_i32_1 : i32, i32, i32
  }
  func.func @transform_3(%arg0: i32) -> (i32, i32, i32) {
    %c0_i32 = arith.constant 0 : i32
    %c0_i32_0 = arith.constant 0 : i32
    %c0_i32_1 = arith.constant 0 : i32
    %c0_i32_2 = arith.constant 0 : i32
    return %c0_i32, %c0_i32_0, %c0_i32_1 : i32, i32, i32
  }
  func.func @transform_4(%arg0: i32) -> (i32, i32, i32) {
    %c0_i32 = arith.constant 0 : i32
    %c0_i32_0 = arith.constant 0 : i32
    %c0_i32_1 = arith.constant 0 : i32
    %c0_i32_2 = arith.constant 0 : i32
    return %c0_i32, %c0_i32_0, %c0_i32_1 : i32, i32, i32
  }
  func.func @transform_5(%arg0: i32) -> (i32, i32, i32) {
    %c0_i32 = arith.constant 0 : i32
    %c0_i32_0 = arith.constant 0 : i32
    %c0_i32_1 = arith.constant 0 : i32
    %c0_i32_2 = arith.constant 0 : i32
    return %c0_i32, %c0_i32_0, %c0_i32_1 : i32, i32, i32
  }
  func.func @transform_6(%arg0: i32) -> (i32, i32, i32) {
    %c0_i32 = arith.constant 0 : i32
    %c0_i32_0 = arith.constant 0 : i32
    %c0_i32_1 = arith.constant 0 : i32
    %c0_i32_2 = arith.constant 0 : i32
    return %c0_i32, %c0_i32_0, %c0_i32_1 : i32, i32, i32
  }
  func.func @transform_7(%arg0: i32) -> (i32, i32, i32) {
    %c0_i32 = arith.constant 0 : i32
    %c0_i32_0 = arith.constant 0 : i32
    %c0_i32_1 = arith.constant 0 : i32
    %c0_i32_2 = arith.constant 0 : i32
    return %c0_i32, %c0_i32_0, %c0_i32_1 : i32, i32, i32
  }
  func.func @transform_8(%arg0: i32) -> (i32, i32, i32) {
    %c0_i32 = arith.constant 0 : i32
    %c0_i32_0 = arith.constant 0 : i32
    %c0_i32_1 = arith.constant 0 : i32
    %c0_i32_2 = arith.constant 0 : i32
    return %c0_i32, %c0_i32_0, %c0_i32_1 : i32, i32, i32
  }
  func.func @transform_9(%arg0: i32) -> (i32, i32, i32) {
    %c0_i32 = arith.constant 0 : i32
    %c0_i32_0 = arith.constant 0 : i32
    %c0_i32_1 = arith.constant 0 : i32
    %c0_i32_2 = arith.constant 0 : i32
    return %c0_i32, %c0_i32_0, %c0_i32_1 : i32, i32, i32
  }
  func.func @transform_10(%arg0: i32) -> (i32, i32) {
    %c0_i32 = arith.constant 0 : i32
    %c0_i32_0 = arith.constant 0 : i32
    return %arg0, %c0_i32 : i32, i32
  }
  func.func @transform_11(%arg0: i32) -> (i32, i32) {
    %c0_i32 = arith.constant 0 : i32
    %c0_i32_0 = arith.constant 0 : i32
    return %arg0, %c0_i32 : i32, i32
  }
}

module attributes {stable_mosaic.version = 11 : i64} {
  func.func @_bn_kernel(%arg0: i32, %arg1: i32, %arg2: memref<128x128xf32, #tpu.memory_space<vmem>>, %arg3: memref<1x128xf32, #tpu.memory_space<vmem>>, %arg4: memref<1x128xf32, #tpu.memory_space<vmem>>, %arg5: memref<128x128xf32, #tpu.memory_space<vmem>>, %arg6: memref<128x128xf32, #tpu.memory_space<vmem>>, %arg7: memref<1x128xf32, #tpu.memory_space<vmem>>, %arg8: memref<1x128xf32, #tpu.memory_space<vmem>>) attributes {dimension_semantics = [#tpu.dimension_semantics<arbitrary>, #tpu.dimension_semantics<arbitrary>], iteration_bounds = array<i64: 2, 1>, scalar_prefetch = 0 : i64, scratch_operands = 2 : i64, tpu.core_type = #tpu.core_type<tc>, window_params = [{transform_indices = @transform_0, window_bounds = array<i64: 128, 128>}, {pipeline_mode = #tpu.pipeline_mode<synchronous>, transform_indices = @transform_1, window_bounds = array<i64: 1, 128>}, {pipeline_mode = #tpu.pipeline_mode<synchronous>, transform_indices = @transform_2, window_bounds = array<i64: 1, 128>}, {pipeline_mode = #tpu.pipeline_mode<synchronous>, transform_indices = @transform_3, window_bounds = array<i64: 128, 128>}, {transform_indices = @transform_4, window_bounds = array<i64: 128, 128>}]} {
    %c0_i32 = arith.constant 0 : i32
    %0 = arith.cmpi eq, %arg0, %c0_i32 : i32
    %c0_i32_0 = arith.constant 0 : i32
    %1 = arith.cmpi eq, %arg1, %c0_i32_0 : i32
    %2 = arith.andi %0, %1 : i1
    %3 = arith.extui %2 : i1 to i32
    %c0_i32_1 = arith.constant 0 : i32
    %4 = arith.cmpi ne, %3, %c0_i32_1 : i32
    scf.if %4 {
      %cst = arith.constant 0.000000e+00 : f32
      %16 = vector.broadcast %cst : f32 to vector<1x128xf32>
      %c0 = arith.constant 0 : index
      %c0_8 = arith.constant 0 : index
      %17 = vector.load %arg7[%c0, %c0_8] : memref<1x128xf32, #tpu.memory_space<vmem>>, vector<1x128xf32>
      tpu.vector_store %arg7[%c0, %c0_8], %16 {strides = array<i32>} : memref<1x128xf32, #tpu.memory_space<vmem>>, vector<1x128xf32>,
      %cst_9 = arith.constant 0.000000e+00 : f32
      %18 = vector.broadcast %cst_9 : f32 to vector<1x128xf32>
      %c0_10 = arith.constant 0 : index
      %c0_11 = arith.constant 0 : index
      %19 = vector.load %arg8[%c0_10, %c0_11] : memref<1x128xf32, #tpu.memory_space<vmem>>, vector<1x128xf32>
      tpu.vector_store %arg8[%c0_10, %c0_11], %18 {strides = array<i32>} : memref<1x128xf32, #tpu.memory_space<vmem>>, vector<1x128xf32>,
    } else {
    }
    %c0_i32_2 = arith.constant 0 : i32
    %5 = arith.cmpi eq, %arg0, %c0_i32_2 : i32
    %6 = arith.extui %5 : i1 to i32
    %c0_i32_3 = arith.constant 0 : i32
    %7 = arith.cmpi ne, %6, %c0_i32_3 : i32
    scf.if %7 {
      %c0 = arith.constant 0 : index
      %c0_8 = arith.constant 0 : index
      %16 = vector.load %arg2[%c0, %c0_8] : memref<128x128xf32, #tpu.memory_space<vmem>>, vector<128x128xf32>
      %c0_9 = arith.constant 0 : index
      %c0_10 = arith.constant 0 : index
      %17 = vector.load %arg7[%c0_9, %c0_10] : memref<1x128xf32, #tpu.memory_space<vmem>>, vector<1x128xf32>
      %cst = arith.constant dense<0.000000e+00> : vector<128xf32>
      %18 = vector.multi_reduction <add>, %16, %cst [0] : vector<128x128xf32> to vector<128xf32>
      %19 = vector.shape_cast %18 : vector<128xf32> to vector<1x128xf32>
      %20 = arith.addf %17, %19 : vector<1x128xf32>
      %c0_11 = arith.constant 0 : index
      %c0_12 = arith.constant 0 : index
      %21 = vector.load %arg7[%c0_11, %c0_12] : memref<1x128xf32, #tpu.memory_space<vmem>>, vector<1x128xf32>
      tpu.vector_store %arg7[%c0_11, %c0_12], %20 {strides = array<i32>} : memref<1x128xf32, #tpu.memory_space<vmem>>, vector<1x128xf32>,
      %c0_13 = arith.constant 0 : index
      %c0_14 = arith.constant 0 : index
      %22 = vector.load %arg8[%c0_13, %c0_14] : memref<1x128xf32, #tpu.memory_space<vmem>>, vector<1x128xf32>
      %23 = arith.mulf %16, %16 : vector<128x128xf32>
      %cst_15 = arith.constant dense<0.000000e+00> : vector<128xf32>
      %24 = vector.multi_reduction <add>, %23, %cst_15 [0] : vector<128x128xf32> to vector<128xf32>
      %25 = vector.shape_cast %24 : vector<128xf32> to vector<1x128xf32>
      %26 = arith.addf %22, %25 : vector<1x128xf32>
      %c0_16 = arith.constant 0 : index
      %c0_17 = arith.constant 0 : index
      %27 = vector.load %arg8[%c0_16, %c0_17] : memref<1x128xf32, #tpu.memory_space<vmem>>, vector<1x128xf32>
      tpu.vector_store %arg8[%c0_16, %c0_17], %26 {strides = array<i32>} : memref<1x128xf32, #tpu.memory_space<vmem>>, vector<1x128xf32>,
    } else {
    }
    %c1_i32 = arith.constant 1 : i32
    %8 = arith.cmpi eq, %arg0, %c1_i32 : i32
    %c0_i32_4 = arith.constant 0 : i32
    %9 = arith.cmpi eq, %arg1, %c0_i32_4 : i32
    %10 = arith.andi %8, %9 : i1
    %11 = arith.extui %10 : i1 to i32
    %c0_i32_5 = arith.constant 0 : i32
    %12 = arith.cmpi ne, %11, %c0_i32_5 : i32
    scf.if %12 {
      %c0 = arith.constant 0 : index
      %c0_8 = arith.constant 0 : index
      %16 = vector.load %arg7[%c0, %c0_8] : memref<1x128xf32, #tpu.memory_space<vmem>>, vector<1x128xf32>
      %c0_9 = arith.constant 0 : index
      %c0_10 = arith.constant 0 : index
      %17 = vector.load %arg5[%c0_9, %c0_10] : memref<128x128xf32, #tpu.memory_space<vmem>>, vector<128x128xf32>
      %cst = arith.constant dense<0.000000e+00> : vector<1x128xf32>
      %18 = tpu.matmul %16, %17, %cst {dimension_numbers = #tpu.dot_dimension_numbers<[1], [0], [0], [1], [0, 0, 1, 1], [], []>} : vector<1x128xf32>, vector<128x128xf32>, vector<1x128xf32> -> vector<1x128xf32>
      %c0_11 = arith.constant 0 : index
      %c0_12 = arith.constant 0 : index
      %19 = vector.load %arg8[%c0_11, %c0_12] : memref<1x128xf32, #tpu.memory_space<vmem>>, vector<1x128xf32>
      %c0_13 = arith.constant 0 : index
      %c0_14 = arith.constant 0 : index
      %20 = vector.load %arg5[%c0_13, %c0_14] : memref<128x128xf32, #tpu.memory_space<vmem>>, vector<128x128xf32>
      %cst_15 = arith.constant dense<0.000000e+00> : vector<1x128xf32>
      %21 = tpu.matmul %19, %20, %cst_15 {dimension_numbers = #tpu.dot_dimension_numbers<[1], [0], [0], [1], [0, 0, 1, 1], [], []>} : vector<1x128xf32>, vector<128x128xf32>, vector<1x128xf32> -> vector<1x128xf32>
      %cst_16 = arith.constant 0.001953125 : f32
      %22 = vector.broadcast %cst_16 : f32 to vector<1x128xf32>
      %23 = arith.mulf %18, %22 : vector<1x128xf32>
      %cst_17 = arith.constant 0.001953125 : f32
      %24 = vector.broadcast %cst_17 : f32 to vector<1x128xf32>
      %25 = arith.mulf %21, %24 : vector<1x128xf32>
      %26 = arith.mulf %23, %23 : vector<1x128xf32>
      %27 = arith.subf %25, %26 : vector<1x128xf32>
      %c0_18 = arith.constant 0 : index
      %c0_19 = arith.constant 0 : index
      %28 = vector.load %arg7[%c0_18, %c0_19] : memref<1x128xf32, #tpu.memory_space<vmem>>, vector<1x128xf32>
      tpu.vector_store %arg7[%c0_18, %c0_19], %23 {strides = array<i32>} : memref<1x128xf32, #tpu.memory_space<vmem>>, vector<1x128xf32>,
      %cst_20 = arith.constant 9.99999974E-6 : f32
      %29 = vector.broadcast %cst_20 : f32 to vector<1x128xf32>
      %30 = arith.addf %27, %29 : vector<1x128xf32>
      %31 = math.rsqrt %30 : vector<1x128xf32>
      %c0_21 = arith.constant 0 : index
      %c0_22 = arith.constant 0 : index
      %32 = vector.load %arg8[%c0_21, %c0_22] : memref<1x128xf32, #tpu.memory_space<vmem>>, vector<1x128xf32>
      tpu.vector_store %arg8[%c0_21, %c0_22], %31 {strides = array<i32>} : memref<1x128xf32, #tpu.memory_space<vmem>>, vector<1x128xf32>,
    } else {
    }
    %c1_i32_6 = arith.constant 1 : i32
    %13 = arith.cmpi eq, %arg0, %c1_i32_6 : i32
    %14 = arith.extui %13 : i1 to i32
    %c0_i32_7 = arith.constant 0 : i32
    %15 = arith.cmpi ne, %14, %c0_i32_7 : i32
    scf.if %15 {
      %c0 = arith.constant 0 : index
      %c0_8 = arith.constant 0 : index
      %16 = vector.load %arg2[%c0, %c0_8] : memref<128x128xf32, #tpu.memory_space<vmem>>, vector<128x128xf32>
      %c0_9 = arith.constant 0 : index
      %c0_10 = arith.constant 0 : index
      %17 = vector.load %arg7[%c0_9, %c0_10] : memref<1x128xf32, #tpu.memory_space<vmem>>, vector<1x128xf32>
      %18 = vector.broadcast %17 : vector<1x128xf32> to vector<128x128xf32>
      %19 = arith.subf %16, %18 : vector<128x128xf32>
      %c0_11 = arith.constant 0 : index
      %c0_12 = arith.constant 0 : index
      %20 = vector.load %arg8[%c0_11, %c0_12] : memref<1x128xf32, #tpu.memory_space<vmem>>, vector<1x128xf32>
      %21 = vector.broadcast %20 : vector<1x128xf32> to vector<128x128xf32>
      %22 = arith.mulf %19, %21 : vector<128x128xf32>
      %c0_13 = arith.constant 0 : index
      %c0_14 = arith.constant 0 : index
      %23 = vector.load %arg3[%c0_13, %c0_14] : memref<1x128xf32, #tpu.memory_space<vmem>>, vector<1x128xf32>
      %24 = vector.broadcast %23 : vector<1x128xf32> to vector<128x128xf32>
      %25 = arith.mulf %22, %24 : vector<128x128xf32>
      %c0_15 = arith.constant 0 : index
      %c0_16 = arith.constant 0 : index
      %26 = vector.load %arg4[%c0_15, %c0_16] : memref<1x128xf32, #tpu.memory_space<vmem>>, vector<1x128xf32>
      %27 = vector.broadcast %26 : vector<1x128xf32> to vector<128x128xf32>
      %28 = arith.addf %25, %27 : vector<128x128xf32>
      %c0_17 = arith.constant 0 : index
      %c0_18 = arith.constant 0 : index
      %29 = vector.load %arg6[%c0_17, %c0_18] : memref<128x128xf32, #tpu.memory_space<vmem>>, vector<128x128xf32>
      tpu.vector_store %arg6[%c0_17, %c0_18], %28 {strides = array<i32>} : memref<128x128xf32, #tpu.memory_space<vmem>>, vector<128x128xf32>,
    } else {
    }
    return
  }
  func.func @transform_0(%arg0: i32, %arg1: i32) -> (i32, i32) {
    %c0_i32 = arith.constant 0 : i32
    %c0_i32_0 = arith.constant 0 : i32
    return %arg1, %c0_i32 : i32, i32
  }
  func.func @transform_1(%arg0: i32, %arg1: i32) -> (i32, i32) {
    %c0_i32 = arith.constant 0 : i32
    %c0_i32_0 = arith.constant 0 : i32
    %c0_i32_1 = arith.constant 0 : i32
    return %c0_i32, %c0_i32_0 : i32, i32
  }
  func.func @transform_2(%arg0: i32, %arg1: i32) -> (i32, i32) {
    %c0_i32 = arith.constant 0 : i32
    %c0_i32_0 = arith.constant 0 : i32
    %c0_i32_1 = arith.constant 0 : i32
    return %c0_i32, %c0_i32_0 : i32, i32
  }
  func.func @transform_3(%arg0: i32, %arg1: i32) -> (i32, i32) {
    %c0_i32 = arith.constant 0 : i32
    %c0_i32_0 = arith.constant 0 : i32
    %c0_i32_1 = arith.constant 0 : i32
    return %c0_i32, %c0_i32_0 : i32, i32
  }
  func.func @transform_4(%arg0: i32, %arg1: i32) -> (i32, i32) {
    %c0_i32 = arith.constant 0 : i32
    %c0_i32_0 = arith.constant 0 : i32
    return %arg1, %c0_i32 : i32, i32
  }
}

module attributes {stable_mosaic.version = 11 : i64} {
  func.func @_bn_kernel(%arg0: i32, %arg1: i32, %arg2: memref<32x128xf32, #tpu.memory_space<vmem>>, %arg3: memref<1x128xf32, #tpu.memory_space<vmem>>, %arg4: memref<1x128xf32, #tpu.memory_space<vmem>>, %arg5: memref<128x128xf32, #tpu.memory_space<vmem>>, %arg6: memref<32x128xf32, #tpu.memory_space<vmem>>, %arg7: memref<1x128xf32, #tpu.memory_space<vmem>>, %arg8: memref<1x128xf32, #tpu.memory_space<vmem>>) attributes {dimension_semantics = [#tpu.dimension_semantics<arbitrary>, #tpu.dimension_semantics<arbitrary>], iteration_bounds = array<i64: 2, 1>, scalar_prefetch = 0 : i64, scratch_operands = 2 : i64, tpu.core_type = #tpu.core_type<tc>, window_params = [{transform_indices = @transform_0, window_bounds = array<i64: 32, 128>}, {pipeline_mode = #tpu.pipeline_mode<synchronous>, transform_indices = @transform_1, window_bounds = array<i64: 1, 128>}, {pipeline_mode = #tpu.pipeline_mode<synchronous>, transform_indices = @transform_2, window_bounds = array<i64: 1, 128>}, {pipeline_mode = #tpu.pipeline_mode<synchronous>, transform_indices = @transform_3, window_bounds = array<i64: 128, 128>}, {transform_indices = @transform_4, window_bounds = array<i64: 32, 128>}]} {
    %c0_i32 = arith.constant 0 : i32
    %0 = arith.cmpi eq, %arg0, %c0_i32 : i32
    %c0_i32_0 = arith.constant 0 : i32
    %1 = arith.cmpi eq, %arg1, %c0_i32_0 : i32
    %2 = arith.andi %0, %1 : i1
    %3 = arith.extui %2 : i1 to i32
    %c0_i32_1 = arith.constant 0 : i32
    %4 = arith.cmpi ne, %3, %c0_i32_1 : i32
    scf.if %4 {
      %cst = arith.constant 0.000000e+00 : f32
      %16 = vector.broadcast %cst : f32 to vector<1x128xf32>
      %c0 = arith.constant 0 : index
      %c0_8 = arith.constant 0 : index
      %17 = vector.load %arg7[%c0, %c0_8] : memref<1x128xf32, #tpu.memory_space<vmem>>, vector<1x128xf32>
      tpu.vector_store %arg7[%c0, %c0_8], %16 {strides = array<i32>} : memref<1x128xf32, #tpu.memory_space<vmem>>, vector<1x128xf32>,
      %cst_9 = arith.constant 0.000000e+00 : f32
      %18 = vector.broadcast %cst_9 : f32 to vector<1x128xf32>
      %c0_10 = arith.constant 0 : index
      %c0_11 = arith.constant 0 : index
      %19 = vector.load %arg8[%c0_10, %c0_11] : memref<1x128xf32, #tpu.memory_space<vmem>>, vector<1x128xf32>
      tpu.vector_store %arg8[%c0_10, %c0_11], %18 {strides = array<i32>} : memref<1x128xf32, #tpu.memory_space<vmem>>, vector<1x128xf32>,
    } else {
    }
    %c0_i32_2 = arith.constant 0 : i32
    %5 = arith.cmpi eq, %arg0, %c0_i32_2 : i32
    %6 = arith.extui %5 : i1 to i32
    %c0_i32_3 = arith.constant 0 : i32
    %7 = arith.cmpi ne, %6, %c0_i32_3 : i32
    scf.if %7 {
      %c0 = arith.constant 0 : index
      %c0_8 = arith.constant 0 : index
      %16 = vector.load %arg2[%c0, %c0_8] : memref<32x128xf32, #tpu.memory_space<vmem>>, vector<32x128xf32>
      %c0_9 = arith.constant 0 : index
      %c0_10 = arith.constant 0 : index
      %17 = vector.load %arg7[%c0_9, %c0_10] : memref<1x128xf32, #tpu.memory_space<vmem>>, vector<1x128xf32>
      %cst = arith.constant dense<0.000000e+00> : vector<128xf32>
      %18 = vector.multi_reduction <add>, %16, %cst [0] : vector<32x128xf32> to vector<128xf32>
      %19 = vector.shape_cast %18 : vector<128xf32> to vector<1x128xf32>
      %20 = arith.addf %17, %19 : vector<1x128xf32>
      %c0_11 = arith.constant 0 : index
      %c0_12 = arith.constant 0 : index
      %21 = vector.load %arg7[%c0_11, %c0_12] : memref<1x128xf32, #tpu.memory_space<vmem>>, vector<1x128xf32>
      tpu.vector_store %arg7[%c0_11, %c0_12], %20 {strides = array<i32>} : memref<1x128xf32, #tpu.memory_space<vmem>>, vector<1x128xf32>,
      %c0_13 = arith.constant 0 : index
      %c0_14 = arith.constant 0 : index
      %22 = vector.load %arg8[%c0_13, %c0_14] : memref<1x128xf32, #tpu.memory_space<vmem>>, vector<1x128xf32>
      %23 = arith.mulf %16, %16 : vector<32x128xf32>
      %cst_15 = arith.constant dense<0.000000e+00> : vector<128xf32>
      %24 = vector.multi_reduction <add>, %23, %cst_15 [0] : vector<32x128xf32> to vector<128xf32>
      %25 = vector.shape_cast %24 : vector<128xf32> to vector<1x128xf32>
      %26 = arith.addf %22, %25 : vector<1x128xf32>
      %c0_16 = arith.constant 0 : index
      %c0_17 = arith.constant 0 : index
      %27 = vector.load %arg8[%c0_16, %c0_17] : memref<1x128xf32, #tpu.memory_space<vmem>>, vector<1x128xf32>
      tpu.vector_store %arg8[%c0_16, %c0_17], %26 {strides = array<i32>} : memref<1x128xf32, #tpu.memory_space<vmem>>, vector<1x128xf32>,
    } else {
    }
    %c1_i32 = arith.constant 1 : i32
    %8 = arith.cmpi eq, %arg0, %c1_i32 : i32
    %c0_i32_4 = arith.constant 0 : i32
    %9 = arith.cmpi eq, %arg1, %c0_i32_4 : i32
    %10 = arith.andi %8, %9 : i1
    %11 = arith.extui %10 : i1 to i32
    %c0_i32_5 = arith.constant 0 : i32
    %12 = arith.cmpi ne, %11, %c0_i32_5 : i32
    scf.if %12 {
      %c0 = arith.constant 0 : index
      %c0_8 = arith.constant 0 : index
      %16 = vector.load %arg7[%c0, %c0_8] : memref<1x128xf32, #tpu.memory_space<vmem>>, vector<1x128xf32>
      %c0_9 = arith.constant 0 : index
      %c0_10 = arith.constant 0 : index
      %17 = vector.load %arg5[%c0_9, %c0_10] : memref<128x128xf32, #tpu.memory_space<vmem>>, vector<128x128xf32>
      %cst = arith.constant dense<0.000000e+00> : vector<1x128xf32>
      %18 = tpu.matmul %16, %17, %cst {dimension_numbers = #tpu.dot_dimension_numbers<[1], [0], [0], [1], [0, 0, 1, 1], [], []>} : vector<1x128xf32>, vector<128x128xf32>, vector<1x128xf32> -> vector<1x128xf32>
      %c0_11 = arith.constant 0 : index
      %c0_12 = arith.constant 0 : index
      %19 = vector.load %arg8[%c0_11, %c0_12] : memref<1x128xf32, #tpu.memory_space<vmem>>, vector<1x128xf32>
      %c0_13 = arith.constant 0 : index
      %c0_14 = arith.constant 0 : index
      %20 = vector.load %arg5[%c0_13, %c0_14] : memref<128x128xf32, #tpu.memory_space<vmem>>, vector<128x128xf32>
      %cst_15 = arith.constant dense<0.000000e+00> : vector<1x128xf32>
      %21 = tpu.matmul %19, %20, %cst_15 {dimension_numbers = #tpu.dot_dimension_numbers<[1], [0], [0], [1], [0, 0, 1, 1], [], []>} : vector<1x128xf32>, vector<128x128xf32>, vector<1x128xf32> -> vector<1x128xf32>
      %cst_16 = arith.constant 7.812500e-03 : f32
      %22 = vector.broadcast %cst_16 : f32 to vector<1x128xf32>
      %23 = arith.mulf %18, %22 : vector<1x128xf32>
      %cst_17 = arith.constant 7.812500e-03 : f32
      %24 = vector.broadcast %cst_17 : f32 to vector<1x128xf32>
      %25 = arith.mulf %21, %24 : vector<1x128xf32>
      %26 = arith.mulf %23, %23 : vector<1x128xf32>
      %27 = arith.subf %25, %26 : vector<1x128xf32>
      %c0_18 = arith.constant 0 : index
      %c0_19 = arith.constant 0 : index
      %28 = vector.load %arg7[%c0_18, %c0_19] : memref<1x128xf32, #tpu.memory_space<vmem>>, vector<1x128xf32>
      tpu.vector_store %arg7[%c0_18, %c0_19], %23 {strides = array<i32>} : memref<1x128xf32, #tpu.memory_space<vmem>>, vector<1x128xf32>,
      %cst_20 = arith.constant 9.99999974E-6 : f32
      %29 = vector.broadcast %cst_20 : f32 to vector<1x128xf32>
      %30 = arith.addf %27, %29 : vector<1x128xf32>
      %31 = math.rsqrt %30 : vector<1x128xf32>
      %c0_21 = arith.constant 0 : index
      %c0_22 = arith.constant 0 : index
      %32 = vector.load %arg8[%c0_21, %c0_22] : memref<1x128xf32, #tpu.memory_space<vmem>>, vector<1x128xf32>
      tpu.vector_store %arg8[%c0_21, %c0_22], %31 {strides = array<i32>} : memref<1x128xf32, #tpu.memory_space<vmem>>, vector<1x128xf32>,
    } else {
    }
    %c1_i32_6 = arith.constant 1 : i32
    %13 = arith.cmpi eq, %arg0, %c1_i32_6 : i32
    %14 = arith.extui %13 : i1 to i32
    %c0_i32_7 = arith.constant 0 : i32
    %15 = arith.cmpi ne, %14, %c0_i32_7 : i32
    scf.if %15 {
      %c0 = arith.constant 0 : index
      %c0_8 = arith.constant 0 : index
      %16 = vector.load %arg2[%c0, %c0_8] : memref<32x128xf32, #tpu.memory_space<vmem>>, vector<32x128xf32>
      %c0_9 = arith.constant 0 : index
      %c0_10 = arith.constant 0 : index
      %17 = vector.load %arg7[%c0_9, %c0_10] : memref<1x128xf32, #tpu.memory_space<vmem>>, vector<1x128xf32>
      %18 = vector.broadcast %17 : vector<1x128xf32> to vector<32x128xf32>
      %19 = arith.subf %16, %18 : vector<32x128xf32>
      %c0_11 = arith.constant 0 : index
      %c0_12 = arith.constant 0 : index
      %20 = vector.load %arg8[%c0_11, %c0_12] : memref<1x128xf32, #tpu.memory_space<vmem>>, vector<1x128xf32>
      %21 = vector.broadcast %20 : vector<1x128xf32> to vector<32x128xf32>
      %22 = arith.mulf %19, %21 : vector<32x128xf32>
      %c0_13 = arith.constant 0 : index
      %c0_14 = arith.constant 0 : index
      %23 = vector.load %arg3[%c0_13, %c0_14] : memref<1x128xf32, #tpu.memory_space<vmem>>, vector<1x128xf32>
      %24 = vector.broadcast %23 : vector<1x128xf32> to vector<32x128xf32>
      %25 = arith.mulf %22, %24 : vector<32x128xf32>
      %c0_15 = arith.constant 0 : index
      %c0_16 = arith.constant 0 : index
      %26 = vector.load %arg4[%c0_15, %c0_16] : memref<1x128xf32, #tpu.memory_space<vmem>>, vector<1x128xf32>
      %27 = vector.broadcast %26 : vector<1x128xf32> to vector<32x128xf32>
      %28 = arith.addf %25, %27 : vector<32x128xf32>
      %c0_17 = arith.constant 0 : index
      %c0_18 = arith.constant 0 : index
      %29 = vector.load %arg6[%c0_17, %c0_18] : memref<32x128xf32, #tpu.memory_space<vmem>>, vector<32x128xf32>
      tpu.vector_store %arg6[%c0_17, %c0_18], %28 {strides = array<i32>} : memref<32x128xf32, #tpu.memory_space<vmem>>, vector<32x128xf32>,
    } else {
    }
    return
  }
  func.func @transform_0(%arg0: i32, %arg1: i32) -> (i32, i32) {
    %c0_i32 = arith.constant 0 : i32
    %c0_i32_0 = arith.constant 0 : i32
    return %arg1, %c0_i32 : i32, i32
  }
  func.func @transform_1(%arg0: i32, %arg1: i32) -> (i32, i32) {
    %c0_i32 = arith.constant 0 : i32
    %c0_i32_0 = arith.constant 0 : i32
    %c0_i32_1 = arith.constant 0 : i32
    return %c0_i32, %c0_i32_0 : i32, i32
  }
  func.func @transform_2(%arg0: i32, %arg1: i32) -> (i32, i32) {
    %c0_i32 = arith.constant 0 : i32
    %c0_i32_0 = arith.constant 0 : i32
    %c0_i32_1 = arith.constant 0 : i32
    return %c0_i32, %c0_i32_0 : i32, i32
  }
  func.func @transform_3(%arg0: i32, %arg1: i32) -> (i32, i32) {
    %c0_i32 = arith.constant 0 : i32
    %c0_i32_0 = arith.constant 0 : i32
    %c0_i32_1 = arith.constant 0 : i32
    return %c0_i32, %c0_i32_0 : i32, i32
  }
  func.func @transform_4(%arg0: i32, %arg1: i32) -> (i32, i32) {
    %c0_i32 = arith.constant 0 : i32
    %c0_i32_0 = arith.constant 0 : i32
    return %arg1, %c0_i32 : i32, i32
  }
}

module attributes {stable_mosaic.version = 11 : i64} {
  func.func @_bn_kernel(%arg0: i32, %arg1: i32, %arg2: memref<8x128xf32, #tpu.memory_space<vmem>>, %arg3: memref<1x128xf32, #tpu.memory_space<vmem>>, %arg4: memref<1x128xf32, #tpu.memory_space<vmem>>, %arg5: memref<128x128xf32, #tpu.memory_space<vmem>>, %arg6: memref<8x128xf32, #tpu.memory_space<vmem>>, %arg7: memref<1x128xf32, #tpu.memory_space<vmem>>, %arg8: memref<1x128xf32, #tpu.memory_space<vmem>>) attributes {dimension_semantics = [#tpu.dimension_semantics<arbitrary>, #tpu.dimension_semantics<arbitrary>], iteration_bounds = array<i64: 2, 1>, scalar_prefetch = 0 : i64, scratch_operands = 2 : i64, tpu.core_type = #tpu.core_type<tc>, window_params = [{transform_indices = @transform_0, window_bounds = array<i64: 8, 128>}, {pipeline_mode = #tpu.pipeline_mode<synchronous>, transform_indices = @transform_1, window_bounds = array<i64: 1, 128>}, {pipeline_mode = #tpu.pipeline_mode<synchronous>, transform_indices = @transform_2, window_bounds = array<i64: 1, 128>}, {pipeline_mode = #tpu.pipeline_mode<synchronous>, transform_indices = @transform_3, window_bounds = array<i64: 128, 128>}, {transform_indices = @transform_4, window_bounds = array<i64: 8, 128>}]} {
    %c0_i32 = arith.constant 0 : i32
    %0 = arith.cmpi eq, %arg0, %c0_i32 : i32
    %c0_i32_0 = arith.constant 0 : i32
    %1 = arith.cmpi eq, %arg1, %c0_i32_0 : i32
    %2 = arith.andi %0, %1 : i1
    %3 = arith.extui %2 : i1 to i32
    %c0_i32_1 = arith.constant 0 : i32
    %4 = arith.cmpi ne, %3, %c0_i32_1 : i32
    scf.if %4 {
      %cst = arith.constant 0.000000e+00 : f32
      %16 = vector.broadcast %cst : f32 to vector<1x128xf32>
      %c0 = arith.constant 0 : index
      %c0_8 = arith.constant 0 : index
      %17 = vector.load %arg7[%c0, %c0_8] : memref<1x128xf32, #tpu.memory_space<vmem>>, vector<1x128xf32>
      tpu.vector_store %arg7[%c0, %c0_8], %16 {strides = array<i32>} : memref<1x128xf32, #tpu.memory_space<vmem>>, vector<1x128xf32>,
      %cst_9 = arith.constant 0.000000e+00 : f32
      %18 = vector.broadcast %cst_9 : f32 to vector<1x128xf32>
      %c0_10 = arith.constant 0 : index
      %c0_11 = arith.constant 0 : index
      %19 = vector.load %arg8[%c0_10, %c0_11] : memref<1x128xf32, #tpu.memory_space<vmem>>, vector<1x128xf32>
      tpu.vector_store %arg8[%c0_10, %c0_11], %18 {strides = array<i32>} : memref<1x128xf32, #tpu.memory_space<vmem>>, vector<1x128xf32>,
    } else {
    }
    %c0_i32_2 = arith.constant 0 : i32
    %5 = arith.cmpi eq, %arg0, %c0_i32_2 : i32
    %6 = arith.extui %5 : i1 to i32
    %c0_i32_3 = arith.constant 0 : i32
    %7 = arith.cmpi ne, %6, %c0_i32_3 : i32
    scf.if %7 {
      %c0 = arith.constant 0 : index
      %c0_8 = arith.constant 0 : index
      %16 = vector.load %arg2[%c0, %c0_8] : memref<8x128xf32, #tpu.memory_space<vmem>>, vector<8x128xf32>
      %c0_9 = arith.constant 0 : index
      %c0_10 = arith.constant 0 : index
      %17 = vector.load %arg7[%c0_9, %c0_10] : memref<1x128xf32, #tpu.memory_space<vmem>>, vector<1x128xf32>
      %cst = arith.constant dense<0.000000e+00> : vector<128xf32>
      %18 = vector.multi_reduction <add>, %16, %cst [0] : vector<8x128xf32> to vector<128xf32>
      %19 = vector.shape_cast %18 : vector<128xf32> to vector<1x128xf32>
      %20 = arith.addf %17, %19 : vector<1x128xf32>
      %c0_11 = arith.constant 0 : index
      %c0_12 = arith.constant 0 : index
      %21 = vector.load %arg7[%c0_11, %c0_12] : memref<1x128xf32, #tpu.memory_space<vmem>>, vector<1x128xf32>
      tpu.vector_store %arg7[%c0_11, %c0_12], %20 {strides = array<i32>} : memref<1x128xf32, #tpu.memory_space<vmem>>, vector<1x128xf32>,
      %c0_13 = arith.constant 0 : index
      %c0_14 = arith.constant 0 : index
      %22 = vector.load %arg8[%c0_13, %c0_14] : memref<1x128xf32, #tpu.memory_space<vmem>>, vector<1x128xf32>
      %23 = arith.mulf %16, %16 : vector<8x128xf32>
      %cst_15 = arith.constant dense<0.000000e+00> : vector<128xf32>
      %24 = vector.multi_reduction <add>, %23, %cst_15 [0] : vector<8x128xf32> to vector<128xf32>
      %25 = vector.shape_cast %24 : vector<128xf32> to vector<1x128xf32>
      %26 = arith.addf %22, %25 : vector<1x128xf32>
      %c0_16 = arith.constant 0 : index
      %c0_17 = arith.constant 0 : index
      %27 = vector.load %arg8[%c0_16, %c0_17] : memref<1x128xf32, #tpu.memory_space<vmem>>, vector<1x128xf32>
      tpu.vector_store %arg8[%c0_16, %c0_17], %26 {strides = array<i32>} : memref<1x128xf32, #tpu.memory_space<vmem>>, vector<1x128xf32>,
    } else {
    }
    %c1_i32 = arith.constant 1 : i32
    %8 = arith.cmpi eq, %arg0, %c1_i32 : i32
    %c0_i32_4 = arith.constant 0 : i32
    %9 = arith.cmpi eq, %arg1, %c0_i32_4 : i32
    %10 = arith.andi %8, %9 : i1
    %11 = arith.extui %10 : i1 to i32
    %c0_i32_5 = arith.constant 0 : i32
    %12 = arith.cmpi ne, %11, %c0_i32_5 : i32
    scf.if %12 {
      %c0 = arith.constant 0 : index
      %c0_8 = arith.constant 0 : index
      %16 = vector.load %arg7[%c0, %c0_8] : memref<1x128xf32, #tpu.memory_space<vmem>>, vector<1x128xf32>
      %c0_9 = arith.constant 0 : index
      %c0_10 = arith.constant 0 : index
      %17 = vector.load %arg5[%c0_9, %c0_10] : memref<128x128xf32, #tpu.memory_space<vmem>>, vector<128x128xf32>
      %cst = arith.constant dense<0.000000e+00> : vector<1x128xf32>
      %18 = tpu.matmul %16, %17, %cst {dimension_numbers = #tpu.dot_dimension_numbers<[1], [0], [0], [1], [0, 0, 1, 1], [], []>} : vector<1x128xf32>, vector<128x128xf32>, vector<1x128xf32> -> vector<1x128xf32>
      %c0_11 = arith.constant 0 : index
      %c0_12 = arith.constant 0 : index
      %19 = vector.load %arg8[%c0_11, %c0_12] : memref<1x128xf32, #tpu.memory_space<vmem>>, vector<1x128xf32>
      %c0_13 = arith.constant 0 : index
      %c0_14 = arith.constant 0 : index
      %20 = vector.load %arg5[%c0_13, %c0_14] : memref<128x128xf32, #tpu.memory_space<vmem>>, vector<128x128xf32>
      %cst_15 = arith.constant dense<0.000000e+00> : vector<1x128xf32>
      %21 = tpu.matmul %19, %20, %cst_15 {dimension_numbers = #tpu.dot_dimension_numbers<[1], [0], [0], [1], [0, 0, 1, 1], [], []>} : vector<1x128xf32>, vector<128x128xf32>, vector<1x128xf32> -> vector<1x128xf32>
      %cst_16 = arith.constant 3.125000e-02 : f32
      %22 = vector.broadcast %cst_16 : f32 to vector<1x128xf32>
      %23 = arith.mulf %18, %22 : vector<1x128xf32>
      %cst_17 = arith.constant 3.125000e-02 : f32
      %24 = vector.broadcast %cst_17 : f32 to vector<1x128xf32>
      %25 = arith.mulf %21, %24 : vector<1x128xf32>
      %26 = arith.mulf %23, %23 : vector<1x128xf32>
      %27 = arith.subf %25, %26 : vector<1x128xf32>
      %c0_18 = arith.constant 0 : index
      %c0_19 = arith.constant 0 : index
      %28 = vector.load %arg7[%c0_18, %c0_19] : memref<1x128xf32, #tpu.memory_space<vmem>>, vector<1x128xf32>
      tpu.vector_store %arg7[%c0_18, %c0_19], %23 {strides = array<i32>} : memref<1x128xf32, #tpu.memory_space<vmem>>, vector<1x128xf32>,
      %cst_20 = arith.constant 9.99999974E-6 : f32
      %29 = vector.broadcast %cst_20 : f32 to vector<1x128xf32>
      %30 = arith.addf %27, %29 : vector<1x128xf32>
      %31 = math.rsqrt %30 : vector<1x128xf32>
      %c0_21 = arith.constant 0 : index
      %c0_22 = arith.constant 0 : index
      %32 = vector.load %arg8[%c0_21, %c0_22] : memref<1x128xf32, #tpu.memory_space<vmem>>, vector<1x128xf32>
      tpu.vector_store %arg8[%c0_21, %c0_22], %31 {strides = array<i32>} : memref<1x128xf32, #tpu.memory_space<vmem>>, vector<1x128xf32>,
    } else {
    }
    %c1_i32_6 = arith.constant 1 : i32
    %13 = arith.cmpi eq, %arg0, %c1_i32_6 : i32
    %14 = arith.extui %13 : i1 to i32
    %c0_i32_7 = arith.constant 0 : i32
    %15 = arith.cmpi ne, %14, %c0_i32_7 : i32
    scf.if %15 {
      %c0 = arith.constant 0 : index
      %c0_8 = arith.constant 0 : index
      %16 = vector.load %arg2[%c0, %c0_8] : memref<8x128xf32, #tpu.memory_space<vmem>>, vector<8x128xf32>
      %c0_9 = arith.constant 0 : index
      %c0_10 = arith.constant 0 : index
      %17 = vector.load %arg7[%c0_9, %c0_10] : memref<1x128xf32, #tpu.memory_space<vmem>>, vector<1x128xf32>
      %18 = vector.broadcast %17 : vector<1x128xf32> to vector<8x128xf32>
      %19 = arith.subf %16, %18 : vector<8x128xf32>
      %c0_11 = arith.constant 0 : index
      %c0_12 = arith.constant 0 : index
      %20 = vector.load %arg8[%c0_11, %c0_12] : memref<1x128xf32, #tpu.memory_space<vmem>>, vector<1x128xf32>
      %21 = vector.broadcast %20 : vector<1x128xf32> to vector<8x128xf32>
      %22 = arith.mulf %19, %21 : vector<8x128xf32>
      %c0_13 = arith.constant 0 : index
      %c0_14 = arith.constant 0 : index
      %23 = vector.load %arg3[%c0_13, %c0_14] : memref<1x128xf32, #tpu.memory_space<vmem>>, vector<1x128xf32>
      %24 = vector.broadcast %23 : vector<1x128xf32> to vector<8x128xf32>
      %25 = arith.mulf %22, %24 : vector<8x128xf32>
      %c0_15 = arith.constant 0 : index
      %c0_16 = arith.constant 0 : index
      %26 = vector.load %arg4[%c0_15, %c0_16] : memref<1x128xf32, #tpu.memory_space<vmem>>, vector<1x128xf32>
      %27 = vector.broadcast %26 : vector<1x128xf32> to vector<8x128xf32>
      %28 = arith.addf %25, %27 : vector<8x128xf32>
      %c0_17 = arith.constant 0 : index
      %c0_18 = arith.constant 0 : index
      %29 = vector.load %arg6[%c0_17, %c0_18] : memref<8x128xf32, #tpu.memory_space<vmem>>, vector<8x128xf32>
      tpu.vector_store %arg6[%c0_17, %c0_18], %28 {strides = array<i32>} : memref<8x128xf32, #tpu.memory_space<vmem>>, vector<8x128xf32>,
    } else {
    }
    return
  }
  func.func @transform_0(%arg0: i32, %arg1: i32) -> (i32, i32) {
    %c0_i32 = arith.constant 0 : i32
    %c0_i32_0 = arith.constant 0 : i32
    return %arg1, %c0_i32 : i32, i32
  }
  func.func @transform_1(%arg0: i32, %arg1: i32) -> (i32, i32) {
    %c0_i32 = arith.constant 0 : i32
    %c0_i32_0 = arith.constant 0 : i32
    %c0_i32_1 = arith.constant 0 : i32
    return %c0_i32, %c0_i32_0 : i32, i32
  }
  func.func @transform_2(%arg0: i32, %arg1: i32) -> (i32, i32) {
    %c0_i32 = arith.constant 0 : i32
    %c0_i32_0 = arith.constant 0 : i32
    %c0_i32_1 = arith.constant 0 : i32
    return %c0_i32, %c0_i32_0 : i32, i32
  }
  func.func @transform_3(%arg0: i32, %arg1: i32) -> (i32, i32) {
    %c0_i32 = arith.constant 0 : i32
    %c0_i32_0 = arith.constant 0 : i32
    %c0_i32_1 = arith.constant 0 : i32
    return %c0_i32, %c0_i32_0 : i32, i32
  }
  func.func @transform_4(%arg0: i32, %arg1: i32) -> (i32, i32) {
    %c0_i32 = arith.constant 0 : i32
    %c0_i32_0 = arith.constant 0 : i32
    return %arg1, %c0_i32 : i32, i32
  }
}

module attributes {stable_mosaic.version = 11 : i64} {
  func.func @_fused_blocks_kernel(%arg0: i32, %arg1: memref<32x32xf32, #tpu.memory_space<vmem>>, %arg2: memref<32x32xf32, #tpu.memory_space<vmem>>, %arg3: memref<1x1x32xf32, #tpu.memory_space<vmem>>, %arg4: memref<1x1x32xf32, #tpu.memory_space<vmem>>, %arg5: memref<1x32x32xf32, #tpu.memory_space<vmem>>, %arg6: memref<1x1x32xf32, #tpu.memory_space<vmem>>, %arg7: memref<1x32x32xf32, #tpu.memory_space<vmem>>, %arg8: memref<1x1x32xf32, #tpu.memory_space<vmem>>, %arg9: memref<1x32x32xf32, #tpu.memory_space<vmem>>, %arg10: memref<1x1x32xf32, #tpu.memory_space<vmem>>, %arg11: memref<32x32xf32, #tpu.memory_space<vmem>>, %arg12: memref<32x32xf32, #tpu.memory_space<vmem>>) attributes {dimension_semantics = [#tpu.dimension_semantics<parallel>], iteration_bounds = array<i64: 1>, scalar_prefetch = 0 : i64, scratch_operands = 0 : i64, tpu.core_type = #tpu.core_type<tc>, window_params = [{transform_indices = @transform_0, window_bounds = array<i64: 32, 32>}, {transform_indices = @transform_1, window_bounds = array<i64: 32, 32>}, {pipeline_mode = #tpu.pipeline_mode<synchronous>, transform_indices = @transform_2, window_bounds = array<i64: 1, 1, 32>}, {pipeline_mode = #tpu.pipeline_mode<synchronous>, transform_indices = @transform_3, window_bounds = array<i64: 1, 1, 32>}, {pipeline_mode = #tpu.pipeline_mode<synchronous>, transform_indices = @transform_4, window_bounds = array<i64: 1, 32, 32>}, {pipeline_mode = #tpu.pipeline_mode<synchronous>, transform_indices = @transform_5, window_bounds = array<i64: 1, 1, 32>}, {pipeline_mode = #tpu.pipeline_mode<synchronous>, transform_indices = @transform_6, window_bounds = array<i64: 1, 32, 32>}, {pipeline_mode = #tpu.pipeline_mode<synchronous>, transform_indices = @transform_7, window_bounds = array<i64: 1, 1, 32>}, {pipeline_mode = #tpu.pipeline_mode<synchronous>, transform_indices = @transform_8, window_bounds = array<i64: 1, 32, 32>}, {pipeline_mode = #tpu.pipeline_mode<synchronous>, transform_indices = @transform_9, window_bounds = array<i64: 1, 1, 32>}, {transform_indices = @transform_10, window_bounds = array<i64: 32, 32>}, {transform_indices = @transform_11, window_bounds = array<i64: 32, 32>}]} {
    %c0 = arith.constant 0 : index
    %c0_0 = arith.constant 0 : index
    %0 = vector.load %arg1[%c0, %c0_0] : memref<32x32xf32, #tpu.memory_space<vmem>>, vector<32x32xf32>
    %c0_1 = arith.constant 0 : index
    %c0_2 = arith.constant 0 : index
    %1 = vector.load %arg2[%c0_1, %c0_2] : memref<32x32xf32, #tpu.memory_space<vmem>>, vector<32x32xf32>
    %2 = arith.addf %1, %0 : vector<32x32xf32>
    %cst = arith.constant dense<0.000000e+00> : vector<32xf32>
    %3 = vector.multi_reduction <add>, %2, %cst [1] : vector<32x32xf32> to vector<32xf32>
    %4 = vector.shape_cast %3 : vector<32xf32> to vector<32x1xf32>
    %cst_3 = arith.constant 3.200000e+01 : f32
    %5 = vector.broadcast %cst_3 : f32 to vector<32x1xf32>
    %6 = arith.divf %4, %5 : vector<32x1xf32>
    %7 = vector.broadcast %6 : vector<32x1xf32> to vector<32x32xf32>
    %8 = arith.subf %2, %7 : vector<32x32xf32>
    %9 = arith.mulf %8, %8 : vector<32x32xf32>
    %cst_4 = arith.constant dense<0.000000e+00> : vector<32xf32>
    %10 = vector.multi_reduction <add>, %9, %cst_4 [1] : vector<32x32xf32> to vector<32xf32>
    %11 = vector.shape_cast %10 : vector<32xf32> to vector<32x1xf32>
    %cst_5 = arith.constant 3.200000e+01 : f32
    %12 = vector.broadcast %cst_5 : f32 to vector<32x1xf32>
    %13 = arith.divf %11, %12 : vector<32x1xf32>
    %14 = vector.broadcast %6 : vector<32x1xf32> to vector<32x32xf32>
    %15 = arith.subf %2, %14 : vector<32x32xf32>
    %cst_6 = arith.constant 9.99999974E-6 : f32
    %16 = vector.broadcast %cst_6 : f32 to vector<32x1xf32>
    %17 = arith.addf %13, %16 : vector<32x1xf32>
    %18 = math.rsqrt %17 : vector<32x1xf32>
    %19 = vector.broadcast %18 : vector<32x1xf32> to vector<32x32xf32>
    %20 = arith.mulf %15, %19 : vector<32x32xf32>
    %c0_7 = arith.constant 0 : index
    %c0_8 = arith.constant 0 : index
    %c0_9 = arith.constant 0 : index
    %21 = vector.load %arg3[%c0_7, %c0_8, %c0_9] : memref<1x1x32xf32, #tpu.memory_space<vmem>>, vector<1x1x32xf32>
    %22 = vector.shape_cast %21 : vector<1x1x32xf32> to vector<1x32xf32>
    %23 = vector.broadcast %22 : vector<1x32xf32> to vector<32x32xf32>
    %24 = arith.mulf %20, %23 : vector<32x32xf32>
    %c0_10 = arith.constant 0 : index
    %c0_11 = arith.constant 0 : index
    %c0_12 = arith.constant 0 : index
    %25 = vector.load %arg4[%c0_10, %c0_11, %c0_12] : memref<1x1x32xf32, #tpu.memory_space<vmem>>, vector<1x1x32xf32>
    %26 = vector.shape_cast %25 : vector<1x1x32xf32> to vector<1x32xf32>
    %27 = vector.broadcast %26 : vector<1x32xf32> to vector<32x32xf32>
    %28 = arith.addf %24, %27 : vector<32x32xf32>
    %c0_13 = arith.constant 0 : index
    %c0_14 = arith.constant 0 : index
    %c0_15 = arith.constant 0 : index
    %29 = vector.load %arg5[%c0_13, %c0_14, %c0_15] : memref<1x32x32xf32, #tpu.memory_space<vmem>>, vector<1x32x32xf32>
    %30 = vector.shape_cast %29 : vector<1x32x32xf32> to vector<32x32xf32>
    %cst_16 = arith.constant dense<0.000000e+00> : vector<32x32xf32>
    %31 = tpu.matmul %28, %30, %cst_16 {dimension_numbers = #tpu.dot_dimension_numbers<[1], [0], [0], [1], [0, 0, 1, 1], [], []>} : vector<32x32xf32>, vector<32x32xf32>, vector<32x32xf32> -> vector<32x32xf32>
    %c0_17 = arith.constant 0 : index
    %c0_18 = arith.constant 0 : index
    %c0_19 = arith.constant 0 : index
    %32 = vector.load %arg6[%c0_17, %c0_18, %c0_19] : memref<1x1x32xf32, #tpu.memory_space<vmem>>, vector<1x1x32xf32>
    %33 = vector.shape_cast %32 : vector<1x1x32xf32> to vector<1x32xf32>
    %34 = vector.broadcast %33 : vector<1x32xf32> to vector<32x32xf32>
    %35 = arith.addf %31, %34 : vector<32x32xf32>
    %c0_20 = arith.constant 0 : index
    %c0_21 = arith.constant 0 : index
    %c0_22 = arith.constant 0 : index
    %36 = vector.load %arg7[%c0_20, %c0_21, %c0_22] : memref<1x32x32xf32, #tpu.memory_space<vmem>>, vector<1x32x32xf32>
    %37 = vector.shape_cast %36 : vector<1x32x32xf32> to vector<32x32xf32>
    %cst_23 = arith.constant dense<0.000000e+00> : vector<32x32xf32>
    %38 = tpu.matmul %28, %37, %cst_23 {dimension_numbers = #tpu.dot_dimension_numbers<[1], [0], [0], [1], [0, 0, 1, 1], [], []>} : vector<32x32xf32>, vector<32x32xf32>, vector<32x32xf32> -> vector<32x32xf32>
    %c0_24 = arith.constant 0 : index
    %c0_25 = arith.constant 0 : index
    %c0_26 = arith.constant 0 : index
    %39 = vector.load %arg8[%c0_24, %c0_25, %c0_26] : memref<1x1x32xf32, #tpu.memory_space<vmem>>, vector<1x1x32xf32>
    %40 = vector.shape_cast %39 : vector<1x1x32xf32> to vector<1x32xf32>
    %41 = vector.broadcast %40 : vector<1x32xf32> to vector<32x32xf32>
    %42 = arith.addf %38, %41 : vector<32x32xf32>
    %43 = arith.negf %42 : vector<32x32xf32>
    %44 = math.exp %43 : vector<32x32xf32>
    %cst_27 = arith.constant 1.000000e+00 : f32
    %45 = vector.broadcast %cst_27 : f32 to vector<32x32xf32>
    %46 = arith.addf %45, %44 : vector<32x32xf32>
    %47 = arith.divf %45, %46 : vector<32x32xf32>
    %48 = arith.mulf %42, %47 : vector<32x32xf32>
    %49 = arith.mulf %35, %48 : vector<32x32xf32>
    %c0_28 = arith.constant 0 : index
    %c0_29 = arith.constant 0 : index
    %c0_30 = arith.constant 0 : index
    %50 = vector.load %arg9[%c0_28, %c0_29, %c0_30] : memref<1x32x32xf32, #tpu.memory_space<vmem>>, vector<1x32x32xf32>
    %51 = vector.shape_cast %50 : vector<1x32x32xf32> to vector<32x32xf32>
    %cst_31 = arith.constant dense<0.000000e+00> : vector<32x32xf32>
    %52 = tpu.matmul %49, %51, %cst_31 {dimension_numbers = #tpu.dot_dimension_numbers<[1], [0], [0], [1], [0, 0, 1, 1], [], []>} : vector<32x32xf32>, vector<32x32xf32>, vector<32x32xf32> -> vector<32x32xf32>
    %c0_32 = arith.constant 0 : index
    %c0_33 = arith.constant 0 : index
    %c0_34 = arith.constant 0 : index
    %53 = vector.load %arg10[%c0_32, %c0_33, %c0_34] : memref<1x1x32xf32, #tpu.memory_space<vmem>>, vector<1x1x32xf32>
    %54 = vector.shape_cast %53 : vector<1x1x32xf32> to vector<1x32xf32>
    %55 = vector.broadcast %54 : vector<1x32xf32> to vector<32x32xf32>
    %56 = arith.addf %52, %55 : vector<32x32xf32>
    %c0_35 = arith.constant 0 : index
    %c0_36 = arith.constant 0 : index
    %57 = vector.load %arg11[%c0_35, %c0_36] : memref<32x32xf32, #tpu.memory_space<vmem>>, vector<32x32xf32>
    tpu.vector_store %arg11[%c0_35, %c0_36], %56 {strides = array<i32>} : memref<32x32xf32, #tpu.memory_space<vmem>>, vector<32x32xf32>,
    %c0_37 = arith.constant 0 : index
    %c0_38 = arith.constant 0 : index
    %58 = vector.load %arg12[%c0_37, %c0_38] : memref<32x32xf32, #tpu.memory_space<vmem>>, vector<32x32xf32>
    tpu.vector_store %arg12[%c0_37, %c0_38], %2 {strides = array<i32>} : memref<32x32xf32, #tpu.memory_space<vmem>>, vector<32x32xf32>,
    return
  }
  func.func @transform_0(%arg0: i32) -> (i32, i32) {
    %c0_i32 = arith.constant 0 : i32
    %c0_i32_0 = arith.constant 0 : i32
    return %arg0, %c0_i32 : i32, i32
  }
  func.func @transform_1(%arg0: i32) -> (i32, i32) {
    %c0_i32 = arith.constant 0 : i32
    %c0_i32_0 = arith.constant 0 : i32
    return %arg0, %c0_i32 : i32, i32
  }
  func.func @transform_2(%arg0: i32) -> (i32, i32, i32) {
    %c0_i32 = arith.constant 0 : i32
    %c0_i32_0 = arith.constant 0 : i32
    %c0_i32_1 = arith.constant 0 : i32
    %c0_i32_2 = arith.constant 0 : i32
    return %c0_i32, %c0_i32_0, %c0_i32_1 : i32, i32, i32
  }
  func.func @transform_3(%arg0: i32) -> (i32, i32, i32) {
    %c0_i32 = arith.constant 0 : i32
    %c0_i32_0 = arith.constant 0 : i32
    %c0_i32_1 = arith.constant 0 : i32
    %c0_i32_2 = arith.constant 0 : i32
    return %c0_i32, %c0_i32_0, %c0_i32_1 : i32, i32, i32
  }
  func.func @transform_4(%arg0: i32) -> (i32, i32, i32) {
    %c0_i32 = arith.constant 0 : i32
    %c0_i32_0 = arith.constant 0 : i32
    %c0_i32_1 = arith.constant 0 : i32
    %c0_i32_2 = arith.constant 0 : i32
    return %c0_i32, %c0_i32_0, %c0_i32_1 : i32, i32, i32
  }
  func.func @transform_5(%arg0: i32) -> (i32, i32, i32) {
    %c0_i32 = arith.constant 0 : i32
    %c0_i32_0 = arith.constant 0 : i32
    %c0_i32_1 = arith.constant 0 : i32
    %c0_i32_2 = arith.constant 0 : i32
    return %c0_i32, %c0_i32_0, %c0_i32_1 : i32, i32, i32
  }
  func.func @transform_6(%arg0: i32) -> (i32, i32, i32) {
    %c0_i32 = arith.constant 0 : i32
    %c0_i32_0 = arith.constant 0 : i32
    %c0_i32_1 = arith.constant 0 : i32
    %c0_i32_2 = arith.constant 0 : i32
    return %c0_i32, %c0_i32_0, %c0_i32_1 : i32, i32, i32
  }
  func.func @transform_7(%arg0: i32) -> (i32, i32, i32) {
    %c0_i32 = arith.constant 0 : i32
    %c0_i32_0 = arith.constant 0 : i32
    %c0_i32_1 = arith.constant 0 : i32
    %c0_i32_2 = arith.constant 0 : i32
    return %c0_i32, %c0_i32_0, %c0_i32_1 : i32, i32, i32
  }
  func.func @transform_8(%arg0: i32) -> (i32, i32, i32) {
    %c0_i32 = arith.constant 0 : i32
    %c0_i32_0 = arith.constant 0 : i32
    %c0_i32_1 = arith.constant 0 : i32
    %c0_i32_2 = arith.constant 0 : i32
    return %c0_i32, %c0_i32_0, %c0_i32_1 : i32, i32, i32
  }
  func.func @transform_9(%arg0: i32) -> (i32, i32, i32) {
    %c0_i32 = arith.constant 0 : i32
    %c0_i32_0 = arith.constant 0 : i32
    %c0_i32_1 = arith.constant 0 : i32
    %c0_i32_2 = arith.constant 0 : i32
    return %c0_i32, %c0_i32_0, %c0_i32_1 : i32, i32, i32
  }
  func.func @transform_10(%arg0: i32) -> (i32, i32) {
    %c0_i32 = arith.constant 0 : i32
    %c0_i32_0 = arith.constant 0 : i32
    return %arg0, %c0_i32 : i32, i32
  }
  func.func @transform_11(%arg0: i32) -> (i32, i32) {
    %c0_i32 = arith.constant 0 : i32
    %c0_i32_0 = arith.constant 0 : i32
    return %arg0, %c0_i32 : i32, i32
  }
}

module attributes {stable_mosaic.version = 11 : i64} {
  func.func @_matmul_bias_kernel(%arg0: i32, %arg1: memref<8x768xf32, #tpu.memory_space<vmem>>, %arg2: memref<768x32xf32, #tpu.memory_space<vmem>>, %arg3: memref<1x32xf32, #tpu.memory_space<vmem>>, %arg4: memref<8x32xf32, #tpu.memory_space<vmem>>) attributes {dimension_semantics = [#tpu.dimension_semantics<parallel>], iteration_bounds = array<i64: 1>, scalar_prefetch = 0 : i64, scratch_operands = 0 : i64, tpu.core_type = #tpu.core_type<tc>, window_params = [{transform_indices = @transform_0, window_bounds = array<i64: 8, 768>}, {pipeline_mode = #tpu.pipeline_mode<synchronous>, transform_indices = @transform_1, window_bounds = array<i64: 768, 32>}, {pipeline_mode = #tpu.pipeline_mode<synchronous>, transform_indices = @transform_2, window_bounds = array<i64: 1, 32>}, {transform_indices = @transform_3, window_bounds = array<i64: 8, 32>}]} {
    %c0 = arith.constant 0 : index
    %c0_0 = arith.constant 0 : index
    %0 = vector.load %arg1[%c0, %c0_0] : memref<8x768xf32, #tpu.memory_space<vmem>>, vector<8x768xf32>
    %c0_1 = arith.constant 0 : index
    %c0_2 = arith.constant 0 : index
    %1 = vector.load %arg2[%c0_1, %c0_2] : memref<768x32xf32, #tpu.memory_space<vmem>>, vector<768x32xf32>
    %cst = arith.constant dense<0.000000e+00> : vector<8x32xf32>
    %2 = tpu.matmul %0, %1, %cst {dimension_numbers = #tpu.dot_dimension_numbers<[1], [0], [0], [1], [0, 0, 1, 1], [], []>} : vector<8x768xf32>, vector<768x32xf32>, vector<8x32xf32> -> vector<8x32xf32>
    %c0_3 = arith.constant 0 : index
    %c0_4 = arith.constant 0 : index
    %3 = vector.load %arg3[%c0_3, %c0_4] : memref<1x32xf32, #tpu.memory_space<vmem>>, vector<1x32xf32>
    %4 = vector.broadcast %3 : vector<1x32xf32> to vector<8x32xf32>
    %5 = arith.addf %2, %4 : vector<8x32xf32>
    %c0_5 = arith.constant 0 : index
    %c0_6 = arith.constant 0 : index
    %6 = vector.load %arg4[%c0_5, %c0_6] : memref<8x32xf32, #tpu.memory_space<vmem>>, vector<8x32xf32>
    tpu.vector_store %arg4[%c0_5, %c0_6], %5 {strides = array<i32>} : memref<8x32xf32, #tpu.memory_space<vmem>>, vector<8x32xf32>,
    return
  }
  func.func @transform_0(%arg0: i32) -> (i32, i32) {
    %c0_i32 = arith.constant 0 : i32
    %c0_i32_0 = arith.constant 0 : i32
    return %arg0, %c0_i32 : i32, i32
  }
  func.func @transform_1(%arg0: i32) -> (i32, i32) {
    %c0_i32 = arith.constant 0 : i32
    %c0_i32_0 = arith.constant 0 : i32
    %c0_i32_1 = arith.constant 0 : i32
    return %c0_i32, %c0_i32_0 : i32, i32
  }
  func.func @transform_2(%arg0: i32) -> (i32, i32) {
    %c0_i32 = arith.constant 0 : i32
    %c0_i32_0 = arith.constant 0 : i32
    %c0_i32_1 = arith.constant 0 : i32
    return %c0_i32, %c0_i32_0 : i32, i32
  }
  func.func @transform_3(%arg0: i32) -> (i32, i32) {
    %c0_i32 = arith.constant 0 : i32
    %c0_i32_0 = arith.constant 0 : i32
    return %arg0, %c0_i32 : i32, i32
  }
}

module attributes {stable_mosaic.version = 11 : i64} {
  func.func @_bn_kernel(%arg0: i32, %arg1: i32, %arg2: memref<8x128xf32, #tpu.memory_space<vmem>>, %arg3: memref<1x128xf32, #tpu.memory_space<vmem>>, %arg4: memref<1x128xf32, #tpu.memory_space<vmem>>, %arg5: memref<128x128xf32, #tpu.memory_space<vmem>>, %arg6: memref<8x128xf32, #tpu.memory_space<vmem>>, %arg7: memref<1x128xf32, #tpu.memory_space<vmem>>, %arg8: memref<1x128xf32, #tpu.memory_space<vmem>>) attributes {dimension_semantics = [#tpu.dimension_semantics<arbitrary>, #tpu.dimension_semantics<arbitrary>], iteration_bounds = array<i64: 2, 1>, scalar_prefetch = 0 : i64, scratch_operands = 2 : i64, tpu.core_type = #tpu.core_type<tc>, window_params = [{transform_indices = @transform_0, window_bounds = array<i64: 8, 128>}, {pipeline_mode = #tpu.pipeline_mode<synchronous>, transform_indices = @transform_1, window_bounds = array<i64: 1, 128>}, {pipeline_mode = #tpu.pipeline_mode<synchronous>, transform_indices = @transform_2, window_bounds = array<i64: 1, 128>}, {pipeline_mode = #tpu.pipeline_mode<synchronous>, transform_indices = @transform_3, window_bounds = array<i64: 128, 128>}, {transform_indices = @transform_4, window_bounds = array<i64: 8, 128>}]} {
    %c0_i32 = arith.constant 0 : i32
    %0 = arith.cmpi eq, %arg0, %c0_i32 : i32
    %c0_i32_0 = arith.constant 0 : i32
    %1 = arith.cmpi eq, %arg1, %c0_i32_0 : i32
    %2 = arith.andi %0, %1 : i1
    %3 = arith.extui %2 : i1 to i32
    %c0_i32_1 = arith.constant 0 : i32
    %4 = arith.cmpi ne, %3, %c0_i32_1 : i32
    scf.if %4 {
      %cst = arith.constant 0.000000e+00 : f32
      %16 = vector.broadcast %cst : f32 to vector<1x128xf32>
      %c0 = arith.constant 0 : index
      %c0_8 = arith.constant 0 : index
      %17 = vector.load %arg7[%c0, %c0_8] : memref<1x128xf32, #tpu.memory_space<vmem>>, vector<1x128xf32>
      tpu.vector_store %arg7[%c0, %c0_8], %16 {strides = array<i32>} : memref<1x128xf32, #tpu.memory_space<vmem>>, vector<1x128xf32>,
      %cst_9 = arith.constant 0.000000e+00 : f32
      %18 = vector.broadcast %cst_9 : f32 to vector<1x128xf32>
      %c0_10 = arith.constant 0 : index
      %c0_11 = arith.constant 0 : index
      %19 = vector.load %arg8[%c0_10, %c0_11] : memref<1x128xf32, #tpu.memory_space<vmem>>, vector<1x128xf32>
      tpu.vector_store %arg8[%c0_10, %c0_11], %18 {strides = array<i32>} : memref<1x128xf32, #tpu.memory_space<vmem>>, vector<1x128xf32>,
    } else {
    }
    %c0_i32_2 = arith.constant 0 : i32
    %5 = arith.cmpi eq, %arg0, %c0_i32_2 : i32
    %6 = arith.extui %5 : i1 to i32
    %c0_i32_3 = arith.constant 0 : i32
    %7 = arith.cmpi ne, %6, %c0_i32_3 : i32
    scf.if %7 {
      %c0 = arith.constant 0 : index
      %c0_8 = arith.constant 0 : index
      %16 = vector.load %arg2[%c0, %c0_8] : memref<8x128xf32, #tpu.memory_space<vmem>>, vector<8x128xf32>
      %c0_9 = arith.constant 0 : index
      %c0_10 = arith.constant 0 : index
      %17 = vector.load %arg7[%c0_9, %c0_10] : memref<1x128xf32, #tpu.memory_space<vmem>>, vector<1x128xf32>
      %cst = arith.constant dense<0.000000e+00> : vector<128xf32>
      %18 = vector.multi_reduction <add>, %16, %cst [0] : vector<8x128xf32> to vector<128xf32>
      %19 = vector.shape_cast %18 : vector<128xf32> to vector<1x128xf32>
      %20 = arith.addf %17, %19 : vector<1x128xf32>
      %c0_11 = arith.constant 0 : index
      %c0_12 = arith.constant 0 : index
      %21 = vector.load %arg7[%c0_11, %c0_12] : memref<1x128xf32, #tpu.memory_space<vmem>>, vector<1x128xf32>
      tpu.vector_store %arg7[%c0_11, %c0_12], %20 {strides = array<i32>} : memref<1x128xf32, #tpu.memory_space<vmem>>, vector<1x128xf32>,
      %c0_13 = arith.constant 0 : index
      %c0_14 = arith.constant 0 : index
      %22 = vector.load %arg8[%c0_13, %c0_14] : memref<1x128xf32, #tpu.memory_space<vmem>>, vector<1x128xf32>
      %23 = arith.mulf %16, %16 : vector<8x128xf32>
      %cst_15 = arith.constant dense<0.000000e+00> : vector<128xf32>
      %24 = vector.multi_reduction <add>, %23, %cst_15 [0] : vector<8x128xf32> to vector<128xf32>
      %25 = vector.shape_cast %24 : vector<128xf32> to vector<1x128xf32>
      %26 = arith.addf %22, %25 : vector<1x128xf32>
      %c0_16 = arith.constant 0 : index
      %c0_17 = arith.constant 0 : index
      %27 = vector.load %arg8[%c0_16, %c0_17] : memref<1x128xf32, #tpu.memory_space<vmem>>, vector<1x128xf32>
      tpu.vector_store %arg8[%c0_16, %c0_17], %26 {strides = array<i32>} : memref<1x128xf32, #tpu.memory_space<vmem>>, vector<1x128xf32>,
    } else {
    }
    %c1_i32 = arith.constant 1 : i32
    %8 = arith.cmpi eq, %arg0, %c1_i32 : i32
    %c0_i32_4 = arith.constant 0 : i32
    %9 = arith.cmpi eq, %arg1, %c0_i32_4 : i32
    %10 = arith.andi %8, %9 : i1
    %11 = arith.extui %10 : i1 to i32
    %c0_i32_5 = arith.constant 0 : i32
    %12 = arith.cmpi ne, %11, %c0_i32_5 : i32
    scf.if %12 {
      %c0 = arith.constant 0 : index
      %c0_8 = arith.constant 0 : index
      %16 = vector.load %arg7[%c0, %c0_8] : memref<1x128xf32, #tpu.memory_space<vmem>>, vector<1x128xf32>
      %c0_9 = arith.constant 0 : index
      %c0_10 = arith.constant 0 : index
      %17 = vector.load %arg5[%c0_9, %c0_10] : memref<128x128xf32, #tpu.memory_space<vmem>>, vector<128x128xf32>
      %cst = arith.constant dense<0.000000e+00> : vector<1x128xf32>
      %18 = tpu.matmul %16, %17, %cst {dimension_numbers = #tpu.dot_dimension_numbers<[1], [0], [0], [1], [0, 0, 1, 1], [], []>} : vector<1x128xf32>, vector<128x128xf32>, vector<1x128xf32> -> vector<1x128xf32>
      %c0_11 = arith.constant 0 : index
      %c0_12 = arith.constant 0 : index
      %19 = vector.load %arg8[%c0_11, %c0_12] : memref<1x128xf32, #tpu.memory_space<vmem>>, vector<1x128xf32>
      %c0_13 = arith.constant 0 : index
      %c0_14 = arith.constant 0 : index
      %20 = vector.load %arg5[%c0_13, %c0_14] : memref<128x128xf32, #tpu.memory_space<vmem>>, vector<128x128xf32>
      %cst_15 = arith.constant dense<0.000000e+00> : vector<1x128xf32>
      %21 = tpu.matmul %19, %20, %cst_15 {dimension_numbers = #tpu.dot_dimension_numbers<[1], [0], [0], [1], [0, 0, 1, 1], [], []>} : vector<1x128xf32>, vector<128x128xf32>, vector<1x128xf32> -> vector<1x128xf32>
      %cst_16 = arith.constant 1.250000e-01 : f32
      %22 = vector.broadcast %cst_16 : f32 to vector<1x128xf32>
      %23 = arith.mulf %18, %22 : vector<1x128xf32>
      %cst_17 = arith.constant 1.250000e-01 : f32
      %24 = vector.broadcast %cst_17 : f32 to vector<1x128xf32>
      %25 = arith.mulf %21, %24 : vector<1x128xf32>
      %26 = arith.mulf %23, %23 : vector<1x128xf32>
      %27 = arith.subf %25, %26 : vector<1x128xf32>
      %c0_18 = arith.constant 0 : index
      %c0_19 = arith.constant 0 : index
      %28 = vector.load %arg7[%c0_18, %c0_19] : memref<1x128xf32, #tpu.memory_space<vmem>>, vector<1x128xf32>
      tpu.vector_store %arg7[%c0_18, %c0_19], %23 {strides = array<i32>} : memref<1x128xf32, #tpu.memory_space<vmem>>, vector<1x128xf32>,
      %cst_20 = arith.constant 9.99999974E-6 : f32
      %29 = vector.broadcast %cst_20 : f32 to vector<1x128xf32>
      %30 = arith.addf %27, %29 : vector<1x128xf32>
      %31 = math.rsqrt %30 : vector<1x128xf32>
      %c0_21 = arith.constant 0 : index
      %c0_22 = arith.constant 0 : index
      %32 = vector.load %arg8[%c0_21, %c0_22] : memref<1x128xf32, #tpu.memory_space<vmem>>, vector<1x128xf32>
      tpu.vector_store %arg8[%c0_21, %c0_22], %31 {strides = array<i32>} : memref<1x128xf32, #tpu.memory_space<vmem>>, vector<1x128xf32>,
    } else {
    }
    %c1_i32_6 = arith.constant 1 : i32
    %13 = arith.cmpi eq, %arg0, %c1_i32_6 : i32
    %14 = arith.extui %13 : i1 to i32
    %c0_i32_7 = arith.constant 0 : i32
    %15 = arith.cmpi ne, %14, %c0_i32_7 : i32
    scf.if %15 {
      %c0 = arith.constant 0 : index
      %c0_8 = arith.constant 0 : index
      %16 = vector.load %arg2[%c0, %c0_8] : memref<8x128xf32, #tpu.memory_space<vmem>>, vector<8x128xf32>
      %c0_9 = arith.constant 0 : index
      %c0_10 = arith.constant 0 : index
      %17 = vector.load %arg7[%c0_9, %c0_10] : memref<1x128xf32, #tpu.memory_space<vmem>>, vector<1x128xf32>
      %18 = vector.broadcast %17 : vector<1x128xf32> to vector<8x128xf32>
      %19 = arith.subf %16, %18 : vector<8x128xf32>
      %c0_11 = arith.constant 0 : index
      %c0_12 = arith.constant 0 : index
      %20 = vector.load %arg8[%c0_11, %c0_12] : memref<1x128xf32, #tpu.memory_space<vmem>>, vector<1x128xf32>
      %21 = vector.broadcast %20 : vector<1x128xf32> to vector<8x128xf32>
      %22 = arith.mulf %19, %21 : vector<8x128xf32>
      %c0_13 = arith.constant 0 : index
      %c0_14 = arith.constant 0 : index
      %23 = vector.load %arg3[%c0_13, %c0_14] : memref<1x128xf32, #tpu.memory_space<vmem>>, vector<1x128xf32>
      %24 = vector.broadcast %23 : vector<1x128xf32> to vector<8x128xf32>
      %25 = arith.mulf %22, %24 : vector<8x128xf32>
      %c0_15 = arith.constant 0 : index
      %c0_16 = arith.constant 0 : index
      %26 = vector.load %arg4[%c0_15, %c0_16] : memref<1x128xf32, #tpu.memory_space<vmem>>, vector<1x128xf32>
      %27 = vector.broadcast %26 : vector<1x128xf32> to vector<8x128xf32>
      %28 = arith.addf %25, %27 : vector<8x128xf32>
      %c0_17 = arith.constant 0 : index
      %c0_18 = arith.constant 0 : index
      %29 = vector.load %arg6[%c0_17, %c0_18] : memref<8x128xf32, #tpu.memory_space<vmem>>, vector<8x128xf32>
      tpu.vector_store %arg6[%c0_17, %c0_18], %28 {strides = array<i32>} : memref<8x128xf32, #tpu.memory_space<vmem>>, vector<8x128xf32>,
    } else {
    }
    return
  }
  func.func @transform_0(%arg0: i32, %arg1: i32) -> (i32, i32) {
    %c0_i32 = arith.constant 0 : i32
    %c0_i32_0 = arith.constant 0 : i32
    return %arg1, %c0_i32 : i32, i32
  }
  func.func @transform_1(%arg0: i32, %arg1: i32) -> (i32, i32) {
    %c0_i32 = arith.constant 0 : i32
    %c0_i32_0 = arith.constant 0 : i32
    %c0_i32_1 = arith.constant 0 : i32
    return %c0_i32, %c0_i32_0 : i32, i32
  }
  func.func @transform_2(%arg0: i32, %arg1: i32) -> (i32, i32) {
    %c0_i32 = arith.constant 0 : i32
    %c0_i32_0 = arith.constant 0 : i32
    %c0_i32_1 = arith.constant 0 : i32
    return %c0_i32, %c0_i32_0 : i32, i32
  }
  func.func @transform_3(%arg0: i32, %arg1: i32) -> (i32, i32) {
    %c0_i32 = arith.constant 0 : i32
    %c0_i32_0 = arith.constant 0 : i32
    %c0_i32_1 = arith.constant 0 : i32
    return %c0_i32, %c0_i32_0 : i32, i32
  }
  func.func @transform_4(%arg0: i32, %arg1: i32) -> (i32, i32) {
    %c0_i32 = arith.constant 0 : i32
    %c0_i32_0 = arith.constant 0 : i32
    return %arg1, %c0_i32 : i32, i32
  }
}

</mosaic_0001>

<bundles_post_ra>
// kernel: _lambda_.23
= control target key start
LH: loop header
LB: loop body
LE: loop exit
PB: predicated region body
PF: predicated region fallthrough
CT: control target
= control target key end

     0   :  { %vm41_vm0 = vcmask 261120   ;;  %s483_s1 = inlined_call_operand.vmem [shape: f32[32,128], index: 1, kind: input, shape index: {}]   ;;  %s484_s0 = inlined_call_operand.vmem [shape: f32[128,32], index: 0, kind: input, shape index: {}]   ;;  %s485_s2 = inlined_call_operand.vmem [shape: f32[1,128], index: 2, kind: input, shape index: {}]   ;;  %s486_s3 = inlined_call_operand.vmem [shape: f32[128,128], index: 3, kind: output, shape index: {}]  }
   0x1   :  { %v30_v0 = vld [vmem:[%s483_s1] sm:$0xff]  ;;  %v31_v1 = vld [vmem:[%s483_s1 + $0x8] sm:$0xff]  ;;  %v32_v2 = vld [vmem:[%s483_s1 + $0x10] sm:$0xff] }
   0x2   :  { %v324_v3 = vpack.c.bf16 %v31_v1, %v30_v0  ;;  %v33_v4 = vld [vmem:[%s483_s1 + $0x18] sm:$0xff]  ;;  %v14_v5 = vld [vmem:[%s484_s0] sm:$0xff]  ;;  %v15_v8 = vld [vmem:[%s484_s0 + $0x8] sm:$0xff] }
   0x3   :  { %v22_v6 = vld [vmem:[%s484_s0 + $0x40] sm:$0xff]  ;;  %v328_v7 = vpack.c.bf16 %v33_v4, %v32_v2  ;;  %300 = vmatprep.mubr.msk.f32.mxu0 %vm41_vm0, %v14_v5  ;;  %v23_v9 = vld [vmem:[%s484_s0 + $0x48] sm:$0xff]  ;;  %v16_v10 = vld [vmem:[%s484_s0 + $0x10] sm:$0xff] }
   0x4   :  { %312 = vmatprep.mubr.msk.f32.mxu1 %vm41_vm0, %v22_v6  ;;  %325 = vmatprep.subr.bf16.mxu0 %v324_v3  ;;  %v24_v11 = vld [vmem:[%s484_s0 + $0x50] sm:$0xff]  ;;  %v17_v12 = vld [vmem:[%s484_s0 + $0x18] sm:$0xff]  ;;  %v18_v14 = vld [vmem:[%s484_s0 + $0x20] sm:$0xff] }
   0x5   :  { %332 = vmatprep.subr.bf16.mxu1 %v324_v3  ;;  %327 = vmatpush3.bf16.msra.mxu0 %v324_v3  ;;  %v25_v13 = vld [vmem:[%s484_s0 + $0x58] sm:$0xff]  ;;  %v26_v15 = vld [vmem:[%s484_s0 + $0x60] sm:$0xff]  ;;  %v19_v16 = vld [vmem:[%s484_s0 + $0x28] sm:$0xff] }
   0x6   :  { %334 = vmatpush3.bf16.msra.mxu1 %v324_v3  ;;  %329 = vmatprep.subr.bf16.mxu0 %v328_v7  ;;  %v27_v17 = vld [vmem:[%s484_s0 + $0x68] sm:$0xff]  ;;  %v20_v18 = vld [vmem:[%s484_s0 + $0x30] sm:$0xff]  ;;  %v21_v20 = vld [vmem:[%s484_s0 + $0x38] sm:$0xff] }
   0x7   :  { %333 = vmatprep.subr.bf16.mxu1 %v328_v7  ;;  %v28_v19 = vld [vmem:[%s484_s0 + $0x70] sm:$0xff]  ;;  %v29_v21 = vld [vmem:[%s484_s0 + $0x78] sm:$0xff]  ;;  %v255_v22 = vld [vmem:[%s485_s2] ss:$0 sm:$0xff] }
   0x9   :  { %331 = vmatpush3.bf16.msra.mxu0 %v328_v7 }
   0xa   :  { %335 = vmatpush3.bf16.msra.mxu1 %v328_v7 }
   0xc   :  { %301 = vmatmul.mubr.msk.f32.vlgmr.msra.gmra.mrb[0].mxu0 %vm41_vm0, %v15_v8 }
   0xd   :  { %313 = vmatmul.mubr.msk.f32.vlgmr.msra.gmra.mrb[0].mxu1 %vm41_vm0, %v23_v9  ;;  %303 = vmatprep.mubr.msk.f32.mxu0 %vm41_vm0, %v16_v10 }
   0xe   :  { %315 = vmatprep.mubr.msk.f32.mxu1 %vm41_vm0, %v24_v11 }
  0x10   :  { %304 = vmatmul.mubr.msk.f32.gmra.mrb[2].mxu0 %vm41_vm0, %v17_v12 }
  0x11   :  { %316 = vmatmul.mubr.msk.f32.gmra.mrb[2].mxu1 %vm41_vm0, %v25_v13  ;;  %306 = vmatprep.mubr.msk.f32.mxu0 %vm41_vm0, %v18_v14 }
  0x12   :  { %318 = vmatprep.mubr.msk.f32.mxu1 %vm41_vm0, %v26_v15 }
  0x14   :  { %307 = vmatmul.mubr.msk.f32.gmra.mrb[4].mxu0 %vm41_vm0, %v19_v16 }
  0x15   :  { %319 = vmatmul.mubr.msk.f32.gmra.mrb[4].mxu1 %vm41_vm0, %v27_v17  ;;  %309 = vmatprep.mubr.msk.f32.mxu0 %vm41_vm0, %v20_v18 }
  0x16   :  { %321 = vmatprep.mubr.msk.f32.mxu1 %vm41_vm0, %v28_v19 }
  0x18   :  { %310 = vmatmul.mubr.msk.f32.gmra.mrb[6].mxu0 %vm41_vm0, %v21_v20 }
  0x19   :  { %322 = vmatmul.mubr.msk.f32.gmra.mrb[6].mxu1 %vm41_vm0, %v29_v21 }
  0xdf   :  { %v302_v23 = vpop.f32.mrb[0].mxu0 }
  0xe0   :  { %v314_v24 = vpop.f32.mrb[0].mxu1  ;;  %v162_v25 = vadd.f32 %v302_v23, %v255_v22  ;;  %v156_v27 = vpop.f32.mrb[1].mxu0 }
  0xe1   :  { %v202_v26 = vadd.f32 %v314_v24, %v255_v22  ;;  %v196_v28 = vpop.f32.mrb[1].mxu1  ;;  %v157_v29 = vadd.f32 %v255_v22, %v156_v27 }
  0xe2   :  { %v197_v30 = vadd.f32 %v255_v22, %v196_v28  ;;  %236 = vst [vmem:[%s486_s3 + $0x8] sm:$0xff] %v162_v25 }
  0xe3   :  { %244 = vst [vmem:[%s486_s3 + $0x48] sm:$0xff] %v202_v26  ;;  %235 = vst [vmem:[%s486_s3] sm:$0xff] %v157_v29  ;;  %v305_v31 = vpop.f32.mrb[2].mxu0 }
  0xe4   :  { %243 = vst [vmem:[%s486_s3 + $0x40] sm:$0xff] %v197_v30  ;;  %v317_v32 = vpop.f32.mrb[2].mxu1  ;;  %v172_v33 = vadd.f32 %v305_v31, %v255_v22  ;;  %v166_v35 = vpop.f32.mrb[3].mxu0 }
  0xe5   :  { %v212_v34 = vadd.f32 %v317_v32, %v255_v22  ;;  %v206_v36 = vpop.f32.mrb[3].mxu1  ;;  %v167_v37 = vadd.f32 %v255_v22, %v166_v35 }
  0xe6   :  { %v207_v38 = vadd.f32 %v255_v22, %v206_v36  ;;  %238 = vst [vmem:[%s486_s3 + $0x18] sm:$0xff] %v172_v33 }
  0xe7   :  { %246 = vst [vmem:[%s486_s3 + $0x58] sm:$0xff] %v212_v34  ;;  %237 = vst [vmem:[%s486_s3 + $0x10] sm:$0xff] %v167_v37  ;;  %v308_v39 = vpop.f32.mrb[4].mxu0 }
  0xe8   :  { %245 = vst [vmem:[%s486_s3 + $0x50] sm:$0xff] %v207_v38  ;;  %v320_v40 = vpop.f32.mrb[4].mxu1  ;;  %v182_v41 = vadd.f32 %v308_v39, %v255_v22  ;;  %v176_v43 = vpop.f32.mrb[5].mxu0 }
  0xe9   :  { %v222_v42 = vadd.f32 %v320_v40, %v255_v22  ;;  %v216_v44 = vpop.f32.mrb[5].mxu1  ;;  %v177_v45 = vadd.f32 %v255_v22, %v176_v43 }
  0xea   :  { %v217_v46 = vadd.f32 %v255_v22, %v216_v44  ;;  %240 = vst [vmem:[%s486_s3 + $0x28] sm:$0xff] %v182_v41 }
  0xeb   :  { %248 = vst [vmem:[%s486_s3 + $0x68] sm:$0xff] %v222_v42  ;;  %239 = vst [vmem:[%s486_s3 + $0x20] sm:$0xff] %v177_v45  ;;  %v311_v47 = vpop.f32.mrb[6].mxu0 }
  0xec   :  { %247 = vst [vmem:[%s486_s3 + $0x60] sm:$0xff] %v217_v46  ;;  %v323_v48 = vpop.f32.mrb[6].mxu1  ;;  %v192_v49 = vadd.f32 %v311_v47, %v255_v22  ;;  %v186_v51 = vpop.f32.mrb[7].mxu0 }
  0xed   :  { %v232_v50 = vadd.f32 %v323_v48, %v255_v22  ;;  %v226_v52 = vpop.f32.mrb[7].mxu1  ;;  %v187_v53 = vadd.f32 %v255_v22, %v186_v51 }
  0xee   :  { %v227_v54 = vadd.f32 %v255_v22, %v226_v52  ;;  %242 = vst [vmem:[%s486_s3 + $0x38] sm:$0xff] %v192_v49 }
  0xef   :  { %250 = vst [vmem:[%s486_s3 + $0x78] sm:$0xff] %v232_v50  ;;  %241 = vst [vmem:[%s486_s3 + $0x30] sm:$0xff] %v187_v53 }
  0xf0   :  { %249 = vst [vmem:[%s486_s3 + $0x70] sm:$0xff] %v227_v54 }

// kernel: _lambda_.15
= control target key start
LH: loop header
LB: loop body
LE: loop exit
PB: predicated region body
PF: predicated region fallthrough
CT: control target
= control target key end

     0   :  { %vm43_vm0 = vcmask 392192   ;;  %vm237_vm1 = vcmask 261120   ;;  %s520_s1 = inlined_call_operand.vmem [shape: f32[48,32], index: 1, kind: input, shape index: {}]   ;;  %s521_s0 = inlined_call_operand.vmem [shape: f32[128,48], index: 0, kind: input, shape index: {}]   ;;  %s522_s2 = inlined_call_operand.vmem [shape: f32[1,32], index: 2, kind: input, shape index: {}]   ;;  %s523_s3 = inlined_call_operand.vmem [shape: f32[128,32], index: 3, kind: output, shape index: {}]  }
   0x1   :  { %v30_v0 = vld [vmem:[%s520_s1] sm:$0xff]  ;;  %v31_v1 = vld [vmem:[%s520_s1 + $0x8] sm:$0xff]  ;;  %v32_v2 = vld [vmem:[%s520_s1 + $0x10] sm:$0xff] }
   0x2   :  { %v333_v3 = vpack.c.bf16 %v31_v1, %v30_v0  ;;  %v33_v4 = vld [vmem:[%s520_s1 + $0x18] sm:$0xff]  ;;  %v34_v6 = vld [vmem:[%s520_s1 + $0x20] sm:$0xff]  ;;  %v35_v7 = vld [vmem:[%s520_s1 + $0x28] sm:$0xff] }
   0x3   :  { %v337_v5 = vpack.c.bf16 %v33_v4, %v32_v2  ;;  %v14_v8 = vld [vmem:[%s521_s0] sm:$0xff]  ;;  %v341_v10 = vpack.c.bf16 %v35_v7, %v34_v6  ;;  %v15_v11 = vld [vmem:[%s521_s0 + $0x8] sm:$0xff]  ;;  %v16_v13 = vld [vmem:[%s521_s0 + $0x10] sm:$0xff] }
   0x4   :  { %334 = vmatprep.subr.bf16.mxu0 %v333_v3  ;;  %345 = vmatprep.subr.bf16.mxu1 %v333_v3  ;;  %v22_v9 = vld [vmem:[%s521_s0 + $0x40] sm:$0xff]  ;;  %v23_v12 = vld [vmem:[%s521_s0 + $0x48] sm:$0xff]  ;;  %v24_v14 = vld [vmem:[%s521_s0 + $0x50] sm:$0xff] }
   0x5   :  { %336 = vmatpush3.bf16.msra.mxu0 %v333_v3  ;;  %348 = vmatpush3.bf16.msra.mxu1 %v333_v3  ;;  %v17_v15 = vld [vmem:[%s521_s0 + $0x18] sm:$0xff]  ;;  %v18_v17 = vld [vmem:[%s521_s0 + $0x20] sm:$0xff]  ;;  %v19_v19 = vld [vmem:[%s521_s0 + $0x28] sm:$0xff] }
   0x6   :  { %338 = vmatprep.subr.bf16.mxu0 %v337_v5  ;;  %346 = vmatprep.subr.bf16.mxu1 %v337_v5  ;;  %v25_v16 = vld [vmem:[%s521_s0 + $0x58] sm:$0xff]  ;;  %v26_v18 = vld [vmem:[%s521_s0 + $0x60] sm:$0xff]  ;;  %v27_v20 = vld [vmem:[%s521_s0 + $0x68] sm:$0xff] }
   0x7   :  { %309 = vmatprep.mubr.msk.f32.mxu0 %vm43_vm0, %v14_v8  ;;  %321 = vmatprep.mubr.msk.f32.mxu1 %vm43_vm0, %v22_v9  ;;  %v20_v21 = vld [vmem:[%s521_s0 + $0x30] sm:$0xff]  ;;  %v21_v23 = vld [vmem:[%s521_s0 + $0x38] sm:$0xff]  ;;  %v258_v25 = vld [vmem:[%s522_s2] ss:$0 sm:$0xff] }
   0x8   :  { %v28_v22 = vld [vmem:[%s521_s0 + $0x70] sm:$0xff]  ;;  %v29_v24 = vld [vmem:[%s521_s0 + $0x78] sm:$0xff] }
   0x9   :  { %340 = vmatpush3.bf16.msra.mxu0 %v337_v5  ;;  %349 = vmatpush3.bf16.msra.mxu1 %v337_v5 }
   0xa   :  { %342 = vmatprep.subr.bf16.mxu0 %v341_v10  ;;  %347 = vmatprep.subr.bf16.mxu1 %v341_v10 }
   0xd   :  { %344 = vmatpush3.bf16.msra.mxu0 %v341_v10  ;;  %350 = vmatpush3.bf16.msra.mxu1 %v341_v10 }
  0x10   :  { %310 = vmatmul.mubr.msk.f32.vlgmr.msra.gmra.mrb[0].mxu0 %vm43_vm0, %v15_v11  ;;  %322 = vmatmul.mubr.msk.f32.vlgmr.msra.gmra.mrb[0].mxu1 %vm43_vm0, %v23_v12 }
  0x11   :  { %312 = vmatprep.mubr.msk.f32.mxu0 %vm43_vm0, %v16_v13  ;;  %324 = vmatprep.mubr.msk.f32.mxu1 %vm43_vm0, %v24_v14 }
  0x14   :  { %313 = vmatmul.mubr.msk.f32.gmra.mrb[2].mxu0 %vm43_vm0, %v17_v15  ;;  %325 = vmatmul.mubr.msk.f32.gmra.mrb[2].mxu1 %vm43_vm0, %v25_v16 }
  0x15   :  { %315 = vmatprep.mubr.msk.f32.mxu0 %vm43_vm0, %v18_v17  ;;  %327 = vmatprep.mubr.msk.f32.mxu1 %vm43_vm0, %v26_v18 }
  0x18   :  { %316 = vmatmul.mubr.msk.f32.gmra.mrb[4].mxu0 %vm43_vm0, %v19_v19  ;;  %328 = vmatmul.mubr.msk.f32.gmra.mrb[4].mxu1 %vm43_vm0, %v27_v20 }
  0x19   :  { %318 = vmatprep.mubr.msk.f32.mxu0 %vm43_vm0, %v20_v21  ;;  %330 = vmatprep.mubr.msk.f32.mxu1 %vm43_vm0, %v28_v22 }
  0x1c   :  { %319 = vmatmul.mubr.msk.f32.gmra.mrb[6].mxu0 %vm43_vm0, %v21_v23  ;;  %331 = vmatmul.mubr.msk.f32.gmra.mrb[6].mxu1 %vm43_vm0, %v29_v24 }
  0xe3   :  { %v311_v26 = vpop.f32.mrb[0].mxu0  ;;  %v323_v27 = vpop.f32.mrb[0].mxu1 }
  0xe4   :  { %v164_v28 = vadd.f32 %v311_v26, %v258_v25  ;;  %v204_v29 = vadd.f32 %v323_v27, %v258_v25  ;;  %v158_v30 = vpop.f32.mrb[1].mxu0  ;;  %v198_v31 = vpop.f32.mrb[1].mxu1 }
  0xe5   :  { %v159_v32 = vadd.f32 %v258_v25, %v158_v30  ;;  %v199_v33 = vadd.f32 %v258_v25, %v198_v31 }
  0xe6   :  { %239 = vst.msk [vmem:[%s523_s3 + $0x8] sm:$0xff] %vm237_vm1, %v164_v28  ;;  %247 = vst.msk [vmem:[%s523_s3 + $0x48] sm:$0xff] %vm237_vm1, %v204_v29 }
  0xe7   :  { %238 = vst.msk [vmem:[%s523_s3] sm:$0xff] %vm237_vm1, %v159_v32  ;;  %246 = vst.msk [vmem:[%s523_s3 + $0x40] sm:$0xff] %vm237_vm1, %v199_v33  ;;  %v314_v34 = vpop.f32.mrb[2].mxu0  ;;  %v326_v35 = vpop.f32.mrb[2].mxu1 }
  0xe8   :  { %v174_v36 = vadd.f32 %v314_v34, %v258_v25  ;;  %v214_v37 = vadd.f32 %v326_v35, %v258_v25  ;;  %v168_v38 = vpop.f32.mrb[3].mxu0  ;;  %v208_v39 = vpop.f32.mrb[3].mxu1 }
  0xe9   :  { %v169_v40 = vadd.f32 %v258_v25, %v168_v38  ;;  %v209_v41 = vadd.f32 %v258_v25, %v208_v39 }
  0xea   :  { %241 = vst.msk [vmem:[%s523_s3 + $0x18] sm:$0xff] %vm237_vm1, %v174_v36  ;;  %249 = vst.msk [vmem:[%s523_s3 + $0x58] sm:$0xff] %vm237_vm1, %v214_v37 }
  0xeb   :  { %240 = vst.msk [vmem:[%s523_s3 + $0x10] sm:$0xff] %vm237_vm1, %v169_v40  ;;  %248 = vst.msk [vmem:[%s523_s3 + $0x50] sm:$0xff] %vm237_vm1, %v209_v41  ;;  %v317_v42 = vpop.f32.mrb[4].mxu0  ;;  %v329_v43 = vpop.f32.mrb[4].mxu1 }
  0xec   :  { %v184_v44 = vadd.f32 %v317_v42, %v258_v25  ;;  %v224_v45 = vadd.f32 %v329_v43, %v258_v25  ;;  %v178_v46 = vpop.f32.mrb[5].mxu0  ;;  %v218_v47 = vpop.f32.mrb[5].mxu1 }
  0xed   :  { %v179_v48 = vadd.f32 %v258_v25, %v178_v46  ;;  %v219_v49 = vadd.f32 %v258_v25, %v218_v47 }
  0xee   :  { %243 = vst.msk [vmem:[%s523_s3 + $0x28] sm:$0xff] %vm237_vm1, %v184_v44  ;;  %251 = vst.msk [vmem:[%s523_s3 + $0x68] sm:$0xff] %vm237_vm1, %v224_v45 }
  0xef   :  { %242 = vst.msk [vmem:[%s523_s3 + $0x20] sm:$0xff] %vm237_vm1, %v179_v48  ;;  %250 = vst.msk [vmem:[%s523_s3 + $0x60] sm:$0xff] %vm237_vm1, %v219_v49  ;;  %v320_v50 = vpop.f32.mrb[6].mxu0  ;;  %v332_v51 = vpop.f32.mrb[6].mxu1 }
  0xf0   :  { %v194_v52 = vadd.f32 %v320_v50, %v258_v25  ;;  %v234_v53 = vadd.f32 %v332_v51, %v258_v25  ;;  %v188_v54 = vpop.f32.mrb[7].mxu0  ;;  %v228_v55 = vpop.f32.mrb[7].mxu1 }
  0xf1   :  { %v189_v56 = vadd.f32 %v258_v25, %v188_v54  ;;  %v229_v57 = vadd.f32 %v258_v25, %v228_v55 }
  0xf2   :  { %245 = vst.msk [vmem:[%s523_s3 + $0x38] sm:$0xff] %vm237_vm1, %v194_v52  ;;  %253 = vst.msk [vmem:[%s523_s3 + $0x78] sm:$0xff] %vm237_vm1, %v234_v53 }
  0xf3   :  { %244 = vst.msk [vmem:[%s523_s3 + $0x30] sm:$0xff] %vm237_vm1, %v189_v56  ;;  %252 = vst.msk [vmem:[%s523_s3 + $0x70] sm:$0xff] %vm237_vm1, %v229_v57 }

// kernel: _lambda_.14
= control target key start
LH: loop header
LB: loop body
LE: loop exit
PB: predicated region body
PF: predicated region fallthrough
CT: control target
= control target key end

     0   :  { %s807_s12 = smov 0   ;;  %s1006_s0 = inlined_call_operand.vmem [shape: f32[512,12], index: 0, kind: input, shape index: {}]   ;;  %s1007_s1 = inlined_call_operand.vmem [shape: f32[12,32], index: 1, kind: input, shape index: {}]   ;;  %s1008_s2 = inlined_call_operand.vmem [shape: f32[1,32], index: 2, kind: input, shape index: {}]   ;;  %s1009_s3 = inlined_call_operand.vmem [shape: f32[512,32], index: 3, kind: output, shape index: {}]  }
   0x1 LB: > { %s630_s13 = sadd.s32 4294967295, %s784_s12   ;;  %p634_p0 = scmp.ge.s32.totalorder %s784_s12, 1  ;;  %s784_s12 = sphi %s807_s12, %s13_s12  }
   0x2   : > { %p138_p1 = scmp.lt.s32.totalorder %s784_s12, 3 }
   0x4   : > { %p139_p2 = pnand %p634_p0, %p138_p1 }
   0x5   : > { %v206_v0 = vld [vmem:[%s1007_s1] sm:$0xff] (!%p139_p2)  ;;  %v207_v1 = vld [vmem:[%s1007_s1 + $0x8] sm:$0xf] (!%p139_p2)  ;;  %vm312_vm0 = vcmask (!%p139_p2), 1043456   ;;  %s635_s18 = sshll.u32 (!%p139_p2), %s630_s13, 5  ;;  %vm786_vm1 = vmmov (!%p139_p2), 1  }
   0x6   : > { %142 = sbr.rel (%p139_p2) target bundleno = 263 (0x107), region = 32  ;;  %v761_v2 = vpack.c.bf16 (!%p139_p2), %v207_v1, %v206_v0  ;;  %vm762_vm2 = vmpackc.low (!%p139_p2), %vm312_vm0, %vm786_vm1  ;;  %p163_p3 = scmp.lt.s32.totalorder (!%p139_p2), %s635_s18, 63  ;;  %vm215_vm3 = vcmask (!%p139_p2), 97280   ;;  %v898_v35 = vld [vmem:[%s1008_s2] ss:$0 sm:$0xff] (!%p139_p2)  ;;  %vm541_vm4 = vcmask (!%p139_p2), 261120  }
   0x8   : > { %763 = vmatprep.subr.msk.bf16.mxu0 (!%p139_p2), %vm762_vm2, %v761_v2  ;;  %767 = vmatprep.subr.msk.bf16.mxu1 (!%p139_p2), %vm762_vm2, %v761_v2 }
   0x9   : > { %766 = vmatpush3.bf16.msk.msra.mxu0 (!%p139_p2), %vm762_vm2, %v761_v2  ;;  %768 = vmatpush3.bf16.msk.msra.mxu1 (!%p139_p2), %vm762_vm2, %v761_v2 }
   0xd   : > { %s1011_s18 = smov (!%p163_p3, %s635_s18), 63 }
   0xe   : > { %s636_s19 = sshll.u32 %s1011_s18, 3 }
   0xf   : > { %s829_s22 = scalar_lea.vmem %s1006_s0, %s636_s19  ;;  %s905_s27 = scalar_lea.vmem %s1009_s3, %s636_s19 }
  0x10   : > { %v174_v3 = vld [vmem:[%s829_s22] sm:$0xff]  ;;  %v175_v5 = vld [vmem:[%s829_s22 + $0x8] sm:$0xff]  ;;  %v176_v7 = vld [vmem:[%s829_s22 + $0x10] sm:$0xff] }
  0x11   : > { %v190_v4 = vld [vmem:[%s829_s22 + $0x80] sm:$0xff]  ;;  %713 = vmatprep.mubr.msk.f32.mxu0 %vm215_vm3, %v174_v3  ;;  %v191_v6 = vld [vmem:[%s829_s22 + $0x88] sm:$0xff]  ;;  %v192_v8 = vld [vmem:[%s829_s22 + $0x90] sm:$0xff] }
  0x12   : > { %737 = vmatprep.mubr.msk.f32.mxu1 %vm215_vm3, %v190_v4  ;;  %714 = vmatmul.mubr.msk.f32.vlgmr.msra.gmra.mrb[0].mxu0 %vm215_vm3, %v175_v5  ;;  %v177_v9 = vld [vmem:[%s829_s22 + $0x18] sm:$0xff]  ;;  %v178_v11 = vld [vmem:[%s829_s22 + $0x20] sm:$0xff]  ;;  %v179_v13 = vld [vmem:[%s829_s22 + $0x28] sm:$0xff] }
  0x13   : > { %738 = vmatmul.mubr.msk.f32.vlgmr.msra.gmra.mrb[0].mxu1 %vm215_vm3, %v191_v6  ;;  %716 = vmatprep.mubr.msk.f32.mxu0 %vm215_vm3, %v176_v7  ;;  %v193_v10 = vld [vmem:[%s829_s22 + $0x98] sm:$0xff]  ;;  %v194_v12 = vld [vmem:[%s829_s22 + $0xa0] sm:$0xff]  ;;  %v195_v14 = vld [vmem:[%s829_s22 + $0xa8] sm:$0xff] }
  0x14   : > { %740 = vmatprep.mubr.msk.f32.mxu1 %vm215_vm3, %v192_v8  ;;  %v180_v15 = vld [vmem:[%s829_s22 + $0x30] sm:$0xff]  ;;  %v181_v17 = vld [vmem:[%s829_s22 + $0x38] sm:$0xff]  ;;  %v182_v19 = vld [vmem:[%s829_s22 + $0x40] sm:$0xff] }
  0x15   : > { %v196_v16 = vld [vmem:[%s829_s22 + $0xb0] sm:$0xff]  ;;  %v197_v18 = vld [vmem:[%s829_s22 + $0xb8] sm:$0xff]  ;;  %v198_v20 = vld [vmem:[%s829_s22 + $0xc0] sm:$0xff] }
  0x16   : > { %717 = vmatmul.mubr.msk.f32.gmra.mrb[2].mxu0 %vm215_vm3, %v177_v9  ;;  %v183_v21 = vld [vmem:[%s829_s22 + $0x48] sm:$0xff]  ;;  %v184_v23 = vld [vmem:[%s829_s22 + $0x50] sm:$0xff]  ;;  %v185_v25 = vld [vmem:[%s829_s22 + $0x58] sm:$0xff] }
  0x17   : > { %741 = vmatmul.mubr.msk.f32.gmra.mrb[2].mxu1 %vm215_vm3, %v193_v10  ;;  %719 = vmatprep.mubr.msk.f32.mxu0 %vm215_vm3, %v178_v11  ;;  %v199_v22 = vld [vmem:[%s829_s22 + $0xc8] sm:$0xff]  ;;  %v200_v24 = vld [vmem:[%s829_s22 + $0xd0] sm:$0xff]  ;;  %v201_v26 = vld [vmem:[%s829_s22 + $0xd8] sm:$0xff] }
  0x18   : > { %743 = vmatprep.mubr.msk.f32.mxu1 %vm215_vm3, %v194_v12  ;;  %v186_v27 = vld [vmem:[%s829_s22 + $0x60] sm:$0xff]  ;;  %v187_v29 = vld [vmem:[%s829_s22 + $0x68] sm:$0xff]  ;;  %v188_v31 = vld [vmem:[%s829_s22 + $0x70] sm:$0xff] }
  0x19   : > { %v202_v28 = vld [vmem:[%s829_s22 + $0xe0] sm:$0xff]  ;;  %v203_v30 = vld [vmem:[%s829_s22 + $0xe8] sm:$0xff]  ;;  %v204_v32 = vld [vmem:[%s829_s22 + $0xf0] sm:$0xff] }
  0x1a   : > { %720 = vmatmul.mubr.msk.f32.gmra.mrb[4].mxu0 %vm215_vm3, %v179_v13  ;;  %v189_v33 = vld [vmem:[%s829_s22 + $0x78] sm:$0xff] }
  0x1b   : > { %744 = vmatmul.mubr.msk.f32.gmra.mrb[4].mxu1 %vm215_vm3, %v195_v14  ;;  %722 = vmatprep.mubr.msk.f32.mxu0 %vm215_vm3, %v180_v15  ;;  %v205_v34 = vld [vmem:[%s829_s22 + $0xf8] sm:$0xff] }
  0x1c   : > { %746 = vmatprep.mubr.msk.f32.mxu1 %vm215_vm3, %v196_v16 }
  0x1e   : > { %723 = vmatmul.mubr.msk.f32.gmra.mrb[6].mxu0 %vm215_vm3, %v181_v17 }
  0x1f   : > { %747 = vmatmul.mubr.msk.f32.gmra.mrb[6].mxu1 %vm215_vm3, %v197_v18  ;;  %725 = vmatprep.mubr.msk.f32.mxu0 %vm215_vm3, %v182_v19 }
  0x20   : > { %749 = vmatprep.mubr.msk.f32.mxu1 %vm215_vm3, %v198_v20 }
  0x22   : > { %726 = vmatmul.mubr.msk.f32.gmra.mrb[8].mxu0 %vm215_vm3, %v183_v21 }
  0x23   : > { %750 = vmatmul.mubr.msk.f32.gmra.mrb[8].mxu1 %vm215_vm3, %v199_v22  ;;  %728 = vmatprep.mubr.msk.f32.mxu0 %vm215_vm3, %v184_v23 }
  0x24   : > { %752 = vmatprep.mubr.msk.f32.mxu1 %vm215_vm3, %v200_v24 }
  0x26   : > { %729 = vmatmul.mubr.msk.f32.gmra.mrb[10].mxu0 %vm215_vm3, %v185_v25 }
  0x27   : > { %753 = vmatmul.mubr.msk.f32.gmra.mrb[10].mxu1 %vm215_vm3, %v201_v26  ;;  %731 = vmatprep.mubr.msk.f32.mxu0 %vm215_vm3, %v186_v27 }
  0x28   : > { %755 = vmatprep.mubr.msk.f32.mxu1 %vm215_vm3, %v202_v28 }
  0x2a   : > { %732 = vmatmul.mubr.msk.f32.gmra.mrb[12].mxu0 %vm215_vm3, %v187_v29 }
  0x2b   : > { %756 = vmatmul.mubr.msk.f32.gmra.mrb[12].mxu1 %vm215_vm3, %v203_v30  ;;  %734 = vmatprep.mubr.msk.f32.mxu0 %vm215_vm3, %v188_v31 }
  0x2c   : > { %758 = vmatprep.mubr.msk.f32.mxu1 %vm215_vm3, %v204_v32 }
  0x2e   : > { %735 = vmatmul.mubr.msk.f32.gmra.mrb[14].mxu0 %vm215_vm3, %v189_v33 }
  0x2f   : > { %759 = vmatmul.mubr.msk.f32.gmra.mrb[14].mxu1 %vm215_vm3, %v205_v34 }
  0xe5   : > { %v715_v36 = vpop.f32.mrb[0].mxu0 }
  0xe6   : > { %v739_v37 = vpop.f32.mrb[0].mxu1  ;;  %v388_v38 = vadd.f32 %v715_v36, %v898_v35  ;;  %v382_v40 = vpop.f32.mrb[1].mxu0 }
  0xe7   : > { %v468_v39 = vadd.f32 %v739_v37, %v898_v35  ;;  %v462_v41 = vpop.f32.mrb[1].mxu1  ;;  %v383_v42 = vadd.f32 %v898_v35, %v382_v40 }
  0xe8   : > { %v463_v43 = vadd.f32 %v898_v35, %v462_v41  ;;  %543 = vst.msk [vmem:[%s905_s27 + $0x8] sm:$0xff] %vm541_vm4, %v388_v38 }
  0xe9   : > { %559 = vst.msk [vmem:[%s905_s27 + $0x88] sm:$0xff] %vm541_vm4, %v468_v39  ;;  %542 = vst.msk [vmem:[%s905_s27] sm:$0xff] %vm541_vm4, %v383_v42  ;;  %v718_v44 = vpop.f32.mrb[2].mxu0 }
  0xea   : > { %558 = vst.msk [vmem:[%s905_s27 + $0x80] sm:$0xff] %vm541_vm4, %v463_v43  ;;  %v742_v45 = vpop.f32.mrb[2].mxu1  ;;  %v398_v46 = vadd.f32 %v718_v44, %v898_v35  ;;  %v392_v48 = vpop.f32.mrb[3].mxu0 }
  0xeb   : > { %v478_v47 = vadd.f32 %v742_v45, %v898_v35  ;;  %v472_v49 = vpop.f32.mrb[3].mxu1  ;;  %v393_v50 = vadd.f32 %v898_v35, %v392_v48 }
  0xec   : > { %v473_v51 = vadd.f32 %v898_v35, %v472_v49  ;;  %545 = vst.msk [vmem:[%s905_s27 + $0x18] sm:$0xff] %vm541_vm4, %v398_v46 }
  0xed   : > { %561 = vst.msk [vmem:[%s905_s27 + $0x98] sm:$0xff] %vm541_vm4, %v478_v47  ;;  %544 = vst.msk [vmem:[%s905_s27 + $0x10] sm:$0xff] %vm541_vm4, %v393_v50  ;;  %v721_v52 = vpop.f32.mrb[4].mxu0 }
  0xee   : > { %560 = vst.msk [vmem:[%s905_s27 + $0x90] sm:$0xff] %vm541_vm4, %v473_v51  ;;  %v745_v53 = vpop.f32.mrb[4].mxu1  ;;  %v408_v54 = vadd.f32 %v721_v52, %v898_v35  ;;  %v402_v56 = vpop.f32.mrb[5].mxu0 }
  0xef   : > { %v488_v55 = vadd.f32 %v745_v53, %v898_v35  ;;  %v482_v57 = vpop.f32.mrb[5].mxu1  ;;  %v403_v58 = vadd.f32 %v898_v35, %v402_v56 }
  0xf0   : > { %v483_v59 = vadd.f32 %v898_v35, %v482_v57  ;;  %547 = vst.msk [vmem:[%s905_s27 + $0x28] sm:$0xff] %vm541_vm4, %v408_v54 }
  0xf1   : > { %563 = vst.msk [vmem:[%s905_s27 + $0xa8] sm:$0xff] %vm541_vm4, %v488_v55  ;;  %546 = vst.msk [vmem:[%s905_s27 + $0x20] sm:$0xff] %vm541_vm4, %v403_v58  ;;  %v724_v60 = vpop.f32.mrb[6].mxu0 }
  0xf2   : > { %562 = vst.msk [vmem:[%s905_s27 + $0xa0] sm:$0xff] %vm541_vm4, %v483_v59  ;;  %v748_v61 = vpop.f32.mrb[6].mxu1  ;;  %v418_v62 = vadd.f32 %v724_v60, %v898_v35  ;;  %v412_v0 = vpop.f32.mrb[7].mxu0 }
  0xf3   : > { %v498_v63 = vadd.f32 %v748_v61, %v898_v35  ;;  %v492_v1 = vpop.f32.mrb[7].mxu1  ;;  %v413_v2 = vadd.f32 %v898_v35, %v412_v0 }
  0xf4   : > { %v493_v3 = vadd.f32 %v898_v35, %v492_v1  ;;  %549 = vst.msk [vmem:[%s905_s27 + $0x38] sm:$0xff] %vm541_vm4, %v418_v62 }
  0xf5   : > { %565 = vst.msk [vmem:[%s905_s27 + $0xb8] sm:$0xff] %vm541_vm4, %v498_v63  ;;  %548 = vst.msk [vmem:[%s905_s27 + $0x30] sm:$0xff] %vm541_vm4, %v413_v2  ;;  %v727_v4 = vpop.f32.mrb[8].mxu0 }
  0xf6   : > { %564 = vst.msk [vmem:[%s905_s27 + $0xb0] sm:$0xff] %vm541_vm4, %v493_v3  ;;  %v751_v5 = vpop.f32.mrb[8].mxu1  ;;  %v428_v6 = vadd.f32 %v727_v4, %v898_v35  ;;  %v422_v8 = vpop.f32.mrb[9].mxu0 }
  0xf7   : > { %v508_v7 = vadd.f32 %v751_v5, %v898_v35  ;;  %v502_v9 = vpop.f32.mrb[9].mxu1  ;;  %v423_v10 = vadd.f32 %v898_v35, %v422_v8 }
  0xf8   : > { %v503_v11 = vadd.f32 %v898_v35, %v502_v9  ;;  %551 = vst.msk [vmem:[%s905_s27 + $0x48] sm:$0xff] %vm541_vm4, %v428_v6 }
  0xf9   : > { %567 = vst.msk [vmem:[%s905_s27 + $0xc8] sm:$0xff] %vm541_vm4, %v508_v7  ;;  %550 = vst.msk [vmem:[%s905_s27 + $0x40] sm:$0xff] %vm541_vm4, %v423_v10  ;;  %v730_v12 = vpop.f32.mrb[10].mxu0 }
  0xfa   : > { %566 = vst.msk [vmem:[%s905_s27 + $0xc0] sm:$0xff] %vm541_vm4, %v503_v11  ;;  %v754_v13 = vpop.f32.mrb[10].mxu1  ;;  %v438_v14 = vadd.f32 %v730_v12, %v898_v35  ;;  %v432_v16 = vpop.f32.mrb[11].mxu0 }
  0xfb   : > { %v518_v15 = vadd.f32 %v754_v13, %v898_v35  ;;  %v512_v17 = vpop.f32.mrb[11].mxu1  ;;  %v433_v18 = vadd.f32 %v898_v35, %v432_v16 }
  0xfc   : > { %v513_v19 = vadd.f32 %v898_v35, %v512_v17  ;;  %553 = vst.msk [vmem:[%s905_s27 + $0x58] sm:$0xff] %vm541_vm4, %v438_v14 }
  0xfd   : > { %569 = vst.msk [vmem:[%s905_s27 + $0xd8] sm:$0xff] %vm541_vm4, %v518_v15  ;;  %552 = vst.msk [vmem:[%s905_s27 + $0x50] sm:$0xff] %vm541_vm4, %v433_v18  ;;  %v733_v20 = vpop.f32.mrb[12].mxu0 }
  0xfe   : > { %568 = vst.msk [vmem:[%s905_s27 + $0xd0] sm:$0xff] %vm541_vm4, %v513_v19  ;;  %v757_v21 = vpop.f32.mrb[12].mxu1  ;;  %v448_v22 = vadd.f32 %v733_v20, %v898_v35  ;;  %v442_v24 = vpop.f32.mrb[13].mxu0 }
  0xff   : > { %v528_v23 = vadd.f32 %v757_v21, %v898_v35  ;;  %v522_v25 = vpop.f32.mrb[13].mxu1  ;;  %v443_v26 = vadd.f32 %v898_v35, %v442_v24 }
 0x100   : > { %v523_v27 = vadd.f32 %v898_v35, %v522_v25  ;;  %555 = vst.msk [vmem:[%s905_s27 + $0x68] sm:$0xff] %vm541_vm4, %v448_v22 }
 0x101   : > { %571 = vst.msk [vmem:[%s905_s27 + $0xe8] sm:$0xff] %vm541_vm4, %v528_v23  ;;  %554 = vst.msk [vmem:[%s905_s27 + $0x60] sm:$0xff] %vm541_vm4, %v443_v26  ;;  %v736_v28 = vpop.f32.mrb[14].mxu0 }
 0x102   : > { %570 = vst.msk [vmem:[%s905_s27 + $0xe0] sm:$0xff] %vm541_vm4, %v523_v27  ;;  %v760_v29 = vpop.f32.mrb[14].mxu1  ;;  %v458_v30 = vadd.f32 %v736_v28, %v898_v35  ;;  %v452_v32 = vpop.f32.mrb[15].mxu0 }
 0x103   : > { %v538_v31 = vadd.f32 %v760_v29, %v898_v35  ;;  %v532_v33 = vpop.f32.mrb[15].mxu1  ;;  %v453_v34 = vadd.f32 %v898_v35, %v452_v32 }
 0x104   : > { %v533_v36 = vadd.f32 %v898_v35, %v532_v33  ;;  %557 = vst.msk [vmem:[%s905_s27 + $0x78] sm:$0xff] %vm541_vm4, %v458_v30 }
 0x105   : > { %573 = vst.msk [vmem:[%s905_s27 + $0xf8] sm:$0xff] %vm541_vm4, %v538_v31  ;;  %556 = vst.msk [vmem:[%s905_s27 + $0x70] sm:$0xff] %vm541_vm4, %v453_v34 }
 0x106   : > { %572 = vst.msk [vmem:[%s905_s27 + $0xf0] sm:$0xff] %vm541_vm4, %v533_v36 }
 0x107 PF: > { %s13_s12 = sadd.s32 1, %s784_s12  }
 0x108   : > { %p10_p4 = scmp.ge.s32.totalorder %s13_s12, 4  }
 0x10a   :  { %12 = sbr.rel (!%p10_p4) target bundleno = 1 (0x1), region = 62 }

// kernel: _lambda_.18
= control target key start
LH: loop header
LB: loop body
LE: loop exit
PB: predicated region body
PF: predicated region fallthrough
CT: control target
= control target key end

     0   :  { %v226_v0 = vmov 0.0|0.0   ;;  %vm53_vm0 = vcmask 523264   ;;  %vm151_vm1 = vcmask 261120   ;;  %s386_s1 = inlined_call_operand.vmem [shape: f32[192,32], index: 1, kind: input, shape index: {}]   ;;  %s387_s0 = inlined_call_operand.vmem [shape: f32[32,192], index: 0, kind: input, shape index: {}]   ;;  %s388_s2 = inlined_call_operand.vmem [shape: f32[1,32], index: 2, kind: input, shape index: {}]   ;;  %s389_s3 = inlined_call_operand.vmem [shape: f32[32,32], index: 3, kind: output, shape index: {}]  }
   0x1   :  { %165 = vmatprep.subr.bf16.mxu0 %v226_v0  ;;  %201 = vmatprep.subr.bf16.mxu1 %v226_v0  ;;  %v22_v1 = vld [vmem:[%s386_s1] sm:$0xff]  ;;  %v23_v2 = vld [vmem:[%s386_s1 + $0x8] sm:$0xff]  ;;  %v24_v3 = vld [vmem:[%s386_s1 + $0x10] sm:$0xff] }
   0x2   :  { %v166_v4 = vpack.c.bf16 %v23_v2, %v22_v1  ;;  %v25_v5 = vld [vmem:[%s386_s1 + $0x18] sm:$0xff]  ;;  %v26_v7 = vld [vmem:[%s386_s1 + $0x20] sm:$0xff]  ;;  %v27_v8 = vld [vmem:[%s386_s1 + $0x28] sm:$0xff] }
   0x3   :  { %v169_v6 = vpack.c.bf16 %v25_v5, %v24_v3  ;;  %v172_v9 = vpack.c.bf16 %v27_v8, %v26_v7  ;;  %v28_v10 = vld [vmem:[%s386_s1 + $0x30] sm:$0xff]  ;;  %v29_v11 = vld [vmem:[%s386_s1 + $0x38] sm:$0xff]  ;;  %v15_v12 = vld [vmem:[%s387_s0 + $0x8] sm:$0xff] }
   0x4   :  { %167 = vmatpush1.bf16.msra.mxu0 %v166_v4  ;;  %213 = vmatpush1.bf16.msra.mxu1 %v166_v4  ;;  %v19_v13 = vld [vmem:[%s387_s0 + $0x28] sm:$0xff]  ;;  %v175_v14 = vpack.c.bf16 %v29_v11, %v28_v10  ;;  %v30_v15 = vld [vmem:[%s386_s1 + $0x40] sm:$0xff]  ;;  %v32_v18 = vld [vmem:[%s386_s1 + $0x50] sm:$0xff] }
   0x5   :  { %168 = vmatprep.subr.bf16.mxu0 %v226_v0  ;;  %202 = vmatprep.subr.bf16.mxu1 %v226_v0  ;;  %v31_v16 = vld [vmem:[%s386_s1 + $0x48] sm:$0xff]  ;;  %v33_v19 = vld [vmem:[%s386_s1 + $0x58] sm:$0xff]  ;;  %v34_v21 = vld [vmem:[%s386_s1 + $0x60] sm:$0xff] }
   0x6   :  { %161 = vmatprep.mubr.msk.f32.mxu0 %vm53_vm0, %v15_v12  ;;  %163 = vmatprep.mubr.msk.f32.mxu1 %vm53_vm0, %v19_v13  ;;  %v178_v17 = vpack.c.bf16 %v31_v16, %v30_v15  ;;  %v181_v20 = vpack.c.bf16 %v33_v19, %v32_v18  ;;  %v35_v22 = vld [vmem:[%s386_s1 + $0x68] sm:$0xff]  ;;  %v36_v24 = vld [vmem:[%s386_s1 + $0x70] sm:$0xff]  ;;  %v37_v25 = vld [vmem:[%s386_s1 + $0x78] sm:$0xff] }
   0x7   :  { %v184_v23 = vpack.c.bf16 %v35_v22, %v34_v21  ;;  %v187_v26 = vpack.c.bf16 %v37_v25, %v36_v24  ;;  %v38_v27 = vld [vmem:[%s386_s1 + $0x80] sm:$0xff]  ;;  %v39_v28 = vld [vmem:[%s386_s1 + $0x88] sm:$0xff]  ;;  %v40_v30 = vld [vmem:[%s386_s1 + $0x90] sm:$0xff] }
   0x8   :  { %170 = vmatpush1.bf16.msra.mxu0 %v169_v6  ;;  %214 = vmatpush1.bf16.msra.mxu1 %v169_v6  ;;  %v190_v29 = vpack.c.bf16 %v39_v28, %v38_v27  ;;  %v41_v31 = vld [vmem:[%s386_s1 + $0x98] sm:$0xff]  ;;  %v42_v33 = vld [vmem:[%s386_s1 + $0xa0] sm:$0xff]  ;;  %v43_v34 = vld [vmem:[%s386_s1 + $0xa8] sm:$0xff] }
   0x9   :  { %171 = vmatprep.subr.bf16.mxu0 %v226_v0  ;;  %203 = vmatprep.subr.bf16.mxu1 %v226_v0  ;;  %v193_v32 = vpack.c.bf16 %v41_v31, %v40_v30  ;;  %v196_v35 = vpack.c.bf16 %v43_v34, %v42_v33  ;;  %v44_v36 = vld [vmem:[%s386_s1 + $0xb0] sm:$0xff]  ;;  %v45_v37 = vld [vmem:[%s386_s1 + $0xb8] sm:$0xff]  ;;  %v14_v39 = vld [vmem:[%s387_s0] sm:$0xff] }
   0xa   :  { %v199_v38 = vpack.c.bf16 %v45_v37, %v44_v36  ;;  %v18_v40 = vld [vmem:[%s387_s0 + $0x20] sm:$0xff]  ;;  %v17_v41 = vld [vmem:[%s387_s0 + $0x18] sm:$0xff]  ;;  %v16_v43 = vld [vmem:[%s387_s0 + $0x10] sm:$0xff] }
   0xb   :  { %v21_v42 = vld [vmem:[%s387_s0 + $0x38] sm:$0xff]  ;;  %v20_v44 = vld [vmem:[%s387_s0 + $0x30] sm:$0xff]  ;;  %v160_v45 = vld [vmem:[%s388_s2] ss:$0 sm:$0xff] }
   0xc   :  { %173 = vmatpush1.bf16.msra.mxu0 %v172_v9  ;;  %215 = vmatpush1.bf16.msra.mxu1 %v172_v9 }
   0xd   :  { %174 = vmatprep.subr.bf16.mxu0 %v226_v0  ;;  %204 = vmatprep.subr.bf16.mxu1 %v226_v0 }
  0x10   :  { %176 = vmatpush1.bf16.msra.mxu0 %v175_v14  ;;  %216 = vmatpush1.bf16.msra.mxu1 %v175_v14 }
  0x11   :  { %177 = vmatprep.subr.bf16.mxu0 %v226_v0  ;;  %205 = vmatprep.subr.bf16.mxu1 %v226_v0 }
  0x14   :  { %179 = vmatpush1.bf16.msra.mxu0 %v178_v17  ;;  %217 = vmatpush1.bf16.msra.mxu1 %v178_v17 }
  0x15   :  { %180 = vmatprep.subr.bf16.mxu0 %v226_v0  ;;  %206 = vmatprep.subr.bf16.mxu1 %v226_v0 }
  0x18   :  { %182 = vmatpush1.bf16.msra.mxu0 %v181_v20  ;;  %218 = vmatpush1.bf16.msra.mxu1 %v181_v20 }
  0x19   :  { %183 = vmatprep.subr.bf16.mxu0 %v226_v0  ;;  %207 = vmatprep.subr.bf16.mxu1 %v226_v0 }
  0x1c   :  { %185 = vmatpush1.bf16.msra.mxu0 %v184_v23  ;;  %219 = vmatpush1.bf16.msra.mxu1 %v184_v23 }
  0x1d   :  { %186 = vmatprep.subr.bf16.mxu0 %v226_v0  ;;  %208 = vmatprep.subr.bf16.mxu1 %v226_v0 }
  0x20   :  { %188 = vmatpush1.bf16.msra.mxu0 %v187_v26  ;;  %220 = vmatpush1.bf16.msra.mxu1 %v187_v26 }
  0x21   :  { %189 = vmatprep.subr.bf16.mxu0 %v226_v0  ;;  %209 = vmatprep.subr.bf16.mxu1 %v226_v0 }
  0x24   :  { %191 = vmatpush1.bf16.msra.mxu0 %v190_v29  ;;  %221 = vmatpush1.bf16.msra.mxu1 %v190_v29 }
  0x25   :  { %192 = vmatprep.subr.bf16.mxu0 %v226_v0  ;;  %210 = vmatprep.subr.bf16.mxu1 %v226_v0 }
  0x28   :  { %194 = vmatpush1.bf16.msra.mxu0 %v193_v32  ;;  %222 = vmatpush1.bf16.msra.mxu1 %v193_v32 }
  0x29   :  { %195 = vmatprep.subr.bf16.mxu0 %v226_v0  ;;  %211 = vmatprep.subr.bf16.mxu1 %v226_v0 }
  0x2c   :  { %197 = vmatpush1.bf16.msra.mxu0 %v196_v35  ;;  %223 = vmatpush1.bf16.msra.mxu1 %v196_v35 }
  0x2d   :  { %198 = vmatprep.subr.bf16.mxu0 %v226_v0  ;;  %212 = vmatprep.subr.bf16.mxu1 %v226_v0 }
  0x30   :  { %200 = vmatpush1.bf16.msra.mxu0 %v199_v38  ;;  %224 = vmatpush1.bf16.msra.mxu1 %v199_v38 }
  0x33   :  { %131 = vmatmul.mubr.f32.vlgmr.msra.gmra.mrb[0].mxu0 %v14_v39  ;;  %141 = vmatmul.mubr.f32.vlgmr.msra.gmra.mrb[0].mxu1 %v18_v40 }
  0x34   :  { %162 = vmatprep.mubr.msk.f32.mxu0 %vm53_vm0, %v17_v41  ;;  %164 = vmatprep.mubr.msk.f32.mxu1 %vm53_vm0, %v21_v42 }
  0x37   :  { %136 = vmatmul.mubr.f32.gmra.mrb[2].mxu0 %v16_v43  ;;  %146 = vmatmul.mubr.f32.gmra.mrb[2].mxu1 %v20_v44 }
 0x106   :  { %v132_v46 = vpop.f32.mrb[0].mxu0  ;;  %v142_v47 = vpop.f32.mrb[0].mxu1 }
 0x107   :  { %v133_v48 = vadd.f32 %v160_v45, %v132_v46  ;;  %v143_v49 = vadd.f32 %v160_v45, %v142_v47  ;;  %v134_v50 = vpop.f32.mrb[1].mxu0  ;;  %v144_v51 = vpop.f32.mrb[1].mxu1 }
 0x109   :  { %152 = vst.msk [vmem:[%s389_s3] sm:$0xff] %vm151_vm1, %v133_v48  ;;  %154 = vst.msk [vmem:[%s389_s3 + $0x10] sm:$0xff] %vm151_vm1, %v143_v49 }
 0x10a   :  { %v137_v52 = vpop.f32.mrb[2].mxu0  ;;  %v147_v53 = vpop.f32.mrb[2].mxu1 }
 0x10b   :  { %v138_v54 = vadd.f32 %v160_v45, %v137_v52  ;;  %v148_v55 = vadd.f32 %v160_v45, %v147_v53  ;;  %v139_v56 = vpop.f32.mrb[3].mxu0  ;;  %v149_v57 = vpop.f32.mrb[3].mxu1 }
 0x10d   :  { %153 = vst.msk [vmem:[%s389_s3 + $0x8] sm:$0xff] %vm151_vm1, %v138_v54  ;;  %155 = vst.msk [vmem:[%s389_s3 + $0x18] sm:$0xff] %vm151_vm1, %v148_v55 }

// kernel: _lambda_.19
= control target key start
LH: loop header
LB: loop body
LE: loop exit
PB: predicated region body
PF: predicated region fallthrough
CT: control target
= control target key end

     0   :  { %vm49_vm0 = vcmask 261120   ;;  %s821_s0 = inlined_call_operand.vmem [shape: f32[32,32], index: 0, kind: input, shape index: {}]   ;;  %s822_s1 = inlined_call_operand.vmem [shape: f32[32,32], index: 1, kind: input, shape index: {}]   ;;  %s823_s11 = inlined_call_operand.vmem [shape: f32[32,32], index: 11, kind: output, shape index: {1}]   ;;  %s824_s4 = inlined_call_operand.vmem [shape: f32[1,32,32], index: 4, kind: input, shape index: {}]   ;;  %s825_s6 = inlined_call_operand.vmem [shape: f32[1,32,32], index: 6, kind: input, shape index: {}]   ;;  %s826_s2 = inlined_call_operand.vmem [shape: f32[1,1,32], index: 2, kind: input, shape index: {}]   ;;  %s827_s3 = inlined_call_operand.vmem [shape: f32[1,1,32], index: 3, kind: input, shape index: {}]   ;;  %s828_s8 = inlined_call_operand.vmem [shape: f32[1,32,32], index: 8, kind: input, shape index: {}]   ;;  %s829_s7 = inlined_call_operand.vmem [shape: f32[1,1,32], index: 7, kind: input, shape index: {}]   ;;  %s830_s5 = inlined_call_operand.vmem [shape: f32[1,1,32], index: 5, kind: input, shape index: {}]   ;;  %s831_s9 = inlined_call_operand.vmem [shape: f32[1,1,32], index: 9, kind: input, shape index: {}]   ;;  %s832_s10 = inlined_call_operand.vmem [shape: f32[32,32], index: 10, kind: output, shape index: {0}]  }
   0x1   :  { %v37_v0 = vld [vmem:[%s821_s0] sm:$0xff]  ;;  %v39_v2 = vld [vmem:[%s821_s0 + $0x10] sm:$0xff]  ;;  %v38_v5 = vld [vmem:[%s821_s0 + $0x8] sm:$0xff] }
   0x2   :  { %v41_v1 = vld [vmem:[%s822_s1] sm:$0xff]  ;;  %v43_v4 = vld [vmem:[%s822_s1 + $0x10] sm:$0xff]  ;;  %v42_v6 = vld [vmem:[%s822_s1 + $0x8] sm:$0xff] }
   0x3   :  { %v45_v3 = vadd.f32 %v41_v1, %v37_v0  ;;  %v47_v7 = vadd.f32 %v43_v4, %v39_v2  ;;  %v46_v8 = vadd.f32 %v42_v6, %v38_v5  ;;  %v40_v9 = vld [vmem:[%s821_s0 + $0x18] sm:$0xff]  ;;  %v125_v36 = vld [vmem:[%s824_s4] sm:$0xff]  ;;  %v126_v37 = vld [vmem:[%s824_s4 + $0x8] sm:$0xff] }
   0x4   :  { %v44_v10 = vld [vmem:[%s822_s1 + $0x18] sm:$0xff]  ;;  %v233_v38 = vld [vmem:[%s825_s6] sm:$0xff]  ;;  %v572_v39 = vpack.c.bf16 %v126_v37, %v125_v36  ;;  %v234_v40 = vld [vmem:[%s825_s6 + $0x8] sm:$0xff] }
   0x5   :  { %v50_v11 = vsel %vm49_vm0, %v45_v3, 0.0  ;;  %473 = vst.msk [vmem:[%s823_s11] sm:$0xff] %vm49_vm0, %v45_v3  ;;  %v48_v12 = vadd.f32 %v44_v10, %v40_v9  ;;  %v56_v13 = vsel %vm49_vm0, %v47_v7, 0.0  ;;  %475 = vst.msk [vmem:[%s823_s11 + $0x10] sm:$0xff] %vm49_vm0, %v47_v7  ;;  %v53_v14 = vsel %vm49_vm0, %v46_v8, 0.0  ;;  %v127_v41 = vld [vmem:[%s824_s4 + $0x10] sm:$0xff] }
   0x6   :  { %51 = vadd.xlane.f32.xlu0 %v50_v11  ;;  %474 = vst.msk [vmem:[%s823_s11 + $0x8] sm:$0xff] %vm49_vm0, %v46_v8  ;;  %57 = vadd.xlane.f32.xlu1 %v56_v13  ;;  %v128_v42 = vld [vmem:[%s824_s4 + $0x18] sm:$0xff]  ;;  %v580_v43 = vpack.c.bf16 %v234_v40, %v233_v38  ;;  %v235_v45 = vld [vmem:[%s825_s6 + $0x10] sm:$0xff]  ;;  %v485_v61 = vld [vmem:[%s826_s2] ss:$0 sm:$0xff] }
   0x7   :  { %476 = vst.msk [vmem:[%s823_s11 + $0x18] sm:$0xff] %vm49_vm0, %v48_v12  ;;  %v59_v15 = vsel %vm49_vm0, %v48_v12, 0.0  ;;  %v576_v44 = vpack.c.bf16 %v128_v42, %v127_v41  ;;  %573 = vmatprep.subr.bf16.mxu0 %v572_v39  ;;  %v236_v46 = vld [vmem:[%s825_s6 + $0x18] sm:$0xff]  ;;  %v486_v63 = vld [vmem:[%s827_s3] ss:$0 sm:$0xff] }
   0x8   :  { %581 = vmatprep.subr.bf16.mxu1 %v580_v43  ;;  %575 = vmatpush3.bf16.msra.mxu0 %v572_v39  ;;  %v584_v47 = vpack.c.bf16 %v236_v46, %v235_v45  ;;  %v487_v45 = vld [vmem:[%s830_s5] ss:$0 sm:$0xff] }
   0x9   :  { %583 = vmatpush3.bf16.msra.mxu1 %v580_v43  ;;  %577 = vmatprep.subr.bf16.mxu0 %v576_v44 }
   0xa   :  { %54 = vadd.xlane.f32.xlu0 %v53_v14  ;;  %60 = vadd.xlane.f32.xlu1 %v59_v15  ;;  %v361_v14 = vld [vmem:[%s828_s8] sm:$0xff]  ;;  %v362_v15 = vld [vmem:[%s828_s8 + $0x8] sm:$0xff] }
   0xb   :  { %585 = vmatprep.subr.bf16.mxu1 %v584_v47 }
   0xc   :  { %579 = vmatpush3.bf16.msra.mxu0 %v576_v44 }
   0xd   :  { %587 = vmatpush3.bf16.msra.mxu1 %v584_v47 }
  0x93   :  { %v52_v16 = vpop.xlane.xlu0 %51  ;;  %v58_v18 = vpop.xlane.xlu1 %57 }
  0x94   :  { %v63_v17 = vmul.f32 0.03125, %v52_v16  ;;  %v65_v19 = vmul.f32 0.03125, %v58_v18  ;;  %v588_v16 = vpack.c.bf16 %v362_v15, %v361_v14  ;;  %v364_v18 = vld [vmem:[%s828_s8 + $0x18] sm:$0xff] }
  0x96   :  { %v67_v20 = vsub.f32 %v45_v3, %v63_v17  ;;  %v728_v21 = vsub.f32 %v47_v7, %v65_v19  ;;  %589 = vmatprep.subr.bf16.mxu0 %v588_v16  ;;  %596 = vmatprep.subr.bf16.mxu1 %v588_v16  ;;  %v363_v17 = vld [vmem:[%s828_s8 + $0x10] sm:$0xff] }
  0x97   :  { %v55_v22 = vpop.xlane.xlu0 %54  ;;  %v61_v24 = vpop.xlane.xlu1 %60  ;;  %v592_v19 = vpack.c.bf16 %v364_v18, %v363_v17 }
  0x98   :  { %v64_v23 = vmul.f32 0.03125, %v55_v22  ;;  %v71_v25 = vmul.f32 %v67_v20, %v67_v20  ;;  %v66_v26 = vmul.f32 0.03125, %v61_v24  ;;  %v73_v27 = vmul.f32 %v728_v21, %v728_v21 }
  0x9a   :  { %v68_v28 = vsub.f32 %v46_v8, %v64_v23  ;;  %v75_v29 = vsel %vm49_vm0, %v71_v25, 0.0  ;;  %v733_v30 = vsub.f32 %v48_v12, %v66_v26  ;;  %v81_v31 = vsel %vm49_vm0, %v73_v27, 0.0 }
  0x9b   :  { %76 = vadd.xlane.f32.xlu0 %v75_v29 }
  0x9c   :  { %v72_v32 = vmul.f32 %v68_v28, %v68_v28  ;;  %v74_v33 = vmul.f32 %v733_v30, %v733_v30 }
  0x9e   :  { %v78_v34 = vsel %vm49_vm0, %v72_v32, 0.0  ;;  %v84_v35 = vsel %vm49_vm0, %v74_v33, 0.0 }
  0x9f   :  { %82 = vadd.xlane.f32.xlu0 %v81_v31  ;;  %79 = vadd.xlane.f32.xlu1 %v78_v34 }
  0xa3   :  { %85 = vadd.xlane.f32.xlu1 %v84_v35 }
 0x128   :  { %v77_v48 = vpop.xlane.xlu0 %76 }
 0x129   :  { %v87_v49 = vmul.f32 0.03125, %v77_v48 }
 0x12b   :  { %v91_v50 = vadd.f32 1e-05, %v87_v49 }
 0x12c   :  { %v80_v51 = vpop.xlane.xlu1 %79  ;;  %v83_v52 = vpop.xlane.xlu0 %82 }
 0x12d   :  { %600 = vrsqrt.f32 %v91_v50  ;;  %v88_v53 = vmul.f32 0.03125, %v80_v51  ;;  %v89_v54 = vmul.f32 0.03125, %v83_v52 }
 0x12f   :  { %v92_v55 = vadd.f32 1e-05, %v88_v53  ;;  %v93_v56 = vadd.f32 1e-05, %v89_v54 }
 0x130   :  { %v86_v57 = vpop.xlane.xlu1 %85 }
 0x131   :  { %602 = vrsqrt.f32 %v92_v55  ;;  %v90_v58 = vmul.f32 0.03125, %v86_v57 }
 0x132   :  { %604 = vrsqrt.f32 %v93_v56 }
 0x133   :  { %v94_v59 = vadd.f32 1e-05, %v90_v58 }
 0x135   :  { %606 = vrsqrt.f32 %v94_v59 }
 0x137   :  { %v601_v60 = vpop.eup %600 }
 0x138   :  { %v99_v62 = vmul.f32 %v601_v60, %v67_v20  ;;  %v492_v20 = vld [vmem:[%s829_s7] ss:$0 sm:$0xff] }
 0x13a   :  { %v110_v0 = vmul.f32 %v485_v61, %v99_v62  ;;  %v501_v62 = vld [vmem:[%s831_s9] ss:$0 sm:$0xff] }
 0x13b   :  { %v603_v1 = vpop.eup %602 }
 0x13c   :  { %v605_v2 = vpop.eup %604  ;;  %v121_v3 = vadd.f32 %v486_v63, %v110_v0  ;;  %v100_v4 = vmul.f32 %v603_v1, %v68_v28 }
 0x13d   :  { %v101_v5 = vmul.f32 %v605_v2, %v728_v21 }
 0x13e   :  { %538 = vmatprep.mubr.msk.f32.mxu0 %vm49_vm0, %v121_v3  ;;  %552 = vmatprep.mubr.msk.f32.mxu1 %vm49_vm0, %v121_v3  ;;  %v111_v6 = vmul.f32 %v485_v61, %v100_v4 }
 0x13f   :  { %v607_v7 = vpop.eup %606  ;;  %v112_v8 = vmul.f32 %v485_v61, %v101_v5 }
 0x140   :  { %v122_v9 = vadd.f32 %v486_v63, %v111_v6  ;;  %v102_v10 = vmul.f32 %v607_v7, %v733_v30 }
 0x141   :  { %v123_v11 = vadd.f32 %v486_v63, %v112_v8 }
 0x142   :  { %539 = vmatmul.mubr.msk.f32.vlgmr.msra.gmra.mrb[0].mxu0 %vm49_vm0, %v122_v9  ;;  %553 = vmatmul.mubr.msk.f32.vlgmr.msra.gmra.mrb[0].mxu1 %vm49_vm0, %v122_v9  ;;  %v113_v12 = vmul.f32 %v485_v61, %v102_v10 }
 0x143   :  { %541 = vmatprep.mubr.msk.f32.mxu0 %vm49_vm0, %v123_v11  ;;  %555 = vmatprep.mubr.msk.f32.mxu1 %vm49_vm0, %v123_v11 }
 0x144   :  { %v124_v13 = vadd.f32 %v486_v63, %v113_v12  ;;  %591 = vmatpush3.bf16.msra.mxu0 %v588_v16  ;;  %598 = vmatpush3.bf16.msra.mxu1 %v588_v16 }
 0x145   :  { %593 = vmatprep.subr.bf16.mxu0 %v592_v19  ;;  %597 = vmatprep.subr.bf16.mxu1 %v592_v19 }
 0x146   :  { %542 = vmatmul.mubr.msk.f32.gmra.mrb[2].mxu0 %vm49_vm0, %v124_v13  ;;  %556 = vmatmul.mubr.msk.f32.gmra.mrb[2].mxu1 %vm49_vm0, %v124_v13 }
 0x148   :  { %595 = vmatpush3.bf16.msra.mxu0 %v592_v19  ;;  %599 = vmatpush3.bf16.msra.mxu1 %v592_v19 }
 0x215   :  { %v540_v21 = vpop.f32.mrb[0].mxu0  ;;  %v554_v22 = vpop.f32.mrb[0].mxu1 }
 0x216   :  { %v316_v23 = vadd.f32 %v554_v22, %v492_v20  ;;  %v214_v24 = vpop.f32.mrb[1].mxu0  ;;  %v310_v25 = vpop.f32.mrb[1].mxu1  ;;  %v220_v48 = vadd.f32 %v540_v21, %v487_v45 }
 0x217   :  { %v311_v26 = vadd.f32 %v492_v20, %v310_v25  ;;  %v215_v50 = vadd.f32 %v487_v45, %v214_v24 }
 0x218   :  { %v498_v27 = vmul.f32 -1.442695, %v316_v23 }
 0x219   :  { %v497_v28 = vmul.f32 -1.442695, %v311_v26  ;;  %v543_v29 = vpop.f32.mrb[2].mxu0  ;;  %v557_v30 = vpop.f32.mrb[2].mxu1 }
 0x21a   :  { %608 = vpow2.f32 %v498_v27  ;;  %v326_v31 = vadd.f32 %v557_v30, %v492_v20  ;;  %v224_v32 = vpop.f32.mrb[3].mxu0  ;;  %v320_v33 = vpop.f32.mrb[3].mxu1  ;;  %v230_v56 = vadd.f32 %v543_v29, %v487_v45 }
 0x21b   :  { %610 = vpow2.f32 %v497_v28  ;;  %v321_v34 = vadd.f32 %v492_v20, %v320_v33  ;;  %v225_v58 = vadd.f32 %v487_v45, %v224_v32 }
 0x21c   :  { %v500_v35 = vmul.f32 -1.442695, %v326_v31 }
 0x21d   :  { %v499_v36 = vmul.f32 -1.442695, %v321_v34 }
 0x21e   :  { %612 = vpow2.f32 %v500_v35 }
 0x21f   :  { %614 = vpow2.f32 %v499_v36 }
 0x224   :  { %v609_v37 = vpop.eup %608 }
 0x225   :  { %v611_v38 = vpop.eup %610  ;;  %v342_v39 = vadd.f32 1.0, %v609_v37 }
 0x226   :  { %v341_v40 = vadd.f32 1.0, %v611_v38 }
 0x227   :  { %616 = vrcp.f32 %v342_v39 }
 0x228   :  { %v613_v41 = vpop.eup %612  ;;  %618 = vrcp.f32 %v341_v40 }
 0x229   :  { %v615_v42 = vpop.eup %614  ;;  %v344_v43 = vadd.f32 1.0, %v613_v41 }
 0x22a   :  { %v343_v44 = vadd.f32 1.0, %v615_v42 }
 0x22b   :  { %620 = vrcp.f32 %v344_v43 }
 0x22c   :  { %622 = vrcp.f32 %v343_v44 }
 0x231   :  { %v617_v46 = vpop.eup %616 }
 0x232   :  { %v619_v47 = vpop.eup %618  ;;  %v354_v49 = vmul.f32 %v617_v46, %v316_v23 }
 0x233   :  { %v353_v51 = vmul.f32 %v619_v47, %v311_v26 }
 0x234   :  { %v358_v52 = vmul.f32 %v354_v49, %v220_v48 }
 0x235   :  { %v621_v53 = vpop.eup %620  ;;  %v357_v54 = vmul.f32 %v353_v51, %v215_v50 }
 0x236   :  { %v623_v55 = vpop.eup %622  ;;  %v356_v57 = vmul.f32 %v621_v53, %v326_v31 }
 0x237   :  { %v355_v59 = vmul.f32 %v623_v55, %v321_v34  ;;  %566 = vmatprep.mubr.msk.f32.mxu0 %vm49_vm0, %v357_v54 }
 0x238   :  { %v360_v60 = vmul.f32 %v356_v57, %v230_v56  ;;  %567 = vmatmul.mubr.msk.f32.vlgmr.msra.gmra.mrb[4].mxu0 %vm49_vm0, %v358_v52 }
 0x239   :  { %v359_v61 = vmul.f32 %v355_v59, %v225_v58 }
 0x23b   :  { %569 = vmatprep.mubr.msk.f32.mxu1 %vm49_vm0, %v359_v61 }
 0x23c   :  { %570 = vmatmul.mubr.msk.f32.vlgmr.msra.gmra.mrb[4].mxu1 %vm49_vm0, %v360_v60 }
 0x30b   :  { %v568_v63 = vpop.f32.mrb[4].mxu0 }
 0x30c   :  { %v456_v0 = vadd.f32 %v568_v63, %v501_v62  ;;  %v450_v1 = vpop.f32.mrb[5].mxu0 }
 0x30d   :  { %v451_v2 = vadd.f32 %v501_v62, %v450_v1 }
 0x30e   :  { %470 = vst.msk [vmem:[%s832_s10 + $0x8] sm:$0xff] %vm49_vm0, %v456_v0 }
 0x30f   :  { %469 = vst.msk [vmem:[%s832_s10] sm:$0xff] %vm49_vm0, %v451_v2  ;;  %v571_v3 = vpop.f32.mrb[4].mxu1 }
 0x310   :  { %v466_v4 = vadd.f32 %v571_v3, %v501_v62  ;;  %v460_v5 = vpop.f32.mrb[5].mxu1 }
 0x311   :  { %v461_v6 = vadd.f32 %v501_v62, %v460_v5 }
 0x312   :  { %472 = vst.msk [vmem:[%s832_s10 + $0x18] sm:$0xff] %vm49_vm0, %v466_v4 }
 0x313   :  { %471 = vst.msk [vmem:[%s832_s10 + $0x10] sm:$0xff] %vm49_vm0, %v461_v6 }

// kernel: tile.43
= control target key start
LH: loop header
LB: loop body
LE: loop exit
PB: predicated region body
PF: predicated region fallthrough
CT: control target
= control target key end

     0   :  { %s22_s0 = inlined_call_operand.vmem [shape: f32[32], index: 0, kind: input, shape index: {}]   ;;  %s23_s1 = inlined_call_operand.vmem [shape: f32[4,32], index: 1, kind: output, shape index: {}]  }
   0x1   :  { %v4_v0 = vld [vmem:[%s22_s0] ss:$0 sm:$0xff] }
   0x2   :  { %5 = vst [vmem:[%s23_s1] sm:$0xf] %v4_v0 }

// kernel: tile.44
= control target key start
LH: loop header
LB: loop body
LE: loop exit
PB: predicated region body
PF: predicated region fallthrough
CT: control target
= control target key end

     0   :  { %vm7_vm0 = vcmask 261120   ;;  %s37_s8 = smov 32   ;;  %s38_s9 = smov 64   ;;  %vm13_vm1 = vcmask 1048320   ;;  %vm19_vm2 = vcmask 785920   ;;  %vm25_vm3 = vcmask 523520   ;;  %s55_s0 = inlined_call_operand.vmem [shape: f32[4,32], index: 0, kind: input, shape index: {}]   ;;  %s56_s1 = inlined_call_operand.vmem [shape: f32[1,128], index: 1, kind: output, shape index: {}]  }
   0x1   :  { %v4_v0 = vld [vmem:[%s55_s0] sm:$0xf]  ;;  %s36_s0 = smov 96  }
   0x2   :  { %5 = vst [vmem:[#allocation1] sm:$0xf] %v4_v0 }
   0x9   :  { %v10_v1 = vld [vmem:[#allocation1 + $0x3] sm:$0x1]   ;;  %v22_v2 = vld [vmem:[#allocation1 + $0x1] sm:$0x1]   ;;  %v6_v3 = vld [vmem:[#allocation1] sm:$0x1]  }
   0xa   :  { %11 = vrot.lane.b32.xlu0 %v10_v1, %s36_s0  ;;  %23 = vrot.lane.b32.xlu1 %v22_v2, %s37_s8  ;;  %v16_v4 = vld [vmem:[#allocation1 + $0x2] sm:$0x1]   ;;  %8 = vst.msk [vmem:[#allocation0] sm:$0x1] %vm7_vm0, %v6_v3  }
   0xe   :  { %17 = vrot.lane.b32.xlu0 %v16_v4, %s38_s9 }
  0x7c   :  { %v12_v5 = vpop.permute.xlu0 %11   ;;  %v24_v6 = vpop.permute.xlu1 %23  }
  0x7d   :  { %14 = vst.msk [vmem:[#allocation0] sm:$0x1] %vm13_vm1, %v12_v5  }
  0x80   :  { %v18_v7 = vpop.permute.xlu0 %17  }
  0x81   :  { %20 = vst.msk [vmem:[#allocation0] sm:$0x1] %vm19_vm2, %v18_v7  }
  0x82   :  { %26 = vst.msk [vmem:[#allocation0] sm:$0x1] %vm25_vm3, %v24_v6  }
  0x89   :  { %v30_v8 = vld [vmem:[#allocation0] sm:$0x1] }
  0x8a   :  { %32 = vst [vmem:[%s56_s1] sm:$0x1] %v30_v8 }

// kernel: _lambda_.24
= control target key start
LH: loop header
LB: loop body
LE: loop exit
PB: predicated region body
PF: predicated region fallthrough
CT: control target
= control target key end

     0   :  { %s920_s15 = smov 0   ;;  %s922_s16 = smov 0   ;;  %s1223_s0 = inlined_call_operand.vmem [shape: f32[128,128], index: 0, kind: input, shape index: {}]   ;;  %s1224_s1 = inlined_call_operand.vmem [shape: f32[1,128], index: 1, kind: input, shape index: {}]   ;;  %s1225_s2 = inlined_call_operand.vmem [shape: f32[1,128], index: 2, kind: input, shape index: {}]   ;;  %s1226_s3 = inlined_call_operand.vmem [shape: f32[128,128], index: 3, kind: input, shape index: {}]   ;;  %s1227_s4 = inlined_call_operand.vmem [shape: f32[128,128], index: 4, kind: output, shape index: {}]  }
   0x1   :  { %s924_s17 = smov 0  }
   0x2 LB: > { %s26_s18 = sadd.s32 1, %s885_s16  ;;  %p670_p0 = scmp.ge.s32.totalorder %s889_s17, 1  ;;  %s889_s17 = sphi %s924_s17, %s14_s17   ;;  %s885_s16 = sphi %s922_s16, %s1229_s16   ;;  %s881_s15 = sphi %s920_s15, %s1228_s15  }
   0x3   : > { %p28_p1 = scmp.ge.s32.totalorder %s26_s18, 2  ;;  %p175_p2 = scmp.lt.s32.totalorder %s889_s17, 3 }
   0x5   : > { %s1231_s18 = smov (%p28_p1, %s26_s18), 0  ;;  %p176_p3 = pnand %p670_p0, %p175_p2 }
   0x6   : > { %p213_p4 = scmp.eq.s32.totalorder (!%p176_p3), %s881_s15, 0 }
   0x7   : > { %179 = sbr.rel (%p176_p3) target bundleno = 361 (0x169), region = 36 }
   0xe   : > { %218 = sbr.rel (!%p213_p4) target bundleno = 21 (0x15), region = 40  ;;  %v891_v0 = vmov (%p213_p4), 0.0  }
   0xf   : > { %219 = vst [vmem:[#allocation2] sm:$0x1] (%p213_p4), %v891_v0  ;;  %220 = vst [vmem:[#allocation3] sm:$0x1] (%p213_p4), %v891_v0 }
  0x15 PF: > { %p672_p5 = scmp.ne.s32.totalorder %s881_s15, 0 }
  0x16   : > { %v224_v1 = vld [vmem:[%s1223_s0] sm:$0xff] (!%p672_p5)  ;;  %v225_v2 = vld [vmem:[%s1223_s0 + $0x8] sm:$0xff] (!%p672_p5)  ;;  %v226_v3 = vld [vmem:[%s1223_s0 + $0x10] sm:$0xff] (!%p672_p5) }
  0x17   : > { %223 = sbr.rel (%p672_p5) target bundleno = 70 (0x46), region = 44  ;;  %v227_v4 = vld [vmem:[%s1223_s0 + $0x18] sm:$0xff] (!%p672_p5)  ;;  %v241_v5 = vadd.f32 (!%p672_p5), %v225_v2, %v224_v1  ;;  %v265_v6 = vmul.f32 (!%p672_p5), %v224_v1, %v224_v1  ;;  %v266_v7 = vmul.f32 (!%p672_p5), %v225_v2, %v225_v2  ;;  %v267_v8 = vmul.f32 (!%p672_p5), %v226_v3, %v226_v3  ;;  %v228_v9 = vld [vmem:[%s1223_s0 + $0x20] sm:$0xff] (!%p672_p5)  ;;  %v229_v13 = vld [vmem:[%s1223_s0 + $0x28] sm:$0xff] (!%p672_p5) }
  0x18   : > { %v268_v11 = vmul.f32 (!%p672_p5), %v227_v4, %v227_v4  ;;  %v269_v15 = vmul.f32 (!%p672_p5), %v228_v9, %v228_v9  ;;  %v230_v17 = vld [vmem:[%s1223_s0 + $0x30] sm:$0xff] (!%p672_p5)  ;;  %v270_v19 = vmul.f32 (!%p672_p5), %v229_v13, %v229_v13  ;;  %v231_v21 = vld [vmem:[%s1223_s0 + $0x38] sm:$0xff] (!%p672_p5)  ;;  %v232_v25 = vld [vmem:[%s1223_s0 + $0x40] sm:$0xff] (!%p672_p5) }
  0x19   : > { %v242_v10 = vadd.f32 (!%p672_p5), %v241_v5, %v226_v3  ;;  %v281_v12 = vadd.f32 (!%p672_p5), %v266_v7, %v265_v6  ;;  %v271_v23 = vmul.f32 (!%p672_p5), %v230_v17, %v230_v17  ;;  %v272_v27 = vmul.f32 (!%p672_p5), %v231_v21, %v231_v21  ;;  %v233_v29 = vld [vmem:[%s1223_s0 + $0x48] sm:$0xff] (!%p672_p5)  ;;  %v234_v33 = vld [vmem:[%s1223_s0 + $0x50] sm:$0xff] (!%p672_p5)  ;;  %v235_v37 = vld [vmem:[%s1223_s0 + $0x58] sm:$0xff] (!%p672_p5) }
  0x1a   : > { %v273_v31 = vmul.f32 (!%p672_p5), %v232_v25, %v232_v25  ;;  %v274_v35 = vmul.f32 (!%p672_p5), %v233_v29, %v233_v29  ;;  %v275_v39 = vmul.f32 (!%p672_p5), %v234_v33, %v234_v33  ;;  %v236_v41 = vld [vmem:[%s1223_s0 + $0x60] sm:$0xff] (!%p672_p5)  ;;  %v276_v43 = vmul.f32 (!%p672_p5), %v235_v37, %v235_v37  ;;  %v237_v45 = vld [vmem:[%s1223_s0 + $0x68] sm:$0xff] (!%p672_p5)  ;;  %v238_v49 = vld [vmem:[%s1223_s0 + $0x70] sm:$0xff] (!%p672_p5) }
  0x1b   : > { %v243_v14 = vadd.f32 (!%p672_p5), %v242_v10, %v227_v4  ;;  %v282_v16 = vadd.f32 (!%p672_p5), %v281_v12, %v267_v8  ;;  %v277_v47 = vmul.f32 (!%p672_p5), %v236_v41, %v236_v41  ;;  %v278_v51 = vmul.f32 (!%p672_p5), %v237_v45, %v237_v45  ;;  %v239_v53 = vld [vmem:[%s1223_s0 + $0x78] sm:$0xff] (!%p672_p5)  ;;  %v240_v7 = vld [vmem:[#allocation2] sm:$0x1] (!%p672_p5)  ;;  %v264_v12 = vld [vmem:[#allocation3] sm:$0x1] (!%p672_p5) }
  0x1c   : > { %v279_v55 = vmul.f32 (!%p672_p5), %v238_v49, %v238_v49  ;;  %v280_v58 = vmul.f32 (!%p672_p5), %v239_v53, %v239_v53 }
  0x1d   : > { %v244_v18 = vadd.f32 (!%p672_p5), %v243_v14, %v228_v9  ;;  %v283_v20 = vadd.f32 (!%p672_p5), %v282_v16, %v268_v11 }
  0x1f   : > { %v245_v22 = vadd.f32 %v244_v18, %v229_v13  ;;  %v284_v24 = vadd.f32 %v283_v20, %v269_v15 }
  0x21   : > { %v246_v26 = vadd.f32 %v245_v22, %v230_v17  ;;  %v285_v28 = vadd.f32 %v284_v24, %v270_v19 }
  0x23   : > { %v247_v30 = vadd.f32 %v246_v26, %v231_v21  ;;  %v286_v32 = vadd.f32 %v285_v28, %v271_v23 }
  0x25   : > { %v248_v34 = vadd.f32 %v247_v30, %v232_v25  ;;  %v287_v36 = vadd.f32 %v286_v32, %v272_v27 }
  0x27   : > { %v249_v38 = vadd.f32 %v248_v34, %v233_v29  ;;  %v288_v40 = vadd.f32 %v287_v36, %v273_v31 }
  0x29   : > { %v250_v42 = vadd.f32 %v249_v38, %v234_v33  ;;  %v289_v44 = vadd.f32 %v288_v40, %v274_v35 }
  0x2b   : > { %v251_v46 = vadd.f32 %v250_v42, %v235_v37  ;;  %v290_v48 = vadd.f32 %v289_v44, %v275_v39 }
  0x2d   : > { %v252_v50 = vadd.f32 %v251_v46, %v236_v41  ;;  %v291_v52 = vadd.f32 %v290_v48, %v276_v43 }
  0x2f   : > { %v253_v54 = vadd.f32 %v252_v50, %v237_v45  ;;  %v292_v56 = vadd.f32 %v291_v52, %v277_v47 }
  0x31   : > { %v254_v57 = vadd.f32 %v253_v54, %v238_v49  ;;  %v293_v59 = vadd.f32 %v292_v56, %v278_v51 }
  0x33   : > { %v255_v60 = vadd.f32 %v254_v57, %v239_v53  ;;  %v294_v61 = vadd.f32 %v293_v59, %v279_v55 }
  0x35   : > { %v256_v62 = vrot.slane %v255_v60, 4  ;;  %v295_v63 = vadd.f32 %v294_v61, %v280_v58 }
  0x37   : > { %v257_v0 = vadd.f32 %v256_v62, %v255_v60  ;;  %v296_v1 = vrot.slane %v295_v63, 4 }
  0x39   : > { %v258_v2 = vrot.slane %v257_v0, 2  ;;  %v297_v3 = vadd.f32 %v296_v1, %v295_v63 }
  0x3b   : > { %v259_v4 = vadd.f32 %v258_v2, %v257_v0  ;;  %v298_v5 = vrot.slane %v297_v3, 2 }
  0x3d   : > { %v260_v6 = vrot.slane %v259_v4, 1  ;;  %v299_v8 = vadd.f32 %v298_v5, %v297_v3 }
  0x3f   : > { %v261_v9 = vadd.f32 %v260_v6, %v259_v4  ;;  %v300_v10 = vrot.slane %v299_v8, 1 }
  0x41   : > { %v262_v11 = vadd.f32 %v261_v9, %v240_v7  ;;  %v301_v13 = vadd.f32 %v300_v10, %v299_v8 }
  0x43   : > { %263 = vst [vmem:[#allocation2] sm:$0x1] %v262_v11  ;;  %v302_v14 = vadd.f32 %v301_v13, %v264_v12 }
  0x45   : > { %303 = vst [vmem:[#allocation3] sm:$0x1] %v302_v14 }
  0x46 PF: > { %p304_p6 = scmp.eq.s32.totalorder %s881_s15, 1 }
  0x47   : > { %v310_v15 = vld [vmem:[%s1226_s3] sm:$0xff] (%p304_p6)  ;;  %v311_v16 = vld [vmem:[%s1226_s3 + $0x8] sm:$0xff] (%p304_p6)  ;;  %v312_v17 = vld [vmem:[%s1226_s3 + $0x10] sm:$0xff] (%p304_p6)  ;;  %v892_v18 = vmov (%p304_p6), 0.0|0.0   ;;  %vm893_vm0 = vmmov (%p304_p6), 0   ;;  %v894_v21 = vmov (%p304_p6), 0.0  }
  0x48   : > { %308 = sbr.rel (!%p304_p6) target bundleno = 337 (0x151), region = 48  ;;  %789 = vmatprep.subr.bf16.mxu0 (%p304_p6), %v892_v18  ;;  %v790_v19 = vpack.c.bf16 (%p304_p6), %v311_v16, %v310_v15  ;;  %813 = vmatprep.subr.bf16.mxu1 (%p304_p6), %v892_v18  ;;  %v313_v20 = vld [vmem:[%s1226_s3 + $0x18] sm:$0xff] (%p304_p6)  ;;  %v314_v23 = vld [vmem:[%s1226_s3 + $0x20] sm:$0xff] (%p304_p6)  ;;  %v315_v24 = vld [vmem:[%s1226_s3 + $0x28] sm:$0xff] (%p304_p6) }
  0x49   : > { %751 = vmatprep.mubr.msk.f32.mxu0 (%p304_p6), %vm893_vm0, %v894_v21  ;;  %786 = vmatprep.mubr.msk.f32.mxu1 (%p304_p6), %vm893_vm0, %v894_v21  ;;  %v793_v22 = vpack.c.bf16 (%p304_p6), %v313_v20, %v312_v17  ;;  %v796_v25 = vpack.c.bf16 (%p304_p6), %v315_v24, %v314_v23  ;;  %v316_v26 = vld [vmem:[%s1226_s3 + $0x30] sm:$0xff] (%p304_p6)  ;;  %v317_v27 = vld [vmem:[%s1226_s3 + $0x38] sm:$0xff] (%p304_p6)  ;;  %v318_v29 = vld [vmem:[%s1226_s3 + $0x40] sm:$0xff] (%p304_p6) }
  0x4a   : > { %791 = vmatpush3.bf16.msra.mxu0 (%p304_p6), %v790_v19  ;;  %815 = vmatpush3.bf16.msra.mxu1 (%p304_p6), %v790_v19  ;;  %v799_v28 = vpack.c.bf16 (%p304_p6), %v317_v27, %v316_v26  ;;  %v319_v30 = vld [vmem:[%s1226_s3 + $0x48] sm:$0xff] (%p304_p6)  ;;  %v320_v32 = vld [vmem:[%s1226_s3 + $0x50] sm:$0xff] (%p304_p6)  ;;  %v321_v33 = vld [vmem:[%s1226_s3 + $0x58] sm:$0xff] (%p304_p6) }
  0x4b   : > { %792 = vmatprep.subr.bf16.mxu0 (%p304_p6), %v892_v18  ;;  %816 = vmatprep.subr.bf16.mxu1 (%p304_p6), %v892_v18  ;;  %v802_v31 = vpack.c.bf16 (%p304_p6), %v319_v30, %v318_v29  ;;  %v805_v34 = vpack.c.bf16 (%p304_p6), %v321_v33, %v320_v32  ;;  %v322_v35 = vld [vmem:[%s1226_s3 + $0x60] sm:$0xff] (%p304_p6)  ;;  %v323_v36 = vld [vmem:[%s1226_s3 + $0x68] sm:$0xff] (%p304_p6)  ;;  %v324_v38 = vld [vmem:[%s1226_s3 + $0x70] sm:$0xff] (%p304_p6) }
  0x4c   : > { %v808_v37 = vpack.c.bf16 (%p304_p6), %v323_v36, %v322_v35  ;;  %v325_v39 = vld [vmem:[%s1226_s3 + $0x78] sm:$0xff] (%p304_p6)  ;;  %v309_v41 = vld [vmem:[#allocation2] sm:$0x1] (%p304_p6)  ;;  %v396_v42 = vld [vmem:[#allocation3] sm:$0x1] (%p304_p6) }
  0x4d   : > { %v811_v40 = vpack.c.bf16 (%p304_p6), %v325_v39, %v324_v38 }
  0x4e   : > { %794 = vmatpush3.bf16.msra.mxu0 (%p304_p6), %v793_v22  ;;  %818 = vmatpush3.bf16.msra.mxu1 (%p304_p6), %v793_v22 }
  0x4f   : > { %795 = vmatprep.subr.bf16.mxu0 %v892_v18  ;;  %819 = vmatprep.subr.bf16.mxu1 %v892_v18 }
  0x52   : > { %797 = vmatpush3.bf16.msra.mxu0 %v796_v25  ;;  %821 = vmatpush3.bf16.msra.mxu1 %v796_v25 }
  0x53   : > { %798 = vmatprep.subr.bf16.mxu0 %v892_v18  ;;  %822 = vmatprep.subr.bf16.mxu1 %v892_v18 }
  0x56   : > { %800 = vmatpush3.bf16.msra.mxu0 %v799_v28  ;;  %824 = vmatpush3.bf16.msra.mxu1 %v799_v28 }
  0x57   : > { %801 = vmatprep.subr.bf16.mxu0 %v892_v18  ;;  %825 = vmatprep.subr.bf16.mxu1 %v892_v18 }
  0x5a   : > { %803 = vmatpush3.bf16.msra.mxu0 %v802_v31  ;;  %827 = vmatpush3.bf16.msra.mxu1 %v802_v31 }
  0x5b   : > { %804 = vmatprep.subr.bf16.mxu0 %v892_v18  ;;  %828 = vmatprep.subr.bf16.mxu1 %v892_v18 }
  0x5e   : > { %806 = vmatpush3.bf16.msra.mxu0 %v805_v34  ;;  %830 = vmatpush3.bf16.msra.mxu1 %v805_v34 }
  0x5f   : > { %807 = vmatprep.subr.bf16.mxu0 %v892_v18  ;;  %831 = vmatprep.subr.bf16.mxu1 %v892_v18 }
  0x62   : > { %809 = vmatpush3.bf16.msra.mxu0 %v808_v37  ;;  %833 = vmatpush3.bf16.msra.mxu1 %v808_v37 }
  0x63   : > { %810 = vmatprep.subr.bf16.mxu0 %v892_v18  ;;  %834 = vmatprep.subr.bf16.mxu1 %v892_v18 }
  0x66   : > { %812 = vmatpush3.bf16.msra.mxu0 %v811_v40  ;;  %836 = vmatpush3.bf16.msra.mxu1 %v811_v40 }
  0x69   : > { %752 = vmatmul.mubr.f32.vlgmr.msra.gmra.mrb[0].mxu0 %v309_v41  ;;  %787 = vmatmul.mubr.f32.vlgmr.msra.gmra.mrb[0].mxu1 %v396_v42 }
 0x13c   : > { %v392_v43 = vpop.f32.mrb[0].mxu0  ;;  %v463_v44 = vpop.f32.mrb[0].mxu1 }
 0x13d   : > { %v467_v45 = vmul.f32 0.001953125, %v392_v43  ;;  %v753_v46 = vpop.f32.mrb[1].mxu0  ;;  %v468_v47 = vmul.f32 0.001953125, %v463_v44  ;;  %v788_v48 = vpop.f32.mrb[1].mxu1 }
 0x13f   : > { %v469_v49 = vmul.f32 %v467_v45, %v467_v45  ;;  %471 = vst [vmem:[#allocation2] sm:$0x1] %v467_v45 }
 0x141   : > { %v470_v50 = vsub.f32 %v468_v47, %v469_v49 }
 0x143   : > { %v472_v51 = vadd.f32 1e-05, %v470_v50 }
 0x145   : > { %865 = vrsqrt.f32 %v472_v51 }
 0x14f   : > { %v866_v52 = vpop.eup %865 }
 0x150   : > { %474 = vst [vmem:[#allocation3] sm:$0x1] %v866_v52 }
 0x151 PF: > { %p674_p7 = scmp.ne.s32.totalorder %s881_s15, 1 }
 0x152   : > { %v478_v53 = vld [vmem:[%s1223_s0] sm:$0xff] (!%p674_p7)  ;;  %v479_v58 = vld [vmem:[%s1223_s0 + $0x8] sm:$0xff] (!%p674_p7)  ;;  %v480_v60 = vld [vmem:[%s1223_s0 + $0x10] sm:$0xff] (!%p674_p7) }
 0x153   : > { %477 = sbr.rel (%p674_p7) target bundleno = 361 (0x169), region = 52  ;;  %v1043_v54 = vld [vmem:[#allocation2] ss:$0 sm:$0xff] (!%p674_p7)  ;;  %v481_v61 = vld [vmem:[%s1223_s0 + $0x18] sm:$0xff] (!%p674_p7)  ;;  %v483_v3 = vld [vmem:[%s1223_s0 + $0x28] sm:$0xff] (!%p674_p7) }
 0x154   : > { %v501_v56 = vsub.f32 (!%p674_p7), %v478_v53, %v1043_v54  ;;  %v1051_v57 = vld [vmem:[%s1224_s1] ss:$0 sm:$0xff] (!%p674_p7)  ;;  %v502_v59 = vsub.f32 (!%p674_p7), %v479_v58, %v1043_v54  ;;  %v503_v0 = vsub.f32 (!%p674_p7), %v480_v60, %v1043_v54  ;;  %v504_v1 = vsub.f32 (!%p674_p7), %v481_v61, %v1043_v54  ;;  %v484_v4 = vld [vmem:[%s1223_s0 + $0x30] sm:$0xff] (!%p674_p7)  ;;  %v485_v5 = vld [vmem:[%s1223_s0 + $0x38] sm:$0xff] (!%p674_p7) }
 0x155   : > { %v482_v62 = vld [vmem:[%s1223_s0 + $0x20] sm:$0xff] (!%p674_p7)  ;;  %v506_v8 = vsub.f32 (!%p674_p7), %v483_v3, %v1043_v54  ;;  %v507_v9 = vsub.f32 (!%p674_p7), %v484_v4, %v1043_v54  ;;  %v508_v10 = vsub.f32 (!%p674_p7), %v485_v5, %v1043_v54  ;;  %v487_v24 = vld [vmem:[%s1223_s0 + $0x48] sm:$0xff] (!%p674_p7)  ;;  %v488_v29 = vld [vmem:[%s1223_s0 + $0x50] sm:$0xff] (!%p674_p7) }
 0x156   : > { %v505_v2 = vsub.f32 (!%p674_p7), %v482_v62, %v1043_v54  ;;  %v1082_v6 = vld [vmem:[%s1225_s2] ss:$0 sm:$0xff] (!%p674_p7)  ;;  %v489_v30 = vld [vmem:[%s1223_s0 + $0x58] sm:$0xff] (!%p674_p7)  ;;  %v491_v36 = vld [vmem:[%s1223_s0 + $0x68] sm:$0xff] (!%p674_p7)  ;;  %v510_v42 = vsub.f32 (!%p674_p7), %v487_v24, %v1043_v54  ;;  %v511_v44 = vsub.f32 (!%p674_p7), %v488_v29, %v1043_v54 }
 0x157   : > { %v1045_v55 = vld [vmem:[#allocation3] ss:$0 sm:$0xff] (!%p674_p7)  ;;  %v492_v37 = vld [vmem:[%s1223_s0 + $0x70] sm:$0xff] (!%p674_p7)  ;;  %v493_v38 = vld [vmem:[%s1223_s0 + $0x78] sm:$0xff] (!%p674_p7)  ;;  %v512_v45 = vsub.f32 (!%p674_p7), %v489_v30, %v1043_v54  ;;  %v514_v48 = vsub.f32 (!%p674_p7), %v491_v36, %v1043_v54 }
 0x158   : > { %v524_v63 = vmul.f32 (!%p674_p7), %v1045_v55, %v501_v56  ;;  %v525_v7 = vmul.f32 (!%p674_p7), %v1045_v55, %v502_v59  ;;  %v526_v12 = vmul.f32 (!%p674_p7), %v1045_v55, %v503_v0  ;;  %v527_v13 = vmul.f32 (!%p674_p7), %v1045_v55, %v504_v1  ;;  %v486_v19 = vld [vmem:[%s1223_s0 + $0x40] sm:$0xff] (!%p674_p7) }
 0x159   : > { %v528_v14 = vmul.f32 (!%p674_p7), %v1045_v55, %v505_v2  ;;  %v529_v16 = vmul.f32 (!%p674_p7), %v1045_v55, %v506_v8  ;;  %v530_v17 = vmul.f32 (!%p674_p7), %v1045_v55, %v507_v9  ;;  %v531_v18 = vmul.f32 (!%p674_p7), %v1045_v55, %v508_v10  ;;  %v490_v31 = vld [vmem:[%s1223_s0 + $0x60] sm:$0xff] (!%p674_p7) }
 0x15a   : > { %v547_v11 = vmul.f32 %v1051_v57, %v524_v63  ;;  %v548_v15 = vmul.f32 %v1051_v57, %v525_v7  ;;  %v549_v21 = vmul.f32 %v1051_v57, %v526_v12  ;;  %v550_v22 = vmul.f32 %v1051_v57, %v527_v13 }
 0x15b   : > { %v551_v23 = vmul.f32 %v1051_v57, %v528_v14  ;;  %v552_v26 = vmul.f32 %v1051_v57, %v529_v16  ;;  %v553_v27 = vmul.f32 %v1051_v57, %v530_v17  ;;  %v554_v28 = vmul.f32 %v1051_v57, %v531_v18 }
 0x15c   : > { %v570_v20 = vadd.f32 %v1082_v6, %v547_v11  ;;  %v571_v25 = vadd.f32 %v1082_v6, %v548_v15  ;;  %v572_v32 = vadd.f32 %v1082_v6, %v549_v21  ;;  %v573_v33 = vadd.f32 %v1082_v6, %v550_v22 }
 0x15d   : > { %v574_v34 = vadd.f32 %v1082_v6, %v551_v23  ;;  %v509_v35 = vsub.f32 %v486_v19, %v1043_v54  ;;  %v575_v39 = vadd.f32 %v1082_v6, %v552_v26  ;;  %v576_v40 = vadd.f32 %v1082_v6, %v553_v27 }
 0x15e   : > { %586 = vst [vmem:[%s1227_s4] sm:$0xff] %v570_v20  ;;  %587 = vst [vmem:[%s1227_s4 + $0x8] sm:$0xff] %v571_v25  ;;  %v577_v41 = vadd.f32 %v1082_v6, %v554_v28  ;;  %v513_v46 = vsub.f32 %v490_v31, %v1043_v54  ;;  %v533_v47 = vmul.f32 %v1045_v55, %v510_v42 }
 0x15f   : > { %588 = vst [vmem:[%s1227_s4 + $0x10] sm:$0xff] %v572_v32  ;;  %589 = vst [vmem:[%s1227_s4 + $0x18] sm:$0xff] %v573_v33  ;;  %v532_v43 = vmul.f32 %v1045_v55, %v509_v35  ;;  %v515_v49 = vsub.f32 %v492_v37, %v1043_v54  ;;  %v516_v50 = vsub.f32 %v493_v38, %v1043_v54 }
 0x160   : > { %590 = vst [vmem:[%s1227_s4 + $0x20] sm:$0xff] %v574_v34  ;;  %591 = vst [vmem:[%s1227_s4 + $0x28] sm:$0xff] %v575_v39  ;;  %v534_v52 = vmul.f32 %v1045_v55, %v511_v44  ;;  %v535_v53 = vmul.f32 %v1045_v55, %v512_v45  ;;  %v536_v56 = vmul.f32 %v1045_v55, %v513_v46 }
 0x161   : > { %592 = vst [vmem:[%s1227_s4 + $0x30] sm:$0xff] %v576_v40  ;;  %593 = vst [vmem:[%s1227_s4 + $0x38] sm:$0xff] %v577_v41  ;;  %v555_v51 = vmul.f32 %v1051_v57, %v532_v43  ;;  %v556_v58 = vmul.f32 %v1051_v57, %v533_v47  ;;  %v537_v59 = vmul.f32 %v1045_v55, %v514_v48 }
 0x162   : > { %v538_v60 = vmul.f32 %v1045_v55, %v515_v49  ;;  %v539_v61 = vmul.f32 %v1045_v55, %v516_v50  ;;  %v557_v54 = vmul.f32 %v1051_v57, %v534_v52  ;;  %v558_v63 = vmul.f32 %v1051_v57, %v535_v53 }
 0x163   : > { %v578_v62 = vadd.f32 %v1082_v6, %v555_v51  ;;  %v559_v0 = vmul.f32 %v1051_v57, %v536_v56  ;;  %v579_v1 = vadd.f32 %v1082_v6, %v556_v58  ;;  %v560_v2 = vmul.f32 %v1051_v57, %v537_v59 }
 0x164   : > { %v561_v3 = vmul.f32 %v1051_v57, %v538_v60  ;;  %v562_v4 = vmul.f32 %v1051_v57, %v539_v61  ;;  %v580_v55 = vadd.f32 %v1082_v6, %v557_v54  ;;  %v581_v5 = vadd.f32 %v1082_v6, %v558_v63 }
 0x165   : > { %594 = vst [vmem:[%s1227_s4 + $0x40] sm:$0xff] %v578_v62  ;;  %v582_v7 = vadd.f32 %v1082_v6, %v559_v0  ;;  %595 = vst [vmem:[%s1227_s4 + $0x48] sm:$0xff] %v579_v1  ;;  %v583_v8 = vadd.f32 %v1082_v6, %v560_v2 }
 0x166   : > { %v584_v9 = vadd.f32 %v1082_v6, %v561_v3  ;;  %v585_v57 = vadd.f32 %v1082_v6, %v562_v4  ;;  %596 = vst [vmem:[%s1227_s4 + $0x50] sm:$0xff] %v580_v55  ;;  %597 = vst [vmem:[%s1227_s4 + $0x58] sm:$0xff] %v581_v5 }
 0x167   : > { %598 = vst [vmem:[%s1227_s4 + $0x60] sm:$0xff] %v582_v7  ;;  %599 = vst [vmem:[%s1227_s4 + $0x68] sm:$0xff] %v583_v8 }
 0x168   : > { %600 = vst [vmem:[%s1227_s4 + $0x70] sm:$0xff] %v584_v9  ;;  %601 = vst [vmem:[%s1227_s4 + $0x78] sm:$0xff] %v585_v57 }
 0x169 PF: > { %s14_s17 = sadd.s32 1, %s889_s17   ;;  %s1228_s15 = smov %s885_s16 }
 0x16a   : > { %p11_p8 = scmp.ge.s32.totalorder %s14_s17, 4   ;;  %s1229_s16 = smov %s1231_s18 }
 0x16c   :  { %13 = sbr.rel (!%p11_p8) target bundleno = 2 (0x2), region = 82 }

// kernel: _lambda_.25
= control target key start
LH: loop header
LB: loop body
LE: loop exit
PB: predicated region body
PF: predicated region fallthrough
CT: control target
= control target key end

     0   :  { %s800_s15 = smov 0   ;;  %s802_s16 = smov 0   ;;  %s923_s0 = inlined_call_operand.vmem [shape: f32[32,128], index: 0, kind: input, shape index: {}]   ;;  %s924_s1 = inlined_call_operand.vmem [shape: f32[1,128], index: 1, kind: input, shape index: {}]   ;;  %s925_s2 = inlined_call_operand.vmem [shape: f32[1,128], index: 2, kind: input, shape index: {}]   ;;  %s926_s3 = inlined_call_operand.vmem [shape: f32[128,128], index: 3, kind: input, shape index: {}]   ;;  %s927_s4 = inlined_call_operand.vmem [shape: f32[32,128], index: 4, kind: output, shape index: {}]  }
   0x1   :  { %s804_s17 = smov 0  }
   0x2 LB: > { %s26_s18 = sadd.s32 1, %s765_s16  ;;  %p550_p0 = scmp.ge.s32.totalorder %s769_s17, 1  ;;  %s769_s17 = sphi %s804_s17, %s14_s17   ;;  %s765_s16 = sphi %s802_s16, %s929_s16   ;;  %s761_s15 = sphi %s800_s15, %s928_s15  }
   0x3   : > { %p28_p1 = scmp.ge.s32.totalorder %s26_s18, 2  ;;  %p175_p2 = scmp.lt.s32.totalorder %s769_s17, 3 }
   0x5   : > { %s931_s18 = smov (%p28_p1, %s26_s18), 0  ;;  %p176_p3 = pnand %p550_p0, %p175_p2 }
   0x6   : > { %p213_p4 = scmp.eq.s32.totalorder (!%p176_p3), %s761_s15, 0 }
   0x7   : > { %179 = sbr.rel (%p176_p3) target bundleno = 328 (0x148), region = 36 }
   0xe   : > { %218 = sbr.rel (!%p213_p4) target bundleno = 21 (0x15), region = 40  ;;  %v771_v0 = vmov (%p213_p4), 0.0  }
   0xf   : > { %219 = vst [vmem:[#allocation2] sm:$0x1] (%p213_p4), %v771_v0  ;;  %220 = vst [vmem:[#allocation3] sm:$0x1] (%p213_p4), %v771_v0 }
  0x15 PF: > { %p552_p5 = scmp.ne.s32.totalorder %s761_s15, 0 }
  0x16   : > { %v224_v1 = vld [vmem:[%s923_s0] sm:$0xff] (!%p552_p5)  ;;  %v225_v2 = vld [vmem:[%s923_s0 + $0x8] sm:$0xff] (!%p552_p5)  ;;  %v226_v3 = vld [vmem:[%s923_s0 + $0x10] sm:$0xff] (!%p552_p5) }
  0x17   : > { %223 = sbr.rel (%p552_p5) target bundleno = 46 (0x2e), region = 44  ;;  %v227_v4 = vld [vmem:[%s923_s0 + $0x18] sm:$0xff] (!%p552_p5)  ;;  %v229_v5 = vadd.f32 (!%p552_p5), %v225_v2, %v224_v1  ;;  %v241_v6 = vmul.f32 (!%p552_p5), %v224_v1, %v224_v1  ;;  %v242_v7 = vmul.f32 (!%p552_p5), %v225_v2, %v225_v2  ;;  %v243_v8 = vmul.f32 (!%p552_p5), %v226_v3, %v226_v3  ;;  %v228_v24 = vld [vmem:[#allocation2] sm:$0x1] (!%p552_p5)  ;;  %v240_v27 = vld [vmem:[#allocation3] sm:$0x1] (!%p552_p5) }
  0x18   : > { %v244_v10 = vmul.f32 (!%p552_p5), %v227_v4, %v227_v4 }
  0x19   : > { %v230_v9 = vadd.f32 (!%p552_p5), %v229_v5, %v226_v3  ;;  %v245_v11 = vadd.f32 (!%p552_p5), %v242_v7, %v241_v6 }
  0x1b   : > { %v231_v12 = vadd.f32 (!%p552_p5), %v230_v9, %v227_v4  ;;  %v246_v13 = vadd.f32 (!%p552_p5), %v245_v11, %v243_v8 }
  0x1d   : > { %v232_v14 = vrot.slane (!%p552_p5), %v231_v12, 4  ;;  %v247_v15 = vadd.f32 (!%p552_p5), %v246_v13, %v244_v10 }
  0x1f   : > { %v233_v16 = vadd.f32 %v232_v14, %v231_v12  ;;  %v248_v17 = vrot.slane %v247_v15, 4 }
  0x21   : > { %v234_v18 = vrot.slane %v233_v16, 2  ;;  %v249_v19 = vadd.f32 %v248_v17, %v247_v15 }
  0x23   : > { %v235_v20 = vadd.f32 %v234_v18, %v233_v16  ;;  %v250_v21 = vrot.slane %v249_v19, 2 }
  0x25   : > { %v236_v22 = vrot.slane %v235_v20, 1  ;;  %v251_v23 = vadd.f32 %v250_v21, %v249_v19 }
  0x27   : > { %v237_v25 = vadd.f32 %v236_v22, %v235_v20  ;;  %v252_v26 = vrot.slane %v251_v23, 1 }
  0x29   : > { %v238_v28 = vadd.f32 %v237_v25, %v228_v24  ;;  %v253_v29 = vadd.f32 %v252_v26, %v251_v23 }
  0x2b   : > { %239 = vst [vmem:[#allocation2] sm:$0x1] %v238_v28  ;;  %v254_v30 = vadd.f32 %v253_v29, %v240_v27 }
  0x2d   : > { %255 = vst [vmem:[#allocation3] sm:$0x1] %v254_v30 }
  0x2e PF: > { %p256_p6 = scmp.eq.s32.totalorder %s761_s15, 1 }
  0x2f   : > { %v262_v31 = vld [vmem:[%s926_s3] sm:$0xff] (%p256_p6)  ;;  %v263_v32 = vld [vmem:[%s926_s3 + $0x8] sm:$0xff] (%p256_p6)  ;;  %v264_v33 = vld [vmem:[%s926_s3 + $0x10] sm:$0xff] (%p256_p6)  ;;  %v772_v34 = vmov (%p256_p6), 0.0|0.0   ;;  %vm773_vm0 = vmmov (%p256_p6), 0   ;;  %v774_v37 = vmov (%p256_p6), 0.0  }
  0x30   : > { %260 = sbr.rel (!%p256_p6) target bundleno = 313 (0x139), region = 48  ;;  %669 = vmatprep.subr.bf16.mxu0 (%p256_p6), %v772_v34  ;;  %v670_v35 = vpack.c.bf16 (%p256_p6), %v263_v32, %v262_v31  ;;  %693 = vmatprep.subr.bf16.mxu1 (%p256_p6), %v772_v34  ;;  %v265_v36 = vld [vmem:[%s926_s3 + $0x18] sm:$0xff] (%p256_p6)  ;;  %v266_v39 = vld [vmem:[%s926_s3 + $0x20] sm:$0xff] (%p256_p6)  ;;  %v267_v40 = vld [vmem:[%s926_s3 + $0x28] sm:$0xff] (%p256_p6) }
  0x31   : > { %631 = vmatprep.mubr.msk.f32.mxu0 (%p256_p6), %vm773_vm0, %v774_v37  ;;  %666 = vmatprep.mubr.msk.f32.mxu1 (%p256_p6), %vm773_vm0, %v774_v37  ;;  %v673_v38 = vpack.c.bf16 (%p256_p6), %v265_v36, %v264_v33  ;;  %v676_v41 = vpack.c.bf16 (%p256_p6), %v267_v40, %v266_v39  ;;  %v268_v42 = vld [vmem:[%s926_s3 + $0x30] sm:$0xff] (%p256_p6)  ;;  %v269_v43 = vld [vmem:[%s926_s3 + $0x38] sm:$0xff] (%p256_p6)  ;;  %v270_v45 = vld [vmem:[%s926_s3 + $0x40] sm:$0xff] (%p256_p6) }
  0x32   : > { %671 = vmatpush3.bf16.msra.mxu0 (%p256_p6), %v670_v35  ;;  %695 = vmatpush3.bf16.msra.mxu1 (%p256_p6), %v670_v35  ;;  %v679_v44 = vpack.c.bf16 (%p256_p6), %v269_v43, %v268_v42  ;;  %v271_v46 = vld [vmem:[%s926_s3 + $0x48] sm:$0xff] (%p256_p6)  ;;  %v272_v48 = vld [vmem:[%s926_s3 + $0x50] sm:$0xff] (%p256_p6)  ;;  %v273_v49 = vld [vmem:[%s926_s3 + $0x58] sm:$0xff] (%p256_p6) }
  0x33   : > { %672 = vmatprep.subr.bf16.mxu0 (%p256_p6), %v772_v34  ;;  %696 = vmatprep.subr.bf16.mxu1 (%p256_p6), %v772_v34  ;;  %v682_v47 = vpack.c.bf16 (%p256_p6), %v271_v46, %v270_v45  ;;  %v685_v50 = vpack.c.bf16 (%p256_p6), %v273_v49, %v272_v48  ;;  %v274_v51 = vld [vmem:[%s926_s3 + $0x60] sm:$0xff] (%p256_p6)  ;;  %v275_v52 = vld [vmem:[%s926_s3 + $0x68] sm:$0xff] (%p256_p6)  ;;  %v276_v54 = vld [vmem:[%s926_s3 + $0x70] sm:$0xff] (%p256_p6) }
  0x34   : > { %v688_v53 = vpack.c.bf16 (%p256_p6), %v275_v52, %v274_v51  ;;  %v277_v55 = vld [vmem:[%s926_s3 + $0x78] sm:$0xff] (%p256_p6)  ;;  %v261_v57 = vld [vmem:[#allocation2] sm:$0x1] (%p256_p6)  ;;  %v348_v58 = vld [vmem:[#allocation3] sm:$0x1] (%p256_p6) }
  0x35   : > { %v691_v56 = vpack.c.bf16 (%p256_p6), %v277_v55, %v276_v54 }
  0x36   : > { %674 = vmatpush3.bf16.msra.mxu0 (%p256_p6), %v673_v38  ;;  %698 = vmatpush3.bf16.msra.mxu1 (%p256_p6), %v673_v38 }
  0x37   : > { %675 = vmatprep.subr.bf16.mxu0 %v772_v34  ;;  %699 = vmatprep.subr.bf16.mxu1 %v772_v34 }
  0x3a   : > { %677 = vmatpush3.bf16.msra.mxu0 %v676_v41  ;;  %701 = vmatpush3.bf16.msra.mxu1 %v676_v41 }
  0x3b   : > { %678 = vmatprep.subr.bf16.mxu0 %v772_v34  ;;  %702 = vmatprep.subr.bf16.mxu1 %v772_v34 }
  0x3e   : > { %680 = vmatpush3.bf16.msra.mxu0 %v679_v44  ;;  %704 = vmatpush3.bf16.msra.mxu1 %v679_v44 }
  0x3f   : > { %681 = vmatprep.subr.bf16.mxu0 %v772_v34  ;;  %705 = vmatprep.subr.bf16.mxu1 %v772_v34 }
  0x42   : > { %683 = vmatpush3.bf16.msra.mxu0 %v682_v47  ;;  %707 = vmatpush3.bf16.msra.mxu1 %v682_v47 }
  0x43   : > { %684 = vmatprep.subr.bf16.mxu0 %v772_v34  ;;  %708 = vmatprep.subr.bf16.mxu1 %v772_v34 }
  0x46   : > { %686 = vmatpush3.bf16.msra.mxu0 %v685_v50  ;;  %710 = vmatpush3.bf16.msra.mxu1 %v685_v50 }
  0x47   : > { %687 = vmatprep.subr.bf16.mxu0 %v772_v34  ;;  %711 = vmatprep.subr.bf16.mxu1 %v772_v34 }
  0x4a   : > { %689 = vmatpush3.bf16.msra.mxu0 %v688_v53  ;;  %713 = vmatpush3.bf16.msra.mxu1 %v688_v53 }
  0x4b   : > { %690 = vmatprep.subr.bf16.mxu0 %v772_v34  ;;  %714 = vmatprep.subr.bf16.mxu1 %v772_v34 }
  0x4e   : > { %692 = vmatpush3.bf16.msra.mxu0 %v691_v56  ;;  %716 = vmatpush3.bf16.msra.mxu1 %v691_v56 }
  0x51   : > { %632 = vmatmul.mubr.f32.vlgmr.msra.gmra.mrb[0].mxu0 %v261_v57  ;;  %667 = vmatmul.mubr.f32.vlgmr.msra.gmra.mrb[0].mxu1 %v348_v58 }
 0x124   : > { %v344_v59 = vpop.f32.mrb[0].mxu0  ;;  %v415_v60 = vpop.f32.mrb[0].mxu1 }
 0x125   : > { %v419_v61 = vmul.f32 0.0078125, %v344_v59  ;;  %v633_v62 = vpop.f32.mrb[1].mxu0  ;;  %v420_v63 = vmul.f32 0.0078125, %v415_v60  ;;  %v668_v0 = vpop.f32.mrb[1].mxu1 }
 0x127   : > { %v421_v1 = vmul.f32 %v419_v61, %v419_v61  ;;  %423 = vst [vmem:[#allocation2] sm:$0x1] %v419_v61 }
 0x129   : > { %v422_v2 = vsub.f32 %v420_v63, %v421_v1 }
 0x12b   : > { %v424_v3 = vadd.f32 1e-05, %v422_v2 }
 0x12d   : > { %745 = vrsqrt.f32 %v424_v3 }
 0x137   : > { %v746_v4 = vpop.eup %745 }
 0x138   : > { %426 = vst [vmem:[#allocation3] sm:$0x1] %v746_v4 }
 0x139 PF: > { %p554_p7 = scmp.ne.s32.totalorder %s761_s15, 1 }
 0x13a   : > { %v430_v5 = vld [vmem:[%s923_s0] sm:$0xff] (!%p554_p7)  ;;  %v431_v9 = vld [vmem:[%s923_s0 + $0x8] sm:$0xff] (!%p554_p7)  ;;  %v432_v12 = vld [vmem:[%s923_s0 + $0x10] sm:$0xff] (!%p554_p7) }
 0x13b   : > { %429 = sbr.rel (%p554_p7) target bundleno = 328 (0x148), region = 52  ;;  %v555_v6 = vld [vmem:[#allocation2] ss:$0 sm:$0xff] (!%p554_p7)  ;;  %v433_v13 = vld [vmem:[%s923_s0 + $0x18] sm:$0xff] (!%p554_p7) }
 0x13c   : > { %v441_v8 = vsub.f32 (!%p554_p7), %v430_v5, %v555_v6  ;;  %v557_v10 = vld [vmem:[%s924_s1] ss:$0 sm:$0xff] (!%p554_p7)  ;;  %v442_v11 = vsub.f32 (!%p554_p7), %v431_v9, %v555_v6  ;;  %v443_v15 = vsub.f32 (!%p554_p7), %v432_v12, %v555_v6  ;;  %v444_v16 = vsub.f32 (!%p554_p7), %v433_v13, %v555_v6 }
 0x13d   : > { %v558_v17 = vld [vmem:[%s925_s2] ss:$0 sm:$0xff] (!%p554_p7) }
 0x13f   : > { %v556_v7 = vld [vmem:[#allocation3] ss:$0 sm:$0xff] (!%p554_p7) }
 0x140   : > { %v452_v14 = vmul.f32 (!%p554_p7), %v556_v7, %v441_v8  ;;  %v453_v18 = vmul.f32 (!%p554_p7), %v556_v7, %v442_v11  ;;  %v454_v20 = vmul.f32 (!%p554_p7), %v556_v7, %v443_v15  ;;  %v455_v21 = vmul.f32 (!%p554_p7), %v556_v7, %v444_v16 }
 0x142   : > { %v463_v19 = vmul.f32 %v557_v10, %v452_v14  ;;  %v464_v22 = vmul.f32 %v557_v10, %v453_v18  ;;  %v465_v24 = vmul.f32 %v557_v10, %v454_v20  ;;  %v466_v25 = vmul.f32 %v557_v10, %v455_v21 }
 0x144   : > { %v474_v23 = vadd.f32 %v558_v17, %v463_v19  ;;  %v475_v26 = vadd.f32 %v558_v17, %v464_v22  ;;  %v476_v27 = vadd.f32 %v558_v17, %v465_v24  ;;  %v477_v28 = vadd.f32 %v558_v17, %v466_v25 }
 0x146   : > { %478 = vst [vmem:[%s927_s4] sm:$0xff] %v474_v23  ;;  %479 = vst [vmem:[%s927_s4 + $0x8] sm:$0xff] %v475_v26 }
 0x147   : > { %480 = vst [vmem:[%s927_s4 + $0x10] sm:$0xff] %v476_v27  ;;  %481 = vst [vmem:[%s927_s4 + $0x18] sm:$0xff] %v477_v28 }
 0x148 PF: > { %s14_s17 = sadd.s32 1, %s769_s17   ;;  %s928_s15 = smov %s765_s16 }
 0x149   : > { %p11_p8 = scmp.ge.s32.totalorder %s14_s17, 4   ;;  %s929_s16 = smov %s931_s18 }
 0x14b   :  { %13 = sbr.rel (!%p11_p8) target bundleno = 2 (0x2), region = 82 }

// kernel: _lambda_.26
= control target key start
LH: loop header
LB: loop body
LE: loop exit
PB: predicated region body
PF: predicated region fallthrough
CT: control target
= control target key end

     0   :  { %s758_s15 = smov 0   ;;  %s760_s16 = smov 0   ;;  %s854_s0 = inlined_call_operand.vmem [shape: f32[8,128], index: 0, kind: input, shape index: {}]   ;;  %s855_s1 = inlined_call_operand.vmem [shape: f32[1,128], index: 1, kind: input, shape index: {}]   ;;  %s856_s2 = inlined_call_operand.vmem [shape: f32[1,128], index: 2, kind: input, shape index: {}]   ;;  %s857_s3 = inlined_call_operand.vmem [shape: f32[128,128], index: 3, kind: input, shape index: {}]   ;;  %s858_s4 = inlined_call_operand.vmem [shape: f32[8,128], index: 4, kind: output, shape index: {}]  }
   0x1   :  { %s762_s17 = smov 0  }
   0x2 LB: > { %s26_s18 = sadd.s32 1, %s723_s16  ;;  %p509_p0 = scmp.ge.s32.totalorder %s727_s17, 1  ;;  %s727_s17 = sphi %s762_s17, %s14_s17   ;;  %s723_s16 = sphi %s760_s16, %s860_s16   ;;  %s719_s15 = sphi %s758_s15, %s859_s15  }
   0x3   : > { %p28_p1 = scmp.ge.s32.totalorder %s26_s18, 2  ;;  %p173_p2 = scmp.lt.s32.totalorder %s727_s17, 3 }
   0x5   : > { %s862_s18 = smov (%p28_p1, %s26_s18), 0  ;;  %p174_p3 = pnand %p509_p0, %p173_p2 }
   0x6   : > { %p205_p4 = scmp.eq.s32.totalorder (!%p174_p3), %s719_s15, 0 }
   0x7   : > { %177 = sbr.rel (%p174_p3) target bundleno = 321 (0x141), region = 36 }
   0xe   : > { %210 = sbr.rel (!%p205_p4) target bundleno = 21 (0x15), region = 40  ;;  %v729_v0 = vmov (%p205_p4), 0.0  }
   0xf   : > { %211 = vst [vmem:[#allocation2] sm:$0x1] (%p205_p4), %v729_v0  ;;  %212 = vst [vmem:[#allocation3] sm:$0x1] (%p205_p4), %v729_v0 }
  0x15 PF: > { %p511_p5 = scmp.ne.s32.totalorder %s719_s15, 0 }
  0x16   : > { %v216_v1 = vld [vmem:[%s854_s0] sm:$0xff] (!%p511_p5) }
  0x17   : > { %215 = sbr.rel (%p511_p5) target bundleno = 40 (0x28), region = 44  ;;  %v218_v2 = vrot.slane (!%p511_p5), %v216_v1, 4  ;;  %v227_v3 = vmul.f32 (!%p511_p5), %v216_v1, %v216_v1  ;;  %v217_v12 = vld [vmem:[#allocation2] sm:$0x1] (!%p511_p5)  ;;  %v226_v15 = vld [vmem:[#allocation3] sm:$0x1] (!%p511_p5) }
  0x19   : > { %v219_v4 = vadd.f32 (!%p511_p5), %v218_v2, %v216_v1  ;;  %v228_v5 = vrot.slane (!%p511_p5), %v227_v3, 4 }
  0x1b   : > { %v220_v6 = vrot.slane (!%p511_p5), %v219_v4, 2  ;;  %v229_v7 = vadd.f32 (!%p511_p5), %v228_v5, %v227_v3 }
  0x1d   : > { %v221_v8 = vadd.f32 (!%p511_p5), %v220_v6, %v219_v4  ;;  %v230_v9 = vrot.slane (!%p511_p5), %v229_v7, 2 }
  0x1f   : > { %v222_v10 = vrot.slane %v221_v8, 1  ;;  %v231_v11 = vadd.f32 %v230_v9, %v229_v7 }
  0x21   : > { %v223_v13 = vadd.f32 %v222_v10, %v221_v8  ;;  %v232_v14 = vrot.slane %v231_v11, 1 }
  0x23   : > { %v224_v16 = vadd.f32 %v223_v13, %v217_v12  ;;  %v233_v17 = vadd.f32 %v232_v14, %v231_v11 }
  0x25   : > { %225 = vst [vmem:[#allocation2] sm:$0x1] %v224_v16  ;;  %v234_v18 = vadd.f32 %v233_v17, %v226_v15 }
  0x27   : > { %235 = vst [vmem:[#allocation3] sm:$0x1] %v234_v18 }
  0x28 PF: > { %p236_p6 = scmp.eq.s32.totalorder %s719_s15, 1 }
  0x29   : > { %v242_v19 = vld [vmem:[%s857_s3] sm:$0xff] (%p236_p6)  ;;  %v243_v20 = vld [vmem:[%s857_s3 + $0x8] sm:$0xff] (%p236_p6)  ;;  %v244_v21 = vld [vmem:[%s857_s3 + $0x10] sm:$0xff] (%p236_p6)  ;;  %v730_v22 = vmov (%p236_p6), 0.0|0.0   ;;  %vm731_vm0 = vmmov (%p236_p6), 0   ;;  %v732_v25 = vmov (%p236_p6), 0.0  }
  0x2a   : > { %240 = sbr.rel (!%p236_p6) target bundleno = 307 (0x133), region = 48  ;;  %627 = vmatprep.subr.bf16.mxu0 (%p236_p6), %v730_v22  ;;  %v628_v23 = vpack.c.bf16 (%p236_p6), %v243_v20, %v242_v19  ;;  %651 = vmatprep.subr.bf16.mxu1 (%p236_p6), %v730_v22  ;;  %v245_v24 = vld [vmem:[%s857_s3 + $0x18] sm:$0xff] (%p236_p6)  ;;  %v246_v27 = vld [vmem:[%s857_s3 + $0x20] sm:$0xff] (%p236_p6)  ;;  %v247_v28 = vld [vmem:[%s857_s3 + $0x28] sm:$0xff] (%p236_p6) }
  0x2b   : > { %589 = vmatprep.mubr.msk.f32.mxu0 (%p236_p6), %vm731_vm0, %v732_v25  ;;  %624 = vmatprep.mubr.msk.f32.mxu1 (%p236_p6), %vm731_vm0, %v732_v25  ;;  %v631_v26 = vpack.c.bf16 (%p236_p6), %v245_v24, %v244_v21  ;;  %v634_v29 = vpack.c.bf16 (%p236_p6), %v247_v28, %v246_v27  ;;  %v248_v30 = vld [vmem:[%s857_s3 + $0x30] sm:$0xff] (%p236_p6)  ;;  %v249_v31 = vld [vmem:[%s857_s3 + $0x38] sm:$0xff] (%p236_p6)  ;;  %v250_v33 = vld [vmem:[%s857_s3 + $0x40] sm:$0xff] (%p236_p6) }
  0x2c   : > { %629 = vmatpush3.bf16.msra.mxu0 (%p236_p6), %v628_v23  ;;  %653 = vmatpush3.bf16.msra.mxu1 (%p236_p6), %v628_v23  ;;  %v637_v32 = vpack.c.bf16 (%p236_p6), %v249_v31, %v248_v30  ;;  %v251_v34 = vld [vmem:[%s857_s3 + $0x48] sm:$0xff] (%p236_p6)  ;;  %v252_v36 = vld [vmem:[%s857_s3 + $0x50] sm:$0xff] (%p236_p6)  ;;  %v253_v37 = vld [vmem:[%s857_s3 + $0x58] sm:$0xff] (%p236_p6) }
  0x2d   : > { %630 = vmatprep.subr.bf16.mxu0 (%p236_p6), %v730_v22  ;;  %654 = vmatprep.subr.bf16.mxu1 (%p236_p6), %v730_v22  ;;  %v640_v35 = vpack.c.bf16 (%p236_p6), %v251_v34, %v250_v33  ;;  %v643_v38 = vpack.c.bf16 (%p236_p6), %v253_v37, %v252_v36  ;;  %v254_v39 = vld [vmem:[%s857_s3 + $0x60] sm:$0xff] (%p236_p6)  ;;  %v255_v40 = vld [vmem:[%s857_s3 + $0x68] sm:$0xff] (%p236_p6)  ;;  %v256_v42 = vld [vmem:[%s857_s3 + $0x70] sm:$0xff] (%p236_p6) }
  0x2e   : > { %v646_v41 = vpack.c.bf16 (%p236_p6), %v255_v40, %v254_v39  ;;  %v257_v43 = vld [vmem:[%s857_s3 + $0x78] sm:$0xff] (%p236_p6)  ;;  %v241_v45 = vld [vmem:[#allocation2] sm:$0x1] (%p236_p6)  ;;  %v328_v46 = vld [vmem:[#allocation3] sm:$0x1] (%p236_p6) }
  0x2f   : > { %v649_v44 = vpack.c.bf16 (%p236_p6), %v257_v43, %v256_v42 }
  0x30   : > { %632 = vmatpush3.bf16.msra.mxu0 (%p236_p6), %v631_v26  ;;  %656 = vmatpush3.bf16.msra.mxu1 (%p236_p6), %v631_v26 }
  0x31   : > { %633 = vmatprep.subr.bf16.mxu0 %v730_v22  ;;  %657 = vmatprep.subr.bf16.mxu1 %v730_v22 }
  0x34   : > { %635 = vmatpush3.bf16.msra.mxu0 %v634_v29  ;;  %659 = vmatpush3.bf16.msra.mxu1 %v634_v29 }
  0x35   : > { %636 = vmatprep.subr.bf16.mxu0 %v730_v22  ;;  %660 = vmatprep.subr.bf16.mxu1 %v730_v22 }
  0x38   : > { %638 = vmatpush3.bf16.msra.mxu0 %v637_v32  ;;  %662 = vmatpush3.bf16.msra.mxu1 %v637_v32 }
  0x39   : > { %639 = vmatprep.subr.bf16.mxu0 %v730_v22  ;;  %663 = vmatprep.subr.bf16.mxu1 %v730_v22 }
  0x3c   : > { %641 = vmatpush3.bf16.msra.mxu0 %v640_v35  ;;  %665 = vmatpush3.bf16.msra.mxu1 %v640_v35 }
  0x3d   : > { %642 = vmatprep.subr.bf16.mxu0 %v730_v22  ;;  %666 = vmatprep.subr.bf16.mxu1 %v730_v22 }
  0x40   : > { %644 = vmatpush3.bf16.msra.mxu0 %v643_v38  ;;  %668 = vmatpush3.bf16.msra.mxu1 %v643_v38 }
  0x41   : > { %645 = vmatprep.subr.bf16.mxu0 %v730_v22  ;;  %669 = vmatprep.subr.bf16.mxu1 %v730_v22 }
  0x44   : > { %647 = vmatpush3.bf16.msra.mxu0 %v646_v41  ;;  %671 = vmatpush3.bf16.msra.mxu1 %v646_v41 }
  0x45   : > { %648 = vmatprep.subr.bf16.mxu0 %v730_v22  ;;  %672 = vmatprep.subr.bf16.mxu1 %v730_v22 }
  0x48   : > { %650 = vmatpush3.bf16.msra.mxu0 %v649_v44  ;;  %674 = vmatpush3.bf16.msra.mxu1 %v649_v44 }
  0x4b   : > { %590 = vmatmul.mubr.f32.vlgmr.msra.gmra.mrb[0].mxu0 %v241_v45  ;;  %625 = vmatmul.mubr.f32.vlgmr.msra.gmra.mrb[0].mxu1 %v328_v46 }
 0x11e   : > { %v324_v47 = vpop.f32.mrb[0].mxu0  ;;  %v395_v48 = vpop.f32.mrb[0].mxu1 }
 0x11f   : > { %v399_v49 = vmul.f32 0.03125, %v324_v47  ;;  %v591_v50 = vpop.f32.mrb[1].mxu0  ;;  %v400_v51 = vmul.f32 0.03125, %v395_v48  ;;  %v626_v52 = vpop.f32.mrb[1].mxu1 }
 0x121   : > { %v401_v53 = vmul.f32 %v399_v49, %v399_v49  ;;  %403 = vst [vmem:[#allocation2] sm:$0x1] %v399_v49 }
 0x123   : > { %v402_v54 = vsub.f32 %v400_v51, %v401_v53 }
 0x125   : > { %v404_v55 = vadd.f32 1e-05, %v402_v54 }
 0x127   : > { %703 = vrsqrt.f32 %v404_v55 }
 0x131   : > { %v704_v56 = vpop.eup %703 }
 0x132   : > { %406 = vst [vmem:[#allocation3] sm:$0x1] %v704_v56 }
 0x133 PF: > { %p513_p7 = scmp.ne.s32.totalorder %s719_s15, 1 }
 0x134   : > { %v410_v57 = vld [vmem:[%s854_s0] sm:$0xff] (!%p513_p7) }
 0x135   : > { %409 = sbr.rel (%p513_p7) target bundleno = 321 (0x141), region = 52  ;;  %v514_v58 = vld [vmem:[#allocation2] ss:$0 sm:$0xff] (!%p513_p7) }
 0x136   : > { %v418_v60 = vsub.f32 (!%p513_p7), %v410_v57, %v514_v58  ;;  %v516_v61 = vld [vmem:[%s855_s1] ss:$0 sm:$0xff] (!%p513_p7) }
 0x137   : > { %v517_v63 = vld [vmem:[%s856_s2] ss:$0 sm:$0xff] (!%p513_p7) }
 0x139   : > { %v515_v59 = vld [vmem:[#allocation3] ss:$0 sm:$0xff] (!%p513_p7) }
 0x13a   : > { %v426_v62 = vmul.f32 (!%p513_p7), %v515_v59, %v418_v60 }
 0x13c   : > { %v434_v0 = vmul.f32 %v516_v61, %v426_v62 }
 0x13e   : > { %v442_v1 = vadd.f32 %v517_v63, %v434_v0 }
 0x140   : > { %443 = vst [vmem:[%s858_s4] sm:$0xff] %v442_v1 }
 0x141 PF: > { %s14_s17 = sadd.s32 1, %s727_s17   ;;  %s859_s15 = smov %s723_s16 }
 0x142   : > { %p11_p8 = scmp.ge.s32.totalorder %s14_s17, 4   ;;  %s860_s16 = smov %s862_s18 }
 0x144   :  { %13 = sbr.rel (!%p11_p8) target bundleno = 2 (0x2), region = 82 }

// kernel: _lambda_.22
= control target key start
LH: loop header
LB: loop body
LE: loop exit
PB: predicated region body
PF: predicated region fallthrough
CT: control target
= control target key end

     0   :  { %vm50_vm0 = vcmask 261120   ;;  %s859_s0 = inlined_call_operand.vmem [shape: f32[32,32], index: 0, kind: input, shape index: {}]   ;;  %s860_s1 = inlined_call_operand.vmem [shape: f32[32,32], index: 1, kind: input, shape index: {}]   ;;  %s861_s2 = inlined_call_operand.vmem [shape: f32[1,1,32], index: 2, kind: input, shape index: {}]   ;;  %s862_s3 = inlined_call_operand.vmem [shape: f32[1,1,32], index: 3, kind: input, shape index: {}]   ;;  %s863_s4 = inlined_call_operand.vmem [shape: f32[1,32,32], index: 4, kind: input, shape index: {}]   ;;  %s864_s5 = inlined_call_operand.vmem [shape: f32[1,1,32], index: 5, kind: input, shape index: {}]   ;;  %s865_s6 = inlined_call_operand.vmem [shape: f32[1,32,32], index: 6, kind: input, shape index: {}]   ;;  %s866_s7 = inlined_call_operand.vmem [shape: f32[1,1,32], index: 7, kind: input, shape index: {}]   ;;  %s867_s8 = inlined_call_operand.vmem [shape: f32[1,32,32], index: 8, kind: input, shape index: {}]   ;;  %s868_s9 = inlined_call_operand.vmem [shape: f32[1,1,32], index: 9, kind: input, shape index: {}]   ;;  %s869_s10 = inlined_call_operand.vmem [shape: f32[32,32], index: 10, kind: output, shape index: {0}]   ;;  %s870_s11 = inlined_call_operand.hbm [shape: f32[32,32], index: 11, kind: output, shape index: {1}]  }
   0x1   :  { %v38_v0 = vld [vmem:[%s859_s0] sm:$0xff]  ;;  %v40_v2 = vld [vmem:[%s859_s0 + $0x10] sm:$0xff]  ;;  %v39_v5 = vld [vmem:[%s859_s0 + $0x8] sm:$0xff] }
   0x2   :  { %v42_v1 = vld [vmem:[%s860_s1] sm:$0xff]  ;;  %v44_v4 = vld [vmem:[%s860_s1 + $0x10] sm:$0xff]  ;;  %v43_v6 = vld [vmem:[%s860_s1 + $0x8] sm:$0xff] }
   0x3   :  { %v46_v3 = vadd.f32 %v42_v1, %v38_v0  ;;  %v48_v7 = vadd.f32 %v44_v4, %v40_v2  ;;  %v47_v8 = vadd.f32 %v43_v6, %v39_v5  ;;  %v41_v9 = vld [vmem:[%s859_s0 + $0x18] sm:$0xff] }
   0x4   :  { %v45_v10 = vld [vmem:[%s860_s1 + $0x18] sm:$0xff] }
   0x5   :  { %17 = vsyncpa [#allocation3], 0  ;;  %v51_v11 = vsel %vm50_vm0, %v46_v3, 0.0  ;;  %474 = vst.msk [vmem:[#allocation2] sm:$0xff] %vm50_vm0, %v46_v3  ;;  %v49_v12 = vadd.f32 %v45_v10, %v41_v9  ;;  %v57_v13 = vsel %vm50_vm0, %v48_v7, 0.0  ;;  %v54_v14 = vsel %vm50_vm0, %v47_v8, 0.0 }
   0x6   :  { %52 = vadd.xlane.f32.xlu0 %v51_v11  ;;  %476 = vst.msk [vmem:[#allocation2 + $0x10] sm:$0xff] %vm50_vm0, %v48_v7  ;;  %475 = vst.msk [vmem:[#allocation2 + $0x8] sm:$0xff] %vm50_vm0, %v47_v8  ;;  %58 = vadd.xlane.f32.xlu1 %v57_v13  ;;  %v126_v36 = vld [vmem:[%s863_s4] sm:$0xff]  ;;  %v127_v37 = vld [vmem:[%s863_s4 + $0x8] sm:$0xff] }
   0x7   :  { %477 = vst.msk [vmem:[#allocation2 + $0x18] sm:$0xff] %vm50_vm0, %v49_v12  ;;  %v60_v15 = vsel %vm50_vm0, %v49_v12, 0.0  ;;  %v234_v38 = vld [vmem:[%s865_s6] sm:$0xff]  ;;  %v585_v39 = vpack.c.bf16 %v127_v37, %v126_v36  ;;  %v235_v40 = vld [vmem:[%s865_s6 + $0x8] sm:$0xff]  ;;  %v128_v41 = vld [vmem:[%s863_s4 + $0x10] sm:$0xff] }
   0x8   :  { %v129_v42 = vld [vmem:[%s863_s4 + $0x18] sm:$0xff]  ;;  %v593_v43 = vpack.c.bf16 %v235_v40, %v234_v38  ;;  %v236_v45 = vld [vmem:[%s865_s6 + $0x10] sm:$0xff]  ;;  %v498_v61 = vld [vmem:[%s861_s2] ss:$0 sm:$0xff] }
   0x9   :  { %v589_v44 = vpack.c.bf16 %v129_v42, %v128_v41  ;;  %586 = vmatprep.subr.bf16.mxu0 %v585_v39  ;;  %v237_v46 = vld [vmem:[%s865_s6 + $0x18] sm:$0xff]  ;;  %v499_v63 = vld [vmem:[%s862_s3] ss:$0 sm:$0xff] }
   0xa   :  { %55 = vadd.xlane.f32.xlu0 %v54_v14  ;;  %61 = vadd.xlane.f32.xlu1 %v60_v15  ;;  %v597_v47 = vpack.c.bf16 %v237_v46, %v236_v45  ;;  %v362_v14 = vld [vmem:[%s867_s8] sm:$0xff]  ;;  %v363_v15 = vld [vmem:[%s867_s8 + $0x8] sm:$0xff] }
   0xb   :  { %594 = vmatprep.subr.bf16.mxu1 %v593_v43  ;;  %588 = vmatpush3.bf16.msra.mxu0 %v585_v39  ;;  %v500_v45 = vld [vmem:[%s864_s5] ss:$0 sm:$0xff]  ;;  %s664_s5 = smov [#allocation2]  }
   0xc   :  { %596 = vmatpush3.bf16.msra.mxu1 %v593_v43  ;;  %590 = vmatprep.subr.bf16.mxu0 %v589_v44  ;;  %s485_s17 = sshll.u32 %s664_s5, 4  ;;  %s486_s17 = int_to_ptr.vmem [resolvable:$true] %s485_s17 }
   0xd   :  { %598 = vmatprep.subr.bf16.mxu1 %v597_v47  ;;  %s640_s18 = scalar_lea.vmem %s486_s17, 512  ;;  %p645_p1 = scmp.lt.s32.totalorder %s486_s17, %s486_s17 }
   0xe   :  { %p641_p0 = scmp.ne.s32.totalorder %s486_s17, %s640_s18  ;;  %p646_p2 = scmp.lt.s32.totalorder %s640_s18, %s640_s18 }
   0xf   :  { %592 = vmatpush3.bf16.msra.mxu0 %v589_v44 }
  0x10   :  { %600 = vmatpush3.bf16.msra.mxu1 %v597_v47  ;;  %p647_p3 = por %p646_p2, %p645_p1 }
  0x12   :  { %p648_p4 = pnand %p647_p3, %p641_p0 }
  0x93   :  { %v53_v16 = vpop.xlane.xlu0 %52  ;;  %v59_v18 = vpop.xlane.xlu1 %58 }
  0x94   :  { %v64_v17 = vmul.f32 0.03125, %v53_v16  ;;  %v66_v19 = vmul.f32 0.03125, %v59_v18  ;;  %v601_v16 = vpack.c.bf16 %v363_v15, %v362_v14  ;;  %v365_v18 = vld [vmem:[%s867_s8 + $0x18] sm:$0xff] }
  0x96   :  { %v68_v20 = vsub.f32 %v46_v3, %v64_v17  ;;  %v759_v21 = vsub.f32 %v48_v7, %v66_v19  ;;  %602 = vmatprep.subr.bf16.mxu0 %v601_v16  ;;  %609 = vmatprep.subr.bf16.mxu1 %v601_v16  ;;  %v364_v17 = vld [vmem:[%s867_s8 + $0x10] sm:$0xff] }
  0x97   :  { %v56_v22 = vpop.xlane.xlu0 %55  ;;  %v62_v24 = vpop.xlane.xlu1 %61  ;;  %v605_v19 = vpack.c.bf16 %v365_v18, %v364_v17 }
  0x98   :  { %v65_v23 = vmul.f32 0.03125, %v56_v22  ;;  %v72_v25 = vmul.f32 %v68_v20, %v68_v20  ;;  %v67_v26 = vmul.f32 0.03125, %v62_v24  ;;  %v74_v27 = vmul.f32 %v759_v21, %v759_v21 }
  0x9a   :  { %v69_v28 = vsub.f32 %v47_v8, %v65_v23  ;;  %v76_v29 = vsel %vm50_vm0, %v72_v25, 0.0  ;;  %v71_v30 = vsub.f32 %v49_v12, %v67_v26  ;;  %v82_v31 = vsel %vm50_vm0, %v74_v27, 0.0 }
  0x9b   :  { %77 = vadd.xlane.f32.xlu0 %v76_v29 }
  0x9c   :  { %v73_v32 = vmul.f32 %v69_v28, %v69_v28  ;;  %v75_v33 = vmul.f32 %v71_v30, %v71_v30 }
  0x9e   :  { %v79_v34 = vsel %vm50_vm0, %v73_v32, 0.0  ;;  %v85_v35 = vsel %vm50_vm0, %v75_v33, 0.0 }
  0x9f   :  { %83 = vadd.xlane.f32.xlu0 %v82_v31  ;;  %80 = vadd.xlane.f32.xlu1 %v79_v34 }
  0xa3   :  { %86 = vadd.xlane.f32.xlu1 %v85_v35 }
 0x128   :  { %v78_v48 = vpop.xlane.xlu0 %77 }
 0x129   :  { %v88_v49 = vmul.f32 0.03125, %v78_v48 }
 0x12b   :  { %v92_v50 = vadd.f32 1e-05, %v88_v49 }
 0x12c   :  { %v81_v51 = vpop.xlane.xlu1 %80  ;;  %v84_v52 = vpop.xlane.xlu0 %83 }
 0x12d   :  { %616 = vrsqrt.f32 %v92_v50  ;;  %v89_v53 = vmul.f32 0.03125, %v81_v51  ;;  %v90_v54 = vmul.f32 0.03125, %v84_v52 }
 0x12f   :  { %v93_v55 = vadd.f32 1e-05, %v89_v53  ;;  %v94_v56 = vadd.f32 1e-05, %v90_v54 }
 0x130   :  { %v87_v57 = vpop.xlane.xlu1 %86 }
 0x131   :  { %618 = vrsqrt.f32 %v93_v55  ;;  %v91_v58 = vmul.f32 0.03125, %v87_v57 }
 0x132   :  { %620 = vrsqrt.f32 %v94_v56 }
 0x133   :  { %v95_v59 = vadd.f32 1e-05, %v91_v58 }
 0x135   :  { %622 = vrsqrt.f32 %v95_v59 }
 0x137   :  { %v617_v60 = vpop.eup %616 }
 0x138   :  { %v100_v62 = vmul.f32 %v617_v60, %v68_v20  ;;  %v505_v20 = vld [vmem:[%s866_s7] ss:$0 sm:$0xff] }
 0x13a   :  { %v111_v0 = vmul.f32 %v498_v61, %v100_v62 }
 0x13b   :  { %v619_v1 = vpop.eup %618 }
 0x13c   :  { %v621_v2 = vpop.eup %620  ;;  %v122_v3 = vadd.f32 %v499_v63, %v111_v0  ;;  %v101_v4 = vmul.f32 %v619_v1, %v69_v28 }
 0x13d   :  { %v102_v5 = vmul.f32 %v621_v2, %v759_v21 }
 0x13e   :  { %551 = vmatprep.mubr.msk.f32.mxu0 %vm50_vm0, %v122_v3  ;;  %565 = vmatprep.mubr.msk.f32.mxu1 %vm50_vm0, %v122_v3  ;;  %v112_v6 = vmul.f32 %v498_v61, %v101_v4 }
 0x13f   :  { %v623_v7 = vpop.eup %622  ;;  %v113_v8 = vmul.f32 %v498_v61, %v102_v5 }
 0x140   :  { %v123_v9 = vadd.f32 %v499_v63, %v112_v6  ;;  %v103_v10 = vmul.f32 %v623_v7, %v71_v30 }
 0x141   :  { %v124_v11 = vadd.f32 %v499_v63, %v113_v8 }
 0x142   :  { %552 = vmatmul.mubr.msk.f32.vlgmr.msra.gmra.mrb[0].mxu0 %vm50_vm0, %v123_v9  ;;  %566 = vmatmul.mubr.msk.f32.vlgmr.msra.gmra.mrb[0].mxu1 %vm50_vm0, %v123_v9  ;;  %v114_v12 = vmul.f32 %v498_v61, %v103_v10 }
 0x143   :  { %554 = vmatprep.mubr.msk.f32.mxu0 %vm50_vm0, %v124_v11  ;;  %568 = vmatprep.mubr.msk.f32.mxu1 %vm50_vm0, %v124_v11 }
 0x144   :  { %v125_v13 = vadd.f32 %v499_v63, %v114_v12  ;;  %604 = vmatpush3.bf16.msra.mxu0 %v601_v16  ;;  %611 = vmatpush3.bf16.msra.mxu1 %v601_v16 }
 0x145   :  { %606 = vmatprep.subr.bf16.mxu0 %v605_v19  ;;  %610 = vmatprep.subr.bf16.mxu1 %v605_v19 }
 0x146   :  { %555 = vmatmul.mubr.msk.f32.gmra.mrb[2].mxu0 %vm50_vm0, %v125_v13  ;;  %569 = vmatmul.mubr.msk.f32.gmra.mrb[2].mxu1 %vm50_vm0, %v125_v13 }
 0x148   :  { %608 = vmatpush3.bf16.msra.mxu0 %v605_v19  ;;  %612 = vmatpush3.bf16.msra.mxu1 %v605_v19 }
 0x215   :  { %v553_v21 = vpop.f32.mrb[0].mxu0  ;;  %v567_v22 = vpop.f32.mrb[0].mxu1 }
 0x216   :  { %v317_v23 = vadd.f32 %v567_v22, %v505_v20  ;;  %v215_v24 = vpop.f32.mrb[1].mxu0  ;;  %v311_v25 = vpop.f32.mrb[1].mxu1  ;;  %v221_v48 = vadd.f32 %v553_v21, %v500_v45 }
 0x217   :  { %v312_v26 = vadd.f32 %v505_v20, %v311_v25  ;;  %v216_v50 = vadd.f32 %v500_v45, %v215_v24 }
 0x218   :  { %v511_v27 = vmul.f32 -1.442695, %v317_v23 }
 0x219   :  { %v510_v28 = vmul.f32 -1.442695, %v312_v26  ;;  %v556_v29 = vpop.f32.mrb[2].mxu0  ;;  %v570_v30 = vpop.f32.mrb[2].mxu1 }
 0x21a   :  { %624 = vpow2.f32 %v511_v27  ;;  %v327_v31 = vadd.f32 %v570_v30, %v505_v20  ;;  %v225_v32 = vpop.f32.mrb[3].mxu0  ;;  %v321_v33 = vpop.f32.mrb[3].mxu1  ;;  %v231_v56 = vadd.f32 %v556_v29, %v500_v45 }
 0x21b   :  { %626 = vpow2.f32 %v510_v28  ;;  %v322_v34 = vadd.f32 %v505_v20, %v321_v33  ;;  %v226_v58 = vadd.f32 %v500_v45, %v225_v32 }
 0x21c   :  { %v513_v35 = vmul.f32 -1.442695, %v327_v31 }
 0x21d   :  { %v512_v36 = vmul.f32 -1.442695, %v322_v34 }
 0x21e   :  { %628 = vpow2.f32 %v513_v35 }
 0x21f   :  { %630 = vpow2.f32 %v512_v36 }
 0x224   :  { %v625_v37 = vpop.eup %624 }
 0x225   :  { %v627_v38 = vpop.eup %626  ;;  %v343_v39 = vadd.f32 1.0, %v625_v37 }
 0x226   :  { %v342_v40 = vadd.f32 1.0, %v627_v38 }
 0x227   :  { %632 = vrcp.f32 %v343_v39 }
 0x228   :  { %v629_v41 = vpop.eup %628  ;;  %634 = vrcp.f32 %v342_v40 }
 0x229   :  { %v631_v42 = vpop.eup %630  ;;  %v345_v43 = vadd.f32 1.0, %v629_v41 }
 0x22a   :  { %v344_v44 = vadd.f32 1.0, %v631_v42 }
 0x22b   :  { %636 = vrcp.f32 %v345_v43 }
 0x22c   :  { %638 = vrcp.f32 %v344_v44 }
 0x231   :  { %v633_v46 = vpop.eup %632 }
 0x232   :  { %v635_v47 = vpop.eup %634  ;;  %v355_v49 = vmul.f32 %v633_v46, %v317_v23 }
 0x233   :  { %v354_v51 = vmul.f32 %v635_v47, %v312_v26 }
 0x234   :  { %v359_v52 = vmul.f32 %v355_v49, %v221_v48 }
 0x235   :  { %v637_v53 = vpop.eup %636  ;;  %v358_v54 = vmul.f32 %v354_v51, %v216_v50 }
 0x236   :  { %v639_v55 = vpop.eup %638  ;;  %v357_v57 = vmul.f32 %v637_v53, %v327_v31 }
 0x237   :  { %v356_v59 = vmul.f32 %v639_v55, %v322_v34  ;;  %579 = vmatprep.mubr.msk.f32.mxu0 %vm50_vm0, %v358_v54 }
 0x238   :  { %v361_v60 = vmul.f32 %v357_v57, %v231_v56  ;;  %580 = vmatmul.mubr.msk.f32.vlgmr.msra.gmra.mrb[4].mxu0 %vm50_vm0, %v359_v52 }
 0x239   :  { %v360_v61 = vmul.f32 %v356_v59, %v226_v58 }
 0x23b   :  { %582 = vmatprep.mubr.msk.f32.mxu1 %vm50_vm0, %v360_v61 }
 0x23c   :  { %583 = vmatmul.mubr.msk.f32.vlgmr.msra.gmra.mrb[4].mxu1 %vm50_vm0, %v361_v60 }
 0x23d   :  { %651 = shalt.err (!%p648_p4)
}
 0x23e   :  { %s652_s21 = scalar_lea.hbm %s870_s11, 512 }
 0x23f   :  { %p653_p5 = scmp.ne.s32.totalorder %s870_s11, %s652_s21  ;;  %p656_p6 = scmp.lt.u32.totalorder %s652_s21, %s870_s11 }
 0x241   :  { %p658_p7 = pnand %p656_p6, %p653_p5 }
 0x243   :  { %661 = shalt.err (!%p658_p7)
}
 0x244   :  { %s665_s26 = smov 128   ;;  %s666_s27 = smov 8   ;;  %v514_v62 = vld [vmem:[%s868_s9] ss:$0 sm:$0xff] }
 0x245   :  { %491 = dma.vmem_to_hbm [thread:$0]  %s486_s17, 512, %s870_s11, [#allocation3], %s665_s26, %s665_s26, %s666_s27  }
 0x30b   :  { %v581_v63 = vpop.f32.mrb[4].mxu0 }
 0x30c   :  { %v457_v0 = vadd.f32 %v581_v63, %v514_v62  ;;  %v451_v1 = vpop.f32.mrb[5].mxu0 }
 0x30d   :  { %v452_v2 = vadd.f32 %v514_v62, %v451_v1 }
 0x30e   :  { %471 = vst.msk [vmem:[%s869_s10 + $0x8] sm:$0xff] %vm50_vm0, %v457_v0 }
 0x30f   :  { %470 = vst.msk [vmem:[%s869_s10] sm:$0xff] %vm50_vm0, %v452_v2  ;;  %v584_v3 = vpop.f32.mrb[4].mxu1 }
 0x310   :  { %v467_v4 = vadd.f32 %v584_v3, %v514_v62  ;;  %v461_v5 = vpop.f32.mrb[5].mxu1 }
 0x311   :  { %v462_v6 = vadd.f32 %v514_v62, %v461_v5 }
 0x312   :  { %473 = vst.msk [vmem:[%s869_s10 + $0x18] sm:$0xff] %vm50_vm0, %v467_v4 }
 0x313   :  { %472 = vst.msk [vmem:[%s869_s10 + $0x10] sm:$0xff] %vm50_vm0, %v462_v6 }
 0x314   :  { %662 = dma.done.wait [#allocation3], 512  }
 0x315   :  { %663 = vsyncadd [#allocation3], 4294966784 }
 0x316   :  { %497 = vsyncpa [#allocation3], 1 }

// kernel: _lambda_.17
= control target key start
LH: loop header
LB: loop body
LE: loop exit
PB: predicated region body
PF: predicated region fallthrough
CT: control target
= control target key end

     0   :  { %vm333_vm0 = vcmask 261120   ;;  %s873_s1 = inlined_call_operand.vmem [shape: f32[768,32], index: 1, kind: input, shape index: {}]   ;;  %s874_s0 = inlined_call_operand.vmem [shape: f32[8,768], index: 0, kind: input, shape index: {}]   ;;  %s875_s2 = inlined_call_operand.vmem [shape: f32[1,32], index: 2, kind: input, shape index: {}]   ;;  %s876_s3 = inlined_call_operand.vmem [shape: f32[8,32], index: 3, kind: output, shape index: {}]  }
   0x1   :  { %v36_v0 = vld [vmem:[%s873_s1 + $0x80] sm:$0xff]  ;;  %v37_v1 = vld [vmem:[%s873_s1 + $0x88] sm:$0xff]  ;;  %v38_v11 = vld [vmem:[%s873_s1 + $0x90] sm:$0xff] }
   0x2   :  { %v20_v2 = vld [vmem:[%s873_s1] sm:$0xff]  ;;  %v445_v3 = vpack.c.bf16 %v37_v1, %v36_v0  ;;  %v21_v4 = vld [vmem:[%s873_s1 + $0x8] sm:$0xff]  ;;  %v39_v13 = vld [vmem:[%s873_s1 + $0x98] sm:$0xff] }
   0x3   :  { %v68_v5 = vld [vmem:[%s873_s1 + $0x180] sm:$0xff]  ;;  %v69_v6 = vld [vmem:[%s873_s1 + $0x188] sm:$0xff]  ;;  %v447_v7 = vpack.c.bf16 %v21_v4, %v20_v2  ;;  %v22_v14 = vld [vmem:[%s873_s1 + $0x10] sm:$0xff]  ;;  %v449_v16 = vpack.c.bf16 %v39_v13, %v38_v11 }
   0x4   :  { %v477_v8 = vpack.c.bf16 %v69_v6, %v68_v5  ;;  %v52_v9 = vld [vmem:[%s873_s1 + $0x100] sm:$0xff]  ;;  %v53_v10 = vld [vmem:[%s873_s1 + $0x108] sm:$0xff]  ;;  %446 = vmatprep.subr.bf16.mxu0 %v445_v3  ;;  %v23_v15 = vld [vmem:[%s873_s1 + $0x18] sm:$0xff] }
   0x5   :  { %v479_v12 = vpack.c.bf16 %v53_v10, %v52_v9  ;;  %448 = vmatpush3.bf16.msra.mxu0 %v447_v7  ;;  %v451_v17 = vpack.c.bf16 %v23_v15, %v22_v14  ;;  %v70_v18 = vld [vmem:[%s873_s1 + $0x190] sm:$0xff]  ;;  %v71_v19 = vld [vmem:[%s873_s1 + $0x198] sm:$0xff]  ;;  %v40_v23 = vld [vmem:[%s873_s1 + $0xa0] sm:$0xff] }
   0x6   :  { %478 = vmatprep.subr.bf16.mxu1 %v477_v8  ;;  %v54_v20 = vld [vmem:[%s873_s1 + $0x110] sm:$0xff]  ;;  %v481_v21 = vpack.c.bf16 %v71_v19, %v70_v18  ;;  %v55_v22 = vld [vmem:[%s873_s1 + $0x118] sm:$0xff]  ;;  %v41_v24 = vld [vmem:[%s873_s1 + $0xa8] sm:$0xff]  ;;  %450 = vmatprep.subr.bf16.mxu0 %v449_v16 }
   0x7   :  { %480 = vmatpush3.bf16.msra.mxu1 %v479_v12  ;;  %v483_v25 = vpack.c.bf16 %v55_v22, %v54_v20  ;;  %v453_v26 = vpack.c.bf16 %v41_v24, %v40_v23  ;;  %v24_v27 = vld [vmem:[%s873_s1 + $0x20] sm:$0xff]  ;;  %v25_v28 = vld [vmem:[%s873_s1 + $0x28] sm:$0xff]  ;;  %v42_v35 = vld [vmem:[%s873_s1 + $0xb0] sm:$0xff] }
   0x8   :  { %v72_v29 = vld [vmem:[%s873_s1 + $0x1a0] sm:$0xff]  ;;  %482 = vmatprep.subr.bf16.mxu1 %v481_v21  ;;  %v73_v30 = vld [vmem:[%s873_s1 + $0x1a8] sm:$0xff]  ;;  %v455_v33 = vpack.c.bf16 %v25_v28, %v24_v27  ;;  %v43_v36 = vld [vmem:[%s873_s1 + $0xb8] sm:$0xff] }
   0x9   :  { %v56_v31 = vld [vmem:[%s873_s1 + $0x120] sm:$0xff]  ;;  %v57_v32 = vld [vmem:[%s873_s1 + $0x128] sm:$0xff]  ;;  %452 = vmatpush3.bf16.msra.mxu0 %v451_v17  ;;  %v485_v34 = vpack.c.bf16 %v73_v30, %v72_v29  ;;  %v26_v37 = vld [vmem:[%s873_s1 + $0x30] sm:$0xff]  ;;  %v457_v39 = vpack.c.bf16 %v43_v36, %v42_v35 }
   0xa   :  { %454 = vmatprep.subr.bf16.mxu0 %v453_v26  ;;  %v487_v38 = vpack.c.bf16 %v57_v32, %v56_v31  ;;  %v27_v40 = vld [vmem:[%s873_s1 + $0x38] sm:$0xff]  ;;  %v74_v41 = vld [vmem:[%s873_s1 + $0x1b0] sm:$0xff]  ;;  %v44_v46 = vld [vmem:[%s873_s1 + $0xc0] sm:$0xff] }
   0xb   :  { %484 = vmatpush3.bf16.msra.mxu1 %v483_v25  ;;  %v75_v42 = vld [vmem:[%s873_s1 + $0x1b8] sm:$0xff]  ;;  %v58_v44 = vld [vmem:[%s873_s1 + $0x130] sm:$0xff]  ;;  %v45_v47 = vld [vmem:[%s873_s1 + $0xc8] sm:$0xff]  ;;  %v459_v48 = vpack.c.bf16 %v27_v40, %v26_v37 }
   0xc   :  { %486 = vmatprep.subr.bf16.mxu1 %v485_v34  ;;  %v489_v43 = vpack.c.bf16 %v75_v42, %v74_v41  ;;  %v59_v45 = vld [vmem:[%s873_s1 + $0x138] sm:$0xff]  ;;  %v76_v49 = vld [vmem:[%s873_s1 + $0x1c0] sm:$0xff]  ;;  %v77_v50 = vld [vmem:[%s873_s1 + $0x1c8] sm:$0xff]  ;;  %v461_v52 = vpack.c.bf16 %v45_v47, %v44_v46 }
   0xd   :  { %456 = vmatpush3.bf16.msra.mxu0 %v455_v33  ;;  %v491_v51 = vpack.c.bf16 %v59_v45, %v58_v44  ;;  %v28_v53 = vld [vmem:[%s873_s1 + $0x40] sm:$0xff]  ;;  %v29_v54 = vld [vmem:[%s873_s1 + $0x48] sm:$0xff]  ;;  %v493_v56 = vpack.c.bf16 %v77_v50, %v76_v49  ;;  %v46_v58 = vld [vmem:[%s873_s1 + $0xd0] sm:$0xff] }
   0xe   :  { %458 = vmatprep.subr.bf16.mxu0 %v457_v39  ;;  %v60_v55 = vld [vmem:[%s873_s1 + $0x140] sm:$0xff]  ;;  %v61_v57 = vld [vmem:[%s873_s1 + $0x148] sm:$0xff]  ;;  %v47_v59 = vld [vmem:[%s873_s1 + $0xd8] sm:$0xff]  ;;  %v463_v62 = vpack.c.bf16 %v29_v54, %v28_v53 }
   0xf   :  { %488 = vmatpush3.bf16.msra.mxu1 %v487_v38  ;;  %v78_v60 = vld [vmem:[%s873_s1 + $0x1d0] sm:$0xff]  ;;  %v79_v61 = vld [vmem:[%s873_s1 + $0x1d8] sm:$0xff]  ;;  %v495_v63 = vpack.c.bf16 %v61_v57, %v60_v55  ;;  %v465_v0 = vpack.c.bf16 %v47_v59, %v46_v58  ;;  %v48_v6 = vld [vmem:[%s873_s1 + $0xe0] sm:$0xff] }
  0x10   :  { %490 = vmatprep.subr.bf16.mxu1 %v489_v43  ;;  %v30_v1 = vld [vmem:[%s873_s1 + $0x50] sm:$0xff]  ;;  %v31_v2 = vld [vmem:[%s873_s1 + $0x58] sm:$0xff]  ;;  %v497_v4 = vpack.c.bf16 %v79_v61, %v78_v60  ;;  %v49_v7 = vld [vmem:[%s873_s1 + $0xe8] sm:$0xff] }
  0x11   :  { %460 = vmatpush3.bf16.msra.mxu0 %v459_v48  ;;  %v62_v3 = vld [vmem:[%s873_s1 + $0x150] sm:$0xff]  ;;  %v63_v5 = vld [vmem:[%s873_s1 + $0x158] sm:$0xff]  ;;  %v80_v8 = vld [vmem:[%s873_s1 + $0x1e0] sm:$0xff]  ;;  %v467_v10 = vpack.c.bf16 %v31_v2, %v30_v1  ;;  %v469_v14 = vpack.c.bf16 %v49_v7, %v48_v6 }
  0x12   :  { %462 = vmatprep.subr.bf16.mxu0 %v461_v52  ;;  %v81_v9 = vld [vmem:[%s873_s1 + $0x1e8] sm:$0xff]  ;;  %v32_v11 = vld [vmem:[%s873_s1 + $0x60] sm:$0xff]  ;;  %v499_v13 = vpack.c.bf16 %v63_v5, %v62_v3  ;;  %v50_v19 = vld [vmem:[%s873_s1 + $0xf0] sm:$0xff] }
  0x13   :  { %492 = vmatpush3.bf16.msra.mxu1 %v491_v51  ;;  %v15_v12 = vld [vmem:[%s874_s0 + $0x8] sm:$0xff]  ;;  %v64_v16 = vld [vmem:[%s873_s1 + $0x160] sm:$0xff]  ;;  %v501_v18 = vpack.c.bf16 %v81_v9, %v80_v8  ;;  %v51_v20 = vld [vmem:[%s873_s1 + $0xf8] sm:$0xff] }
  0x14   :  { %494 = vmatprep.subr.bf16.mxu1 %v493_v56  ;;  %v33_v15 = vld [vmem:[%s873_s1 + $0x68] sm:$0xff]  ;;  %187 = vmatprep.mubr.f32.mxu0 %v15_v12  ;;  %v17_v21 = vld [vmem:[%s874_s0 + $0x18] sm:$0xff]  ;;  %v82_v22 = vld [vmem:[%s873_s1 + $0x1f0] sm:$0xff]  ;;  %v473_v26 = vpack.c.bf16 %v51_v20, %v50_v19 }
  0x15   :  { %464 = vmatpush3.bf16.msra.mxu0 %v463_v62  ;;  %v65_v17 = vld [vmem:[%s873_s1 + $0x168] sm:$0xff]  ;;  %v83_v23 = vld [vmem:[%s873_s1 + $0x1f8] sm:$0xff]  ;;  %257 = vmatprep.mubr.f32.mxu1 %v17_v21  ;;  %v471_v24 = vpack.c.bf16 %v33_v15, %v32_v11  ;;  %v34_v27 = vld [vmem:[%s873_s1 + $0x70] sm:$0xff] }
  0x16   :  { %466 = vmatprep.subr.bf16.mxu0 %v465_v0  ;;  %v503_v25 = vpack.c.bf16 %v65_v17, %v64_v16  ;;  %v35_v28 = vld [vmem:[%s873_s1 + $0x78] sm:$0xff]  ;;  %v66_v29 = vld [vmem:[%s873_s1 + $0x170] sm:$0xff]  ;;  %v505_v30 = vpack.c.bf16 %v83_v23, %v82_v22  ;;  %v100_v32 = vld [vmem:[%s873_s1 + $0x280] sm:$0xff] }
  0x17   :  { %496 = vmatpush3.bf16.msra.mxu1 %v495_v63  ;;  %v67_v31 = vld [vmem:[%s873_s1 + $0x178] sm:$0xff]  ;;  %v101_v33 = vld [vmem:[%s873_s1 + $0x288] sm:$0xff]  ;;  %v475_v34 = vpack.c.bf16 %v35_v28, %v34_v27  ;;  %v84_v37 = vld [vmem:[%s873_s1 + $0x200] sm:$0xff] }
  0x18   :  { %498 = vmatprep.subr.bf16.mxu1 %v497_v4  ;;  %v507_v35 = vpack.c.bf16 %v67_v31, %v66_v29  ;;  %v509_v36 = vpack.c.bf16 %v101_v33, %v100_v32  ;;  %v85_v38 = vld [vmem:[%s873_s1 + $0x208] sm:$0xff]  ;;  %v102_v39 = vld [vmem:[%s873_s1 + $0x290] sm:$0xff]  ;;  %v103_v40 = vld [vmem:[%s873_s1 + $0x298] sm:$0xff] }
  0x19   :  { %468 = vmatpush3.bf16.msra.mxu0 %v467_v10  ;;  %v14_v41 = vld [vmem:[%s874_s0] sm:$0xff]  ;;  %v511_v42 = vpack.c.bf16 %v85_v38, %v84_v37  ;;  %v16_v43 = vld [vmem:[%s874_s0 + $0x10] sm:$0xff]  ;;  %v513_v44 = vpack.c.bf16 %v103_v40, %v102_v39  ;;  %v87_v46 = vld [vmem:[%s873_s1 + $0x218] sm:$0xff] }
  0x1a   :  { %470 = vmatprep.subr.bf16.mxu0 %v469_v14  ;;  %v86_v45 = vld [vmem:[%s873_s1 + $0x210] sm:$0xff]  ;;  %v104_v47 = vld [vmem:[%s873_s1 + $0x2a0] sm:$0xff]  ;;  %v105_v48 = vld [vmem:[%s873_s1 + $0x2a8] sm:$0xff] }
  0x1b   :  { %500 = vmatpush3.bf16.msra.mxu1 %v499_v13  ;;  %v19_v49 = vld [vmem:[%s874_s0 + $0x28] sm:$0xff]  ;;  %v515_v50 = vpack.c.bf16 %v87_v46, %v86_v45  ;;  %v517_v51 = vpack.c.bf16 %v105_v48, %v104_v47  ;;  %v88_v52 = vld [vmem:[%s873_s1 + $0x220] sm:$0xff]  ;;  %v106_v54 = vld [vmem:[%s873_s1 + $0x2b0] sm:$0xff] }
  0x1c   :  { %502 = vmatprep.subr.bf16.mxu1 %v501_v18  ;;  %v89_v53 = vld [vmem:[%s873_s1 + $0x228] sm:$0xff]  ;;  %v107_v55 = vld [vmem:[%s873_s1 + $0x2b8] sm:$0xff]  ;;  %v90_v58 = vld [vmem:[%s873_s1 + $0x230] sm:$0xff] }
  0x1d   :  { %472 = vmatpush3.bf16.msra.mxu0 %v471_v24  ;;  %v519_v56 = vpack.c.bf16 %v89_v53, %v88_v52  ;;  %v521_v57 = vpack.c.bf16 %v107_v55, %v106_v54  ;;  %v91_v59 = vld [vmem:[%s873_s1 + $0x238] sm:$0xff]  ;;  %v108_v60 = vld [vmem:[%s873_s1 + $0x2c0] sm:$0xff]  ;;  %v109_v61 = vld [vmem:[%s873_s1 + $0x2c8] sm:$0xff] }
  0x1e   :  { %474 = vmatprep.subr.bf16.mxu0 %v473_v26  ;;  %v523_v62 = vpack.c.bf16 %v91_v59, %v90_v58  ;;  %v525_v63 = vpack.c.bf16 %v109_v61, %v108_v60  ;;  %v92_v0 = vld [vmem:[%s873_s1 + $0x240] sm:$0xff]  ;;  %v93_v1 = vld [vmem:[%s873_s1 + $0x248] sm:$0xff]  ;;  %v110_v2 = vld [vmem:[%s873_s1 + $0x2d0] sm:$0xff] }
  0x1f   :  { %504 = vmatpush3.bf16.msra.mxu1 %v503_v25  ;;  %v111_v3 = vld [vmem:[%s873_s1 + $0x2d8] sm:$0xff]  ;;  %v527_v4 = vpack.c.bf16 %v93_v1, %v92_v0  ;;  %v94_v6 = vld [vmem:[%s873_s1 + $0x250] sm:$0xff]  ;;  %v112_v8 = vld [vmem:[%s873_s1 + $0x2e0] sm:$0xff] }
  0x20   :  { %506 = vmatprep.subr.bf16.mxu1 %v505_v30  ;;  %v529_v5 = vpack.c.bf16 %v111_v3, %v110_v2  ;;  %v95_v7 = vld [vmem:[%s873_s1 + $0x258] sm:$0xff]  ;;  %v113_v9 = vld [vmem:[%s873_s1 + $0x2e8] sm:$0xff]  ;;  %v96_v12 = vld [vmem:[%s873_s1 + $0x260] sm:$0xff] }
  0x21   :  { %476 = vmatpush3.bf16.msra.mxu0 %v475_v34  ;;  %v531_v10 = vpack.c.bf16 %v95_v7, %v94_v6  ;;  %v533_v11 = vpack.c.bf16 %v113_v9, %v112_v8  ;;  %v97_v13 = vld [vmem:[%s873_s1 + $0x268] sm:$0xff]  ;;  %v114_v14 = vld [vmem:[%s873_s1 + $0x2f0] sm:$0xff]  ;;  %v115_v15 = vld [vmem:[%s873_s1 + $0x2f8] sm:$0xff] }
  0x22   :  { %510 = vmatprep.subr.bf16.mxu0 %v509_v36  ;;  %v535_v16 = vpack.c.bf16 %v97_v13, %v96_v12  ;;  %v537_v17 = vpack.c.bf16 %v115_v15, %v114_v14  ;;  %v98_v18 = vld [vmem:[%s873_s1 + $0x270] sm:$0xff]  ;;  %v99_v19 = vld [vmem:[%s873_s1 + $0x278] sm:$0xff]  ;;  %v18_v21 = vld [vmem:[%s874_s0 + $0x20] sm:$0xff] }
  0x23   :  { %508 = vmatpush3.bf16.msra.mxu1 %v507_v35  ;;  %v539_v20 = vpack.c.bf16 %v99_v19, %v98_v18  ;;  %v339_v23 = vld [vmem:[%s875_s2] ss:$0 sm:$0xff] }
  0x24   :  { %188 = vmatmul.mubr.f32.vlgmr.msra.gmra.mrb[0].mxu0 %v14_v41 }
  0x25   :  { %512 = vmatpush3.bf16.msra.mxu0 %v511_v42  ;;  %327 = vmatprep.mubr.f32.mxu0 %v19_v49 }
  0x26   :  { %258 = vmatmul.mubr.f32.vlgmr.msra.gmra.mrb[0].mxu1 %v16_v43  ;;  %514 = vmatprep.subr.bf16.mxu0 %v513_v44 }
  0x29   :  { %516 = vmatpush3.bf16.msra.mxu0 %v515_v50 }
  0x2a   :  { %518 = vmatprep.subr.bf16.mxu0 %v517_v51 }
  0x2d   :  { %520 = vmatpush3.bf16.msra.mxu0 %v519_v56 }
  0x2e   :  { %522 = vmatprep.subr.bf16.mxu0 %v521_v57 }
  0x31   :  { %524 = vmatpush3.bf16.msra.mxu0 %v523_v62 }
  0x32   :  { %526 = vmatprep.subr.bf16.mxu0 %v525_v63 }
  0x35   :  { %528 = vmatpush3.bf16.msra.mxu0 %v527_v4 }
  0x36   :  { %530 = vmatprep.subr.bf16.mxu0 %v529_v5 }
  0x39   :  { %532 = vmatpush3.bf16.msra.mxu0 %v531_v10 }
  0x3a   :  { %534 = vmatprep.subr.bf16.mxu0 %v533_v11 }
  0x3d   :  { %536 = vmatpush3.bf16.msra.mxu0 %v535_v16 }
  0x3e   :  { %538 = vmatprep.subr.bf16.mxu0 %v537_v17 }
  0x41   :  { %540 = vmatpush3.bf16.msra.mxu0 %v539_v20 }
  0x44   :  { %328 = vmatmul.mubr.f32.vlgmr.msra.gmra.mrb[2].mxu0 %v18_v21 }
  0xf7   :  { %v372_v22 = vpop.f32.mrb[0].mxu0 }
  0xf8   :  { %v373_v24 = vpop.f32.mrb[1].mxu0 }
  0xf9   :  { %v407_v25 = vpop.f32.mrb[0].mxu1  ;;  %v374_v26 = vadd.f32 %v373_v24, %v372_v22 }
  0xfa   :  { %v408_v27 = vpop.f32.mrb[1].mxu1 }
  0xfb   :  { %v409_v28 = vadd.f32 %v408_v27, %v407_v25  ;;  %v190_v29 = vadd.f32 %v374_v26, %v339_v23 }
  0xfd   :  { %v260_v30 = vadd.f32 %v409_v28, %v190_v29 }
 0x117   :  { %v442_v31 = vpop.f32.mrb[2].mxu0 }
 0x118   :  { %v443_v32 = vpop.f32.mrb[3].mxu0 }
 0x119   :  { %v444_v33 = vadd.f32 %v443_v32, %v442_v31 }
 0x11b   :  { %v330_v34 = vadd.f32 %v444_v33, %v260_v30 }
 0x11d   :  { %334 = vst.msk [vmem:[%s876_s3] sm:$0xff] %vm333_vm0, %v330_v34 }

// kernel: _lambda_.27
= control target key start
LH: loop header
LB: loop body
LE: loop exit
PB: predicated region body
PF: predicated region fallthrough
CT: control target
= control target key end

     0   :  { %s758_s15 = smov 0   ;;  %s760_s16 = smov 0   ;;  %s854_s0 = inlined_call_operand.vmem [shape: f32[8,128], index: 0, kind: input, shape index: {}]   ;;  %s855_s1 = inlined_call_operand.vmem [shape: f32[1,128], index: 1, kind: input, shape index: {}]   ;;  %s856_s2 = inlined_call_operand.vmem [shape: f32[1,128], index: 2, kind: input, shape index: {}]   ;;  %s857_s3 = inlined_call_operand.vmem [shape: f32[128,128], index: 3, kind: input, shape index: {}]   ;;  %s858_s4 = inlined_call_operand.vmem [shape: f32[8,128], index: 4, kind: output, shape index: {}]  }
   0x1   :  { %s762_s17 = smov 0  }
   0x2 LB: > { %s26_s18 = sadd.s32 1, %s723_s16  ;;  %p509_p0 = scmp.ge.s32.totalorder %s727_s17, 1  ;;  %s727_s17 = sphi %s762_s17, %s14_s17   ;;  %s723_s16 = sphi %s760_s16, %s860_s16   ;;  %s719_s15 = sphi %s758_s15, %s859_s15  }
   0x3   : > { %p28_p1 = scmp.ge.s32.totalorder %s26_s18, 2  ;;  %p173_p2 = scmp.lt.s32.totalorder %s727_s17, 3 }
   0x5   : > { %s862_s18 = smov (%p28_p1, %s26_s18), 0  ;;  %p174_p3 = pnand %p509_p0, %p173_p2 }
   0x6   : > { %p205_p4 = scmp.eq.s32.totalorder (!%p174_p3), %s719_s15, 0 }
   0x7   : > { %177 = sbr.rel (%p174_p3) target bundleno = 321 (0x141), region = 36 }
   0xe   : > { %210 = sbr.rel (!%p205_p4) target bundleno = 21 (0x15), region = 40  ;;  %v729_v0 = vmov (%p205_p4), 0.0  }
   0xf   : > { %211 = vst [vmem:[#allocation2] sm:$0x1] (%p205_p4), %v729_v0  ;;  %212 = vst [vmem:[#allocation3] sm:$0x1] (%p205_p4), %v729_v0 }
  0x15 PF: > { %p511_p5 = scmp.ne.s32.totalorder %s719_s15, 0 }
  0x16   : > { %v216_v1 = vld [vmem:[%s854_s0] sm:$0xff] (!%p511_p5) }
  0x17   : > { %215 = sbr.rel (%p511_p5) target bundleno = 40 (0x28), region = 44  ;;  %v218_v2 = vrot.slane (!%p511_p5), %v216_v1, 4  ;;  %v227_v3 = vmul.f32 (!%p511_p5), %v216_v1, %v216_v1  ;;  %v217_v12 = vld [vmem:[#allocation2] sm:$0x1] (!%p511_p5)  ;;  %v226_v15 = vld [vmem:[#allocation3] sm:$0x1] (!%p511_p5) }
  0x19   : > { %v219_v4 = vadd.f32 (!%p511_p5), %v218_v2, %v216_v1  ;;  %v228_v5 = vrot.slane (!%p511_p5), %v227_v3, 4 }
  0x1b   : > { %v220_v6 = vrot.slane (!%p511_p5), %v219_v4, 2  ;;  %v229_v7 = vadd.f32 (!%p511_p5), %v228_v5, %v227_v3 }
  0x1d   : > { %v221_v8 = vadd.f32 (!%p511_p5), %v220_v6, %v219_v4  ;;  %v230_v9 = vrot.slane (!%p511_p5), %v229_v7, 2 }
  0x1f   : > { %v222_v10 = vrot.slane %v221_v8, 1  ;;  %v231_v11 = vadd.f32 %v230_v9, %v229_v7 }
  0x21   : > { %v223_v13 = vadd.f32 %v222_v10, %v221_v8  ;;  %v232_v14 = vrot.slane %v231_v11, 1 }
  0x23   : > { %v224_v16 = vadd.f32 %v223_v13, %v217_v12  ;;  %v233_v17 = vadd.f32 %v232_v14, %v231_v11 }
  0x25   : > { %225 = vst [vmem:[#allocation2] sm:$0x1] %v224_v16  ;;  %v234_v18 = vadd.f32 %v233_v17, %v226_v15 }
  0x27   : > { %235 = vst [vmem:[#allocation3] sm:$0x1] %v234_v18 }
  0x28 PF: > { %p236_p6 = scmp.eq.s32.totalorder %s719_s15, 1 }
  0x29   : > { %v242_v19 = vld [vmem:[%s857_s3] sm:$0xff] (%p236_p6)  ;;  %v243_v20 = vld [vmem:[%s857_s3 + $0x8] sm:$0xff] (%p236_p6)  ;;  %v244_v21 = vld [vmem:[%s857_s3 + $0x10] sm:$0xff] (%p236_p6)  ;;  %v730_v22 = vmov (%p236_p6), 0.0|0.0   ;;  %vm731_vm0 = vmmov (%p236_p6), 0   ;;  %v732_v25 = vmov (%p236_p6), 0.0  }
  0x2a   : > { %240 = sbr.rel (!%p236_p6) target bundleno = 307 (0x133), region = 48  ;;  %627 = vmatprep.subr.bf16.mxu0 (%p236_p6), %v730_v22  ;;  %v628_v23 = vpack.c.bf16 (%p236_p6), %v243_v20, %v242_v19  ;;  %651 = vmatprep.subr.bf16.mxu1 (%p236_p6), %v730_v22  ;;  %v245_v24 = vld [vmem:[%s857_s3 + $0x18] sm:$0xff] (%p236_p6)  ;;  %v246_v27 = vld [vmem:[%s857_s3 + $0x20] sm:$0xff] (%p236_p6)  ;;  %v247_v28 = vld [vmem:[%s857_s3 + $0x28] sm:$0xff] (%p236_p6) }
  0x2b   : > { %589 = vmatprep.mubr.msk.f32.mxu0 (%p236_p6), %vm731_vm0, %v732_v25  ;;  %624 = vmatprep.mubr.msk.f32.mxu1 (%p236_p6), %vm731_vm0, %v732_v25  ;;  %v631_v26 = vpack.c.bf16 (%p236_p6), %v245_v24, %v244_v21  ;;  %v634_v29 = vpack.c.bf16 (%p236_p6), %v247_v28, %v246_v27  ;;  %v248_v30 = vld [vmem:[%s857_s3 + $0x30] sm:$0xff] (%p236_p6)  ;;  %v249_v31 = vld [vmem:[%s857_s3 + $0x38] sm:$0xff] (%p236_p6)  ;;  %v250_v33 = vld [vmem:[%s857_s3 + $0x40] sm:$0xff] (%p236_p6) }
  0x2c   : > { %629 = vmatpush3.bf16.msra.mxu0 (%p236_p6), %v628_v23  ;;  %653 = vmatpush3.bf16.msra.mxu1 (%p236_p6), %v628_v23  ;;  %v637_v32 = vpack.c.bf16 (%p236_p6), %v249_v31, %v248_v30  ;;  %v251_v34 = vld [vmem:[%s857_s3 + $0x48] sm:$0xff] (%p236_p6)  ;;  %v252_v36 = vld [vmem:[%s857_s3 + $0x50] sm:$0xff] (%p236_p6)  ;;  %v253_v37 = vld [vmem:[%s857_s3 + $0x58] sm:$0xff] (%p236_p6) }
  0x2d   : > { %630 = vmatprep.subr.bf16.mxu0 (%p236_p6), %v730_v22  ;;  %654 = vmatprep.subr.bf16.mxu1 (%p236_p6), %v730_v22  ;;  %v640_v35 = vpack.c.bf16 (%p236_p6), %v251_v34, %v250_v33  ;;  %v643_v38 = vpack.c.bf16 (%p236_p6), %v253_v37, %v252_v36  ;;  %v254_v39 = vld [vmem:[%s857_s3 + $0x60] sm:$0xff] (%p236_p6)  ;;  %v255_v40 = vld [vmem:[%s857_s3 + $0x68] sm:$0xff] (%p236_p6)  ;;  %v256_v42 = vld [vmem:[%s857_s3 + $0x70] sm:$0xff] (%p236_p6) }
  0x2e   : > { %v646_v41 = vpack.c.bf16 (%p236_p6), %v255_v40, %v254_v39  ;;  %v257_v43 = vld [vmem:[%s857_s3 + $0x78] sm:$0xff] (%p236_p6)  ;;  %v241_v45 = vld [vmem:[#allocation2] sm:$0x1] (%p236_p6)  ;;  %v328_v46 = vld [vmem:[#allocation3] sm:$0x1] (%p236_p6) }
  0x2f   : > { %v649_v44 = vpack.c.bf16 (%p236_p6), %v257_v43, %v256_v42 }
  0x30   : > { %632 = vmatpush3.bf16.msra.mxu0 (%p236_p6), %v631_v26  ;;  %656 = vmatpush3.bf16.msra.mxu1 (%p236_p6), %v631_v26 }
  0x31   : > { %633 = vmatprep.subr.bf16.mxu0 %v730_v22  ;;  %657 = vmatprep.subr.bf16.mxu1 %v730_v22 }
  0x34   : > { %635 = vmatpush3.bf16.msra.mxu0 %v634_v29  ;;  %659 = vmatpush3.bf16.msra.mxu1 %v634_v29 }
  0x35   : > { %636 = vmatprep.subr.bf16.mxu0 %v730_v22  ;;  %660 = vmatprep.subr.bf16.mxu1 %v730_v22 }
  0x38   : > { %638 = vmatpush3.bf16.msra.mxu0 %v637_v32  ;;  %662 = vmatpush3.bf16.msra.mxu1 %v637_v32 }
  0x39   : > { %639 = vmatprep.subr.bf16.mxu0 %v730_v22  ;;  %663 = vmatprep.subr.bf16.mxu1 %v730_v22 }
  0x3c   : > { %641 = vmatpush3.bf16.msra.mxu0 %v640_v35  ;;  %665 = vmatpush3.bf16.msra.mxu1 %v640_v35 }
  0x3d   : > { %642 = vmatprep.subr.bf16.mxu0 %v730_v22  ;;  %666 = vmatprep.subr.bf16.mxu1 %v730_v22 }
  0x40   : > { %644 = vmatpush3.bf16.msra.mxu0 %v643_v38  ;;  %668 = vmatpush3.bf16.msra.mxu1 %v643_v38 }
  0x41   : > { %645 = vmatprep.subr.bf16.mxu0 %v730_v22  ;;  %669 = vmatprep.subr.bf16.mxu1 %v730_v22 }
  0x44   : > { %647 = vmatpush3.bf16.msra.mxu0 %v646_v41  ;;  %671 = vmatpush3.bf16.msra.mxu1 %v646_v41 }
  0x45   : > { %648 = vmatprep.subr.bf16.mxu0 %v730_v22  ;;  %672 = vmatprep.subr.bf16.mxu1 %v730_v22 }
  0x48   : > { %650 = vmatpush3.bf16.msra.mxu0 %v649_v44  ;;  %674 = vmatpush3.bf16.msra.mxu1 %v649_v44 }
  0x4b   : > { %590 = vmatmul.mubr.f32.vlgmr.msra.gmra.mrb[0].mxu0 %v241_v45  ;;  %625 = vmatmul.mubr.f32.vlgmr.msra.gmra.mrb[0].mxu1 %v328_v46 }
 0x11e   : > { %v324_v47 = vpop.f32.mrb[0].mxu0  ;;  %v395_v48 = vpop.f32.mrb[0].mxu1 }
 0x11f   : > { %v399_v49 = vmul.f32 0.125, %v324_v47  ;;  %v591_v50 = vpop.f32.mrb[1].mxu0  ;;  %v400_v51 = vmul.f32 0.125, %v395_v48  ;;  %v626_v52 = vpop.f32.mrb[1].mxu1 }
 0x121   : > { %v401_v53 = vmul.f32 %v399_v49, %v399_v49  ;;  %403 = vst [vmem:[#allocation2] sm:$0x1] %v399_v49 }
 0x123   : > { %v402_v54 = vsub.f32 %v400_v51, %v401_v53 }
 0x125   : > { %v404_v55 = vadd.f32 1e-05, %v402_v54 }
 0x127   : > { %703 = vrsqrt.f32 %v404_v55 }
 0x131   : > { %v704_v56 = vpop.eup %703 }
 0x132   : > { %406 = vst [vmem:[#allocation3] sm:$0x1] %v704_v56 }
 0x133 PF: > { %p513_p7 = scmp.ne.s32.totalorder %s719_s15, 1 }
 0x134   : > { %v410_v57 = vld [vmem:[%s854_s0] sm:$0xff] (!%p513_p7) }
 0x135   : > { %409 = sbr.rel (%p513_p7) target bundleno = 321 (0x141), region = 52  ;;  %v514_v58 = vld [vmem:[#allocation2] ss:$0 sm:$0xff] (!%p513_p7) }
 0x136   : > { %v418_v60 = vsub.f32 (!%p513_p7), %v410_v57, %v514_v58  ;;  %v516_v61 = vld [vmem:[%s855_s1] ss:$0 sm:$0xff] (!%p513_p7) }
 0x137   : > { %v517_v63 = vld [vmem:[%s856_s2] ss:$0 sm:$0xff] (!%p513_p7) }
 0x139   : > { %v515_v59 = vld [vmem:[#allocation3] ss:$0 sm:$0xff] (!%p513_p7) }
 0x13a   : > { %v426_v62 = vmul.f32 (!%p513_p7), %v515_v59, %v418_v60 }
 0x13c   : > { %v434_v0 = vmul.f32 %v516_v61, %v426_v62 }
 0x13e   : > { %v442_v1 = vadd.f32 %v517_v63, %v434_v0 }
 0x140   : > { %443 = vst [vmem:[%s858_s4] sm:$0xff] %v442_v1 }
 0x141 PF: > { %s14_s17 = sadd.s32 1, %s727_s17   ;;  %s859_s15 = smov %s723_s16 }
 0x142   : > { %p11_p8 = scmp.ge.s32.totalorder %s14_s17, 4   ;;  %s860_s16 = smov %s862_s18 }
 0x144   :  { %13 = sbr.rel (!%p11_p8) target bundleno = 2 (0x2), region = 82 }

</bundles_post_ra>
